<compile_context>
chip_gen: v7x
topology: tpu7x:2x2x1
jax: 0.10.0
libtpu: 0.0.40
codegen_flags: <defaults>
</compile_context>

<pallas_src>
import functools

import jax
import jax.numpy as jnp
from jax.experimental import pallas as pl
from jax.experimental.pallas import tpu as pltpu

BN_EPS = 1e-5


def encoder_head_kernel(feat_ref, w_ref, p_ref, out_ref, *, inv_hw):
    # feat_ref: (B, tc, HW)  native-layout feature slab (any float dtype)
    # w_ref:    (tc, E)      bf16 Linear weight slab (pre-transposed)
    # p_ref:    (8, E)       f32, rows = [bias, gamma, beta, 0...]
    # out_ref:  (B, E)       f32 — doubles as the accumulator across k
    k = pl.program_id(0)

    @pl.when(k == 0)
    def _():
        out_ref[...] = jnp.zeros_like(out_ref)

    # Adaptive-avg-pool contribution of this channel slab: sum over the lane
    # (HW) axis in f32; the 1/HW scale is folded into the epilogue.
    pooled = jnp.sum(feat_ref[...].astype(jnp.float32), axis=-1)      # (B, tc)

    # Partial Linear on the bf16 MXU path, f32 accumulation into the
    # resident output block.
    out_ref[...] += jnp.dot(pooled.astype(jnp.bfloat16), w_ref[...],
                            preferred_element_type=jnp.float32)       # (B, E)

    @pl.when(k == pl.num_programs(0) - 1)
    def _():
        params = p_ref[...]
        bias = params[0:1, :]
        gamma = params[1:2, :]
        beta = params[2:3, :]

        emb = out_ref[...] * inv_hw + bias                            # (B, E)

        # BatchNorm1d, training-mode batch statistics (biased variance).
        mean = jnp.mean(emb, axis=0, keepdims=True)
        d = emb - mean
        var = jnp.mean(d * d, axis=0, keepdims=True)

        inv = jax.lax.rsqrt(var + BN_EPS)                 # EUP slot
        scale = gamma * inv                               # (1, E)
        shift = beta - mean * scale                       # (1, E)
        out_ref[...] = emb * scale + shift


def _pick_channel_tile(batch, channels, hw, embed, feat_bytes):
    """Pick the channel slab size and an explicit VMEM limit from the
    queried per-core physical VMEM (v5e/v6e: 128 MiB, v7x: 64 MiB)."""
    try:
        info = pltpu.get_tpu_info()
        phys = int(getattr(info, "vmem_capacity_bytes", 0)) or (64 << 20)
    except Exception:
        phys = 64 << 20   # conservative fallback (v7x per-core)
    budget = phys // 2    # leave headroom for compiler scratch / spills

    def vmem_need(tc):
        feat = 2 * batch * tc * hw * feat_bytes    # double-buffered feature slab
        wts = 2 * tc * embed * 2                   # double-buffered bf16 W slab
        fixed = 2 * batch * embed * 4 + 2 * 8 * embed * 4
        return feat + wts + fixed

    candidates = [t for t in (512, 256, 128) if channels % t == 0]
    if not candidates:
        # TODO(synk): channel counts with no 128-multiple divisor fall back to
        # a single full-extent slab (relies on the full-dim block exception).
        candidates = [channels]
    tc = candidates[-1]                 # smallest valid; upgraded if it fits
    for t in candidates:
        if vmem_need(t) <= budget:
            tc = t
            break
    vmem_limit = int(min(phys, max(32 << 20, vmem_need(tc) + (16 << 20))))
    return tc, vmem_limit


def encoder_cnn_head(feat_map, w_t, b, gamma, beta):
    """feat_map: (B, C, H, W) backbone features in their native layout.
    w_t: (C, E) = Linear weight pre-transposed; b/gamma/beta: (E,)."""
    B, C, H, W = feat_map.shape
    E = w_t.shape[1]
    HW = H * W

    # Contiguous reshape only (metadata; no extra HBM pass over the features).
    feats = feat_map.reshape(B, C, HW)

    # bf16 weights for the MXU; accumulation stays f32 inside the kernel.
    w_bf16 = w_t.astype(jnp.bfloat16)

    # Pack bias / gamma / beta into a single (8, E) f32 input (one tiny DMA).
    params = jnp.zeros((8, E), jnp.float32)
    params = params.at[0].set(b.astype(jnp.float32))
    params = params.at[1].set(gamma.astype(jnp.float32))
    params = params.at[2].set(beta.astype(jnp.float32))

    feat_bytes = feats.dtype.itemsize
    tc, vmem_limit = _pick_channel_tile(B, C, HW, E, feat_bytes)
    nk = C // tc if C % tc == 0 else 1

    cost = pl.CostEstimate(
        flops=int(2 * B * C * E + B * C * HW),
        transcendentals=int(E),
        bytes_accessed=int(feats.size * feat_bytes + C * E * 2
                           + B * E * 4 + 8 * E * 4),
    )

    out = pl.pallas_call(
        functools.partial(encoder_head_kernel, inv_hw=1.0 / HW),
        out_shape=jax.ShapeDtypeStruct((B, E), jnp.float32),
        grid=(nk,),
        in_specs=[
            # Feature slab: B full extent, tc channels on sublanes, HW
            # full-extent on lanes (full-dim exception; no padding needed).
            pl.BlockSpec((B, tc, HW), lambda k: (0, k, 0)),
            pl.BlockSpec((tc, E), lambda k: (k, 0)),
            pl.BlockSpec((8, E), lambda k: (0, 0)),
        ],
        out_specs=pl.BlockSpec((B, E), lambda k: (0, 0)),
        compiler_params=pltpu.CompilerParams(
            dimension_semantics=("arbitrary",),
            vmem_limit_bytes=vmem_limit),
        cost_estimate=cost,
    )(feats, w_bf16, params)

    return out


def reference_head(feat_map, w_t, b, gamma, beta):
    """Pure-JAX f32 reference (pool -> flatten -> Linear -> BatchNorm1d)."""
    B, C, H, W = feat_map.shape
    pooled = feat_map.reshape(B, C, H * W).astype(jnp.float32).mean(axis=-1)
    emb = pooled @ w_t.astype(jnp.float32) + b[None, :]
    mean = emb.mean(axis=0, keepdims=True)
    var = ((emb - mean) ** 2).mean(axis=0, keepdims=True)
    return (emb - mean) / jnp.sqrt(var + BN_EPS) * gamma[None, :] + beta[None, :]


if __name__ == "__main__":
    # Small, deterministic stand-in shapes:
    #   backbone feature map: B=8, C_feat=512 (stand-in for 2048), H=W=4
    #   embed_size = 256 (as in the module)
    B, C_FEAT, H, W = 8, 512, 4, 4
    EMBED = 256

    key = jax.random.PRNGKey(0)
    k_feat, k_w, k_b = jax.random.split(key, 3)

    feat_map = jax.random.normal(k_feat, (B, C_FEAT, H, W), dtype=jnp.float32)

    # Linear(resnet.fc.in_features, embed_size): weight (E, C) -> pass W^T (C, E)
    w_t = jax.random.normal(k_w, (C_FEAT, EMBED), dtype=jnp.float32) * 0.02
    b = jax.random.normal(k_b, (EMBED,), dtype=jnp.float32) * 0.01
    # BatchNorm1d(embed_size) default init
    gamma = jnp.ones((EMBED,), dtype=jnp.float32)
    beta = jnp.zeros((EMBED,), dtype=jnp.float32)

    out = encoder_cnn_head(feat_map, w_t, b, gamma, beta)
    out = jax.block_until_ready(out)

    # The kernel runs the Linear on the bf16 MXU path (f32 accumulation); the
    # reference is full f32, so allow a small quantization tolerance.
    ref = reference_head(feat_map, w_t, b, gamma, beta)
    assert out.shape == (B, EMBED)
    assert jnp.allclose(out, ref, rtol=2e-2, atol=2e-2), "mismatch vs reference"

    print("KERNEL_OK")
</pallas_src>

<mosaic_0001>
module attributes {stable_mosaic.version = 11 : i64} {
  func.func @encoder_head_kernel(%arg0: i32, %arg1: memref<8x512x16xf32, #tpu.memory_space<vmem>>, %arg2: memref<512x256xbf16, #tpu.memory_space<vmem>>, %arg3: memref<8x256xf32, #tpu.memory_space<vmem>>, %arg4: memref<8x256xf32, #tpu.memory_space<vmem>>) attributes {dimension_semantics = [#tpu.dimension_semantics<arbitrary>], iteration_bounds = array<i64: 1>, scalar_prefetch = 0 : i64, scratch_operands = 0 : i64, tpu.core_type = #tpu.core_type<tc>, window_params = [{transform_indices = @transform_0, window_bounds = array<i64: 8, 512, 16>}, {transform_indices = @transform_1, window_bounds = array<i64: 512, 256>}, {pipeline_mode = #tpu.pipeline_mode<synchronous>, transform_indices = @transform_2, window_bounds = array<i64: 8, 256>}, {pipeline_mode = #tpu.pipeline_mode<synchronous>, transform_indices = @transform_3, window_bounds = array<i64: 8, 256>}]} {
    %c0_i32 = arith.constant 0 : i32
    %0 = arith.cmpi eq, %arg0, %c0_i32 : i32
    %1 = arith.extui %0 : i1 to i32
    %c0_i32_0 = arith.constant 0 : i32
    %2 = arith.cmpi ne, %1, %c0_i32_0 : i32
    scf.if %2 {
      %cst_12 = arith.constant 0.000000e+00 : f32
      %14 = vector.broadcast %cst_12 : f32 to vector<8x256xf32>
      %c0_13 = arith.constant 0 : index
      %c0_14 = arith.constant 0 : index
      %15 = vector.load %arg4[%c0_13, %c0_14] : memref<8x256xf32, #tpu.memory_space<vmem>>, vector<8x256xf32>
      tpu.vector_store %arg4[%c0_13, %c0_14], %14 {strides = array<i32>} : memref<8x256xf32, #tpu.memory_space<vmem>>, vector<8x256xf32>,
    } else {
    }
    %c0 = arith.constant 0 : index
    %c0_1 = arith.constant 0 : index
    %c0_2 = arith.constant 0 : index
    %3 = vector.load %arg1[%c0, %c0_1, %c0_2] : memref<8x512x16xf32, #tpu.memory_space<vmem>>, vector<8x512x16xf32>
    %cst = arith.constant dense<0.000000e+00> : vector<8x512xf32>
    %4 = vector.multi_reduction <add>, %3, %cst [2] : vector<8x512x16xf32> to vector<8x512xf32>
    %c0_3 = arith.constant 0 : index
    %c0_4 = arith.constant 0 : index
    %5 = vector.load %arg4[%c0_3, %c0_4] : memref<8x256xf32, #tpu.memory_space<vmem>>, vector<8x256xf32>
    %6 = arith.truncf %4 : vector<8x512xf32> to vector<8x512xbf16>
    %c0_5 = arith.constant 0 : index
    %c0_6 = arith.constant 0 : index
    %7 = vector.load %arg2[%c0_5, %c0_6] : memref<512x256xbf16, #tpu.memory_space<vmem>>, vector<512x256xbf16>
    %cst_7 = arith.constant dense<0.000000e+00> : vector<8x256xf32>
    %8 = tpu.matmul %6, %7, %cst_7 {dimension_numbers = #tpu.dot_dimension_numbers<[1], [0], [0], [1], [0, 0, 1, 1], [], []>} : vector<8x512xbf16>, vector<512x256xbf16>, vector<8x256xf32> -> vector<8x256xf32>
    %9 = arith.addf %5, %8 : vector<8x256xf32>
    %c0_8 = arith.constant 0 : index
    %c0_9 = arith.constant 0 : index
    %10 = vector.load %arg4[%c0_8, %c0_9] : memref<8x256xf32, #tpu.memory_space<vmem>>, vector<8x256xf32>
    tpu.vector_store %arg4[%c0_8, %c0_9], %9 {strides = array<i32>} : memref<8x256xf32, #tpu.memory_space<vmem>>, vector<8x256xf32>,
    %c0_i32_10 = arith.constant 0 : i32
    %11 = arith.cmpi eq, %arg0, %c0_i32_10 : i32
    %12 = arith.extui %11 : i1 to i32
    %c0_i32_11 = arith.constant 0 : i32
    %13 = arith.cmpi ne, %12, %c0_i32_11 : i32
    scf.if %13 {
      %c0_12 = arith.constant 0 : index
      %c0_13 = arith.constant 0 : index
      %14 = vector.load %arg3[%c0_12, %c0_13] : memref<8x256xf32, #tpu.memory_space<vmem>>, vector<8x256xf32>
      %15 = vector.extract_strided_slice %14 {offsets = [0, 0], sizes = [1, 256], strides = [1, 1]} : vector<8x256xf32> to vector<1x256xf32>
      %16 = vector.extract_strided_slice %14 {offsets = [1, 0], sizes = [1, 256], strides = [1, 1]} : vector<8x256xf32> to vector<1x256xf32>
      %17 = vector.extract_strided_slice %14 {offsets = [2, 0], sizes = [1, 256], strides = [1, 1]} : vector<8x256xf32> to vector<1x256xf32>
      %c0_14 = arith.constant 0 : index
      %c0_15 = arith.constant 0 : index
      %18 = vector.load %arg4[%c0_14, %c0_15] : memref<8x256xf32, #tpu.memory_space<vmem>>, vector<8x256xf32>
      %cst_16 = arith.constant 6.250000e-02 : f32
      %19 = vector.broadcast %cst_16 : f32 to vector<8x256xf32>
      %20 = arith.mulf %18, %19 : vector<8x256xf32>
      %21 = vector.broadcast %15 : vector<1x256xf32> to vector<8x256xf32>
      %22 = arith.addf %20, %21 : vector<8x256xf32>
      %cst_17 = arith.constant dense<0.000000e+00> : vector<256xf32>
      %23 = vector.multi_reduction <add>, %22, %cst_17 [0] : vector<8x256xf32> to vector<256xf32>
      %24 = vector.shape_cast %23 : vector<256xf32> to vector<1x256xf32>
      %cst_18 = arith.constant 8.000000e+00 : f32
      %25 = vector.broadcast %cst_18 : f32 to vector<1x256xf32>
      %26 = arith.divf %24, %25 : vector<1x256xf32>
      %27 = vector.broadcast %26 : vector<1x256xf32> to vector<8x256xf32>
      %28 = arith.subf %22, %27 : vector<8x256xf32>
      %29 = arith.mulf %28, %28 : vector<8x256xf32>
      %cst_19 = arith.constant dense<0.000000e+00> : vector<256xf32>
      %30 = vector.multi_reduction <add>, %29, %cst_19 [0] : vector<8x256xf32> to vector<256xf32>
      %31 = vector.shape_cast %30 : vector<256xf32> to vector<1x256xf32>
      %cst_20 = arith.constant 8.000000e+00 : f32
      %32 = vector.broadcast %cst_20 : f32 to vector<1x256xf32>
      %33 = arith.divf %31, %32 : vector<1x256xf32>
      %cst_21 = arith.constant 9.99999974E-6 : f32
      %34 = vector.broadcast %cst_21 : f32 to vector<1x256xf32>
      %35 = arith.addf %33, %34 : vector<1x256xf32>
      %36 = math.rsqrt %35 : vector<1x256xf32>
      %37 = arith.mulf %16, %36 : vector<1x256xf32>
      %38 = arith.mulf %26, %37 : vector<1x256xf32>
      %39 = arith.subf %17, %38 : vector<1x256xf32>
      %40 = vector.broadcast %37 : vector<1x256xf32> to vector<8x256xf32>
      %41 = arith.mulf %22, %40 : vector<8x256xf32>
      %42 = vector.broadcast %39 : vector<1x256xf32> to vector<8x256xf32>
      %43 = arith.addf %41, %42 : vector<8x256xf32>
      %c0_22 = arith.constant 0 : index
      %c0_23 = arith.constant 0 : index
      %44 = vector.load %arg4[%c0_22, %c0_23] : memref<8x256xf32, #tpu.memory_space<vmem>>, vector<8x256xf32>
      tpu.vector_store %arg4[%c0_22, %c0_23], %43 {strides = array<i32>} : memref<8x256xf32, #tpu.memory_space<vmem>>, vector<8x256xf32>,
    } else {
    }
    return
  }
  func.func @transform_0(%arg0: i32) -> (i32, i32, i32) {
    %c0_i32 = arith.constant 0 : i32
    %c0_i32_0 = arith.constant 0 : i32
    %c0_i32_1 = arith.constant 0 : i32
    return %c0_i32, %arg0, %c0_i32_0 : i32, i32, i32
  }
  func.func @transform_1(%arg0: i32) -> (i32, i32) {
    %c0_i32 = arith.constant 0 : i32
    %c0_i32_0 = arith.constant 0 : i32
    return %arg0, %c0_i32 : i32, i32
  }
  func.func @transform_2(%arg0: i32) -> (i32, i32) {
    %c0_i32 = arith.constant 0 : i32
    %c0_i32_0 = arith.constant 0 : i32
    %c0_i32_1 = arith.constant 0 : i32
    return %c0_i32, %c0_i32_0 : i32, i32
  }
  func.func @transform_3(%arg0: i32) -> (i32, i32) {
    %c0_i32 = arith.constant 0 : i32
    %c0_i32_0 = arith.constant 0 : i32
    %c0_i32_1 = arith.constant 0 : i32
    return %c0_i32, %c0_i32_0 : i32, i32
  }
}

</mosaic_0001>

<bundles_post_ra>
// kernel: tpu_custom_call.1
= control target key start
LH: loop header
LB: loop body
LE: loop exit
PB: predicated region body
PF: predicated region fallthrough
CT: control target
= control target key end

     0   :  { %vm533_vm0 = vcmask 130048   ;;  %s10149_s0 = inlined_call_operand.vmem [shape: f32[8,512,16], index: 0, kind: input, shape index: {}]   ;;  %s10150_s1 = inlined_call_operand.vmem [shape: bf16[512,256], index: 1, kind: input, shape index: {}]   ;;  %s10151_s2 = inlined_call_operand.vmem [shape: f32[8,256], index: 2, kind: input, shape index: {}]   ;;  %s10152_s3 = inlined_call_operand.hbm [shape: f32[8,256], index: 3, kind: output, shape index: {}]  }
   0x1   :  { %v23_v0 = vld [vmem:[%s10149_s0 + $0x10] sm:$0xff]  ;;  %v21_v1 = vld [vmem:[%s10149_s0] sm:$0xff]  ;;  %v24_v2 = vld [vmem:[%s10149_s0 + $0x18] sm:$0xff] }
   0x2   :  { %v540_v3 = vsel %vm533_vm0, %v23_v0, 0.0  ;;  %v534_v4 = vsel %vm533_vm0, %v21_v1, 0.0  ;;  %v22_v5 = vld [vmem:[%s10149_s0 + $0x8] sm:$0xff]  ;;  %v543_v6 = vsel %vm533_vm0, %v24_v2, 0.0  ;;  %v25_v9 = vld [vmem:[%s10149_s0 + $0x20] sm:$0xff]  ;;  %v28_v12 = vld [vmem:[%s10149_s0 + $0x38] sm:$0xff] }
   0x3   :  { %541 = vadd.xlane.f32.xlu1 %v540_v3  ;;  %535 = vadd.xlane.f32.xlu0 %v534_v4  ;;  %v537_v7 = vsel %vm533_vm0, %v22_v5, 0.0  ;;  %v26_v8 = vld [vmem:[%s10149_s0 + $0x28] sm:$0xff]  ;;  %v546_v11 = vsel %vm533_vm0, %v25_v9, 0.0  ;;  %v27_v13 = vld [vmem:[%s10149_s0 + $0x30] sm:$0xff]  ;;  %v555_v14 = vsel %vm533_vm0, %v28_v12, 0.0  ;;  %v29_v17 = vld [vmem:[%s10149_s0 + $0x40] sm:$0xff] }
   0x4   :  { %v549_v10 = vsel %vm533_vm0, %v26_v8, 0.0  ;;  %v552_v15 = vsel %vm533_vm0, %v27_v13, 0.0  ;;  %v30_v16 = vld [vmem:[%s10149_s0 + $0x48] sm:$0xff]  ;;  %v558_v19 = vsel %vm533_vm0, %v29_v17, 0.0  ;;  %v32_v20 = vld [vmem:[%s10149_s0 + $0x58] sm:$0xff]  ;;  %v31_v21 = vld [vmem:[%s10149_s0 + $0x50] sm:$0xff] }
   0x5   :  { %v561_v18 = vsel %vm533_vm0, %v30_v16, 0.0  ;;  %v567_v22 = vsel %vm533_vm0, %v32_v20, 0.0  ;;  %v564_v23 = vsel %vm533_vm0, %v31_v21, 0.0  ;;  %v34_v24 = vld [vmem:[%s10149_s0 + $0x68] sm:$0xff]  ;;  %v33_v25 = vld [vmem:[%s10149_s0 + $0x60] sm:$0xff]  ;;  %v36_v28 = vld [vmem:[%s10149_s0 + $0x78] sm:$0xff] }
   0x6   :  { %v573_v26 = vsel %vm533_vm0, %v34_v24, 0.0  ;;  %v570_v27 = vsel %vm533_vm0, %v33_v25, 0.0  ;;  %v35_v29 = vld [vmem:[%s10149_s0 + $0x70] sm:$0xff]  ;;  %v38_v30 = vld [vmem:[%s10149_s0 + $0x88] sm:$0xff]  ;;  %v37_v31 = vld [vmem:[%s10149_s0 + $0x80] sm:$0xff]  ;;  %v579_v32 = vsel %vm533_vm0, %v36_v28, 0.0 }
   0x7   :  { %544 = vadd.xlane.f32.xlu1 %v543_v6  ;;  %538 = vadd.xlane.f32.xlu0 %v537_v7  ;;  %v576_v33 = vsel %vm533_vm0, %v35_v29, 0.0  ;;  %v40_v34 = vld [vmem:[%s10149_s0 + $0x98] sm:$0xff]  ;;  %v39_v35 = vld [vmem:[%s10149_s0 + $0x90] sm:$0xff]  ;;  %v585_v36 = vsel %vm533_vm0, %v38_v30, 0.0  ;;  %v582_v37 = vsel %vm533_vm0, %v37_v31, 0.0  ;;  %v42_v38 = vld [vmem:[%s10149_s0 + $0xa8] sm:$0xff] }
   0x8   :  { %v41_v39 = vld [vmem:[%s10149_s0 + $0xa0] sm:$0xff]  ;;  %v591_v40 = vsel %vm533_vm0, %v40_v34, 0.0  ;;  %v588_v41 = vsel %vm533_vm0, %v39_v35, 0.0  ;;  %v44_v42 = vld [vmem:[%s10149_s0 + $0xb8] sm:$0xff]  ;;  %v43_v43 = vld [vmem:[%s10149_s0 + $0xb0] sm:$0xff]  ;;  %v597_v44 = vsel %vm533_vm0, %v42_v38, 0.0 }
   0x9   :  { %v594_v45 = vsel %vm533_vm0, %v41_v39, 0.0  ;;  %v46_v46 = vld [vmem:[%s10149_s0 + $0xc8] sm:$0xff]  ;;  %v45_v47 = vld [vmem:[%s10149_s0 + $0xc0] sm:$0xff]  ;;  %v603_v48 = vsel %vm533_vm0, %v44_v42, 0.0  ;;  %v600_v49 = vsel %vm533_vm0, %v43_v43, 0.0  ;;  %v48_v50 = vld [vmem:[%s10149_s0 + $0xd8] sm:$0xff] }
   0xa   :  { %v47_v51 = vld [vmem:[%s10149_s0 + $0xd0] sm:$0xff]  ;;  %v609_v52 = vsel %vm533_vm0, %v46_v46, 0.0  ;;  %v606_v53 = vsel %vm533_vm0, %v45_v47, 0.0  ;;  %v50_v54 = vld [vmem:[%s10149_s0 + $0xe8] sm:$0xff]  ;;  %v49_v55 = vld [vmem:[%s10149_s0 + $0xe0] sm:$0xff]  ;;  %v615_v56 = vsel %vm533_vm0, %v48_v50, 0.0 }
   0xb   :  { %550 = vadd.xlane.f32.xlu1 %v549_v10  ;;  %547 = vadd.xlane.f32.xlu0 %v546_v11  ;;  %v612_v57 = vsel %vm533_vm0, %v47_v51, 0.0 }
   0xf   :  { %556 = vadd.xlane.f32.xlu1 %v555_v14  ;;  %553 = vadd.xlane.f32.xlu0 %v552_v15 }
  0x13   :  { %562 = vadd.xlane.f32.xlu1 %v561_v18  ;;  %559 = vadd.xlane.f32.xlu0 %v558_v19 }
  0x17   :  { %568 = vadd.xlane.f32.xlu1 %v567_v22  ;;  %565 = vadd.xlane.f32.xlu0 %v564_v23 }
  0x1b   :  { %574 = vadd.xlane.f32.xlu1 %v573_v26  ;;  %571 = vadd.xlane.f32.xlu0 %v570_v27 }
  0x1f   :  { %580 = vadd.xlane.f32.xlu1 %v579_v32  ;;  %577 = vadd.xlane.f32.xlu0 %v576_v33 }
  0x23   :  { %586 = vadd.xlane.f32.xlu1 %v585_v36  ;;  %583 = vadd.xlane.f32.xlu0 %v582_v37 }
  0x27   :  { %592 = vadd.xlane.f32.xlu1 %v591_v40  ;;  %589 = vadd.xlane.f32.xlu0 %v588_v41 }
  0x2b   :  { %598 = vadd.xlane.f32.xlu1 %v597_v44  ;;  %595 = vadd.xlane.f32.xlu0 %v594_v45 }
  0x2f   :  { %604 = vadd.xlane.f32.xlu1 %v603_v48  ;;  %601 = vadd.xlane.f32.xlu0 %v600_v49 }
  0x33   :  { %610 = vadd.xlane.f32.xlu1 %v609_v52  ;;  %607 = vadd.xlane.f32.xlu0 %v606_v53 }
  0x34   :  { %8 = vsyncpa [#allocation3], 0  ;;  %v621_v58 = vsel %vm533_vm0, %v50_v54, 0.0  ;;  %v618_v59 = vsel %vm533_vm0, %v49_v55, 0.0  ;;  %v52_v60 = vld [vmem:[%s10149_s0 + $0xf8] sm:$0xff]  ;;  %v51_v61 = vld [vmem:[%s10149_s0 + $0xf0] sm:$0xff] }
  0x35   :  { %v627_v62 = vsel %vm533_vm0, %v52_v60, 0.0  ;;  %v624_v63 = vsel %vm533_vm0, %v51_v61, 0.0  ;;  %v54_v0 = vld [vmem:[%s10149_s0 + $0x108] sm:$0xff]  ;;  %v53_v1 = vld [vmem:[%s10149_s0 + $0x100] sm:$0xff]  ;;  %v56_v4 = vld [vmem:[%s10149_s0 + $0x118] sm:$0xff]  ;;  %vm3171_vm1 = vcmask 130112  }
  0x36   :  { %v633_v2 = vsel %vm533_vm0, %v54_v0, 0.0  ;;  %v630_v3 = vsel %vm533_vm0, %v53_v1, 0.0  ;;  %v55_v5 = vld [vmem:[%s10149_s0 + $0x110] sm:$0xff]  ;;  %v639_v6 = vsel %vm533_vm0, %v56_v4, 0.0  ;;  %v58_v8 = vld [vmem:[%s10149_s0 + $0x128] sm:$0xff]  ;;  %v57_v9 = vld [vmem:[%s10149_s0 + $0x120] sm:$0xff] }
  0x37   :  { %616 = vadd.xlane.f32.xlu1 %v615_v56  ;;  %613 = vadd.xlane.f32.xlu0 %v612_v57  ;;  %v636_v7 = vsel %vm533_vm0, %v55_v5, 0.0  ;;  %v645_v10 = vsel %vm533_vm0, %v58_v8, 0.0  ;;  %v642_v11 = vsel %vm533_vm0, %v57_v9, 0.0  ;;  %v60_v12 = vld [vmem:[%s10149_s0 + $0x138] sm:$0xff]  ;;  %v59_v13 = vld [vmem:[%s10149_s0 + $0x130] sm:$0xff]  ;;  %v62_v16 = vld [vmem:[%s10149_s0 + $0x148] sm:$0xff] }
  0x38   :  { %v651_v14 = vsel %vm533_vm0, %v60_v12, 0.0  ;;  %v648_v15 = vsel %vm533_vm0, %v59_v13, 0.0  ;;  %v61_v17 = vld [vmem:[%s10149_s0 + $0x140] sm:$0xff]  ;;  %v657_v18 = vsel %vm533_vm0, %v62_v16, 0.0  ;;  %v64_v20 = vld [vmem:[%s10149_s0 + $0x158] sm:$0xff]  ;;  %v63_v21 = vld [vmem:[%s10149_s0 + $0x150] sm:$0xff] }
  0x39   :  { %v654_v19 = vsel %vm533_vm0, %v61_v17, 0.0  ;;  %v663_v22 = vsel %vm533_vm0, %v64_v20, 0.0  ;;  %v660_v23 = vsel %vm533_vm0, %v63_v21, 0.0  ;;  %v66_v24 = vld [vmem:[%s10149_s0 + $0x168] sm:$0xff]  ;;  %v65_v25 = vld [vmem:[%s10149_s0 + $0x160] sm:$0xff]  ;;  %v68_v28 = vld [vmem:[%s10149_s0 + $0x178] sm:$0xff] }
  0x3a   :  { %v669_v26 = vsel %vm533_vm0, %v66_v24, 0.0  ;;  %v666_v27 = vsel %vm533_vm0, %v65_v25, 0.0  ;;  %v67_v29 = vld [vmem:[%s10149_s0 + $0x170] sm:$0xff]  ;;  %v675_v30 = vsel %vm533_vm0, %v68_v28, 0.0  ;;  %v70_v32 = vld [vmem:[%s10149_s0 + $0x188] sm:$0xff]  ;;  %v69_v33 = vld [vmem:[%s10149_s0 + $0x180] sm:$0xff] }
  0x3b   :  { %622 = vadd.xlane.f32.xlu1 %v621_v58  ;;  %619 = vadd.xlane.f32.xlu0 %v618_v59  ;;  %v672_v31 = vsel %vm533_vm0, %v67_v29, 0.0  ;;  %v681_v34 = vsel %vm533_vm0, %v70_v32, 0.0  ;;  %v678_v35 = vsel %vm533_vm0, %v69_v33, 0.0  ;;  %v72_v36 = vld [vmem:[%s10149_s0 + $0x198] sm:$0xff]  ;;  %v71_v37 = vld [vmem:[%s10149_s0 + $0x190] sm:$0xff]  ;;  %v74_v40 = vld [vmem:[%s10149_s0 + $0x1a8] sm:$0xff] }
  0x3c   :  { %v687_v38 = vsel %vm533_vm0, %v72_v36, 0.0  ;;  %v684_v39 = vsel %vm533_vm0, %v71_v37, 0.0  ;;  %v73_v41 = vld [vmem:[%s10149_s0 + $0x1a0] sm:$0xff]  ;;  %v693_v42 = vsel %vm533_vm0, %v74_v40, 0.0  ;;  %v76_v44 = vld [vmem:[%s10149_s0 + $0x1b8] sm:$0xff]  ;;  %v75_v45 = vld [vmem:[%s10149_s0 + $0x1b0] sm:$0xff] }
  0x3d   :  { %v690_v43 = vsel %vm533_vm0, %v73_v41, 0.0  ;;  %v699_v46 = vsel %vm533_vm0, %v76_v44, 0.0  ;;  %v696_v47 = vsel %vm533_vm0, %v75_v45, 0.0  ;;  %v78_v48 = vld [vmem:[%s10149_s0 + $0x1c8] sm:$0xff]  ;;  %v77_v49 = vld [vmem:[%s10149_s0 + $0x1c0] sm:$0xff]  ;;  %v80_v52 = vld [vmem:[%s10149_s0 + $0x1d8] sm:$0xff] }
  0x3e   :  { %v705_v50 = vsel %vm533_vm0, %v78_v48, 0.0  ;;  %v702_v51 = vsel %vm533_vm0, %v77_v49, 0.0  ;;  %v79_v53 = vld [vmem:[%s10149_s0 + $0x1d0] sm:$0xff]  ;;  %v711_v54 = vsel %vm533_vm0, %v80_v52, 0.0  ;;  %v82_v56 = vld [vmem:[%s10149_s0 + $0x1e8] sm:$0xff]  ;;  %v81_v57 = vld [vmem:[%s10149_s0 + $0x1e0] sm:$0xff] }
  0x3f   :  { %628 = vadd.xlane.f32.xlu1 %v627_v62  ;;  %625 = vadd.xlane.f32.xlu0 %v624_v63  ;;  %v708_v55 = vsel %vm533_vm0, %v79_v53, 0.0  ;;  %v717_v58 = vsel %vm533_vm0, %v82_v56, 0.0  ;;  %v714_v59 = vsel %vm533_vm0, %v81_v57, 0.0  ;;  %v84_v60 = vld [vmem:[%s10149_s0 + $0x1f8] sm:$0xff]  ;;  %v83_v61 = vld [vmem:[%s10149_s0 + $0x1f0] sm:$0xff]  ;;  %v86_v0 = vld [vmem:[%s10149_s0 + $0x208] sm:$0xff] }
  0x40   :  { %v723_v62 = vsel %vm533_vm0, %v84_v60, 0.0  ;;  %v720_v63 = vsel %vm533_vm0, %v83_v61, 0.0  ;;  %v85_v1 = vld [vmem:[%s10149_s0 + $0x200] sm:$0xff]  ;;  %v88_v4 = vld [vmem:[%s10149_s0 + $0x218] sm:$0xff]  ;;  %v87_v5 = vld [vmem:[%s10149_s0 + $0x210] sm:$0xff]  ;;  %vm3178_vm2 = vcmask 195712  }
  0x41   :  { %v90_v8 = vld [vmem:[%s10149_s0 + $0x228] sm:$0xff]  ;;  %v89_v9 = vld [vmem:[%s10149_s0 + $0x220] sm:$0xff]  ;;  %v92_v12 = vld [vmem:[%s10149_s0 + $0x238] sm:$0xff]  ;;  %vm3185_vm3 = vcmask 261312   ;;  %vm3192_vm4 = vcmask 326912   ;;  %vm3199_vm5 = vcmask 392512  }
  0x42   :  { %v91_v13 = vld [vmem:[%s10149_s0 + $0x230] sm:$0xff]  ;;  %v94_v17 = vld [vmem:[%s10149_s0 + $0x248] sm:$0xff]  ;;  %v97_v41 = vld [vmem:[%s10149_s0 + $0x260] sm:$0xff]  ;;  %vm3206_vm6 = vcmask 458112   ;;  %vm3213_vm7 = vcmask 523712   ;;  %vm3220_vm8 = vcmask 589312  }
  0x43   :  { %634 = vadd.xlane.f32.xlu1 %v633_v2  ;;  %631 = vadd.xlane.f32.xlu0 %v630_v3  ;;  %v729_v2 = vsel %vm533_vm0, %v86_v0, 0.0  ;;  %v726_v3 = vsel %vm533_vm0, %v85_v1, 0.0  ;;  %v744_v16 = vsel %vm533_vm0, %v91_v13, 0.0  ;;  %v95_v28 = vld [vmem:[%s10149_s0 + $0x250] sm:$0xff]  ;;  %v98_v40 = vld [vmem:[%s10149_s0 + $0x268] sm:$0xff]  ;;  %v100_v49 = vld [vmem:[%s10149_s0 + $0x278] sm:$0xff] }
  0x44   :  { %vm3227_vm9 = vcmask 654912   ;;  %vm3234_vm10 = vcmask 720512   ;;  %vm10154_vm11 = vcmask 786112   ;;  %vm3248_vm12 = vcmask 851712  }
  0x45   :  { %vm10153_vm13 = vcmask 917312   ;;  %vm3262_vm14 = vcmask 982912   ;;  %vm3269_vm15 = vcmask 1048512  }
  0x47   :  { %640 = vadd.xlane.f32.xlu1 %v639_v6  ;;  %637 = vadd.xlane.f32.xlu0 %v636_v7  ;;  %v735_v6 = vsel %vm533_vm0, %v88_v4, 0.0  ;;  %v732_v7 = vsel %vm533_vm0, %v87_v5, 0.0  ;;  %v102_v4 = vld [vmem:[%s10149_s0 + $0x288] sm:$0xff] }
  0x4b   :  { %646 = vadd.xlane.f32.xlu1 %v645_v10  ;;  %643 = vadd.xlane.f32.xlu0 %v642_v11  ;;  %v741_v10 = vsel %vm533_vm0, %v90_v8, 0.0  ;;  %v738_v11 = vsel %vm533_vm0, %v89_v9, 0.0 }
  0x4f   :  { %652 = vadd.xlane.f32.xlu1 %v651_v14  ;;  %649 = vadd.xlane.f32.xlu0 %v648_v15  ;;  %v3160_v14 = vlaneseq  ;;  %v747_v15 = vsel %vm533_vm0, %v92_v12, 0.0 }
  0x51   :  { %v6780_v20 = vshrl.u32 %v3160_v14, 7 }
  0x53   :  { %658 = vadd.xlane.f32.xlu1 %v657_v18  ;;  %655 = vadd.xlane.f32.xlu0 %v654_v19  ;;  %v93_v18 = vld [vmem:[%s10149_s0 + $0x240] sm:$0xff]  ;;  %v6778_v19 = vand.u32 127, %v3160_v14 }
  0x54   :  { %v750_v24 = vsel %vm533_vm0, %v93_v18, 0.0 }
  0x55   :  { %v3173_v25 = vadd.s32 4294967280, %v6778_v19  ;;  %v3180_v29 = vadd.s32 4294967272, %v6778_v19  ;;  %v3201_v44 = vadd.s32 4294967248, %v6778_v19 }
  0x57   :  { %664 = vadd.xlane.f32.xlu1 %v663_v22  ;;  %661 = vadd.xlane.f32.xlu0 %v660_v23  ;;  %v753_v23 = vsel %vm533_vm0, %v94_v17, 0.0  ;;  %v6801_v36 = vsub.s32 %v3173_v25, %v6780_v20  ;;  %v777_v17 = vsel %vm533_vm0, %v102_v4, 0.0 }
  0x5b   :  { %670 = vadd.xlane.f32.xlu1 %v669_v26  ;;  %667 = vadd.xlane.f32.xlu0 %v666_v27  ;;  %v3166_v26 = vadd.s32 4294967288, %v6778_v19  ;;  %v96_v27 = vld [vmem:[%s10149_s0 + $0x258] sm:$0xff] }
  0x5c   :  { %v759_v33 = vsel %vm533_vm0, %v96_v27, 0.0 }
  0x5f   :  { %676 = vadd.xlane.f32.xlu1 %v675_v30  ;;  %673 = vadd.xlane.f32.xlu0 %v672_v31  ;;  %v6795_v30 = vsub.s32 %v6778_v19, %v6780_v20 }
  0x63   :  { %682 = vadd.xlane.f32.xlu1 %v681_v34  ;;  %679 = vadd.xlane.f32.xlu0 %v678_v35  ;;  %v756_v34 = vsel %vm533_vm0, %v95_v28, 0.0  ;;  %v3187_v35 = vadd.s32 4294967264, %v6778_v19 }
  0x65   :  { %v6824_v52 = vsub.s32 %v3187_v35, %v6780_v20 }
  0x67   :  { %688 = vadd.xlane.f32.xlu1 %v687_v38  ;;  %685 = vadd.xlane.f32.xlu0 %v684_v39  ;;  %v6804_v38 = vsub.s32 %v3166_v26, %v6780_v20 }
  0x6b   :  { %694 = vadd.xlane.f32.xlu1 %v693_v42  ;;  %691 = vadd.xlane.f32.xlu0 %v690_v43  ;;  %v6813_v42 = vsub.s32 %v3180_v29, %v6780_v20  ;;  %v3194_v43 = vadd.s32 4294967256, %v6778_v19  ;;  %v3229_v29 = vadd.s32 4294967216, %v6778_v19 }
  0x6d   :  { %v6833_v60 = vsub.s32 %v3194_v43, %v6780_v20 }
  0x6f   :  { %700 = vadd.xlane.f32.xlu1 %v699_v46  ;;  %697 = vadd.xlane.f32.xlu0 %v696_v47 }
  0x73   :  { %706 = vadd.xlane.f32.xlu1 %v705_v50  ;;  %703 = vadd.xlane.f32.xlu0 %v702_v51  ;;  %v99_v50 = vld [vmem:[%s10149_s0 + $0x270] sm:$0xff] }
  0x77   :  { %712 = vadd.xlane.f32.xlu1 %v711_v54  ;;  %709 = vadd.xlane.f32.xlu0 %v708_v55  ;;  %v765_v54 = vsel %vm533_vm0, %v98_v40, 0.0  ;;  %v762_v55 = vsel %vm533_vm0, %v97_v41, 0.0 }
  0x7b   :  { %718 = vadd.xlane.f32.xlu1 %v717_v58  ;;  %715 = vadd.xlane.f32.xlu0 %v714_v59  ;;  %v3208_v59 = vadd.s32 4294967240, %v6778_v19 }
  0x7d   :  { %v6853_v13 = vsub.s32 %v3208_v59, %v6780_v20 }
  0x7f   :  { %724 = vadd.xlane.f32.xlu1 %v723_v62  ;;  %721 = vadd.xlane.f32.xlu0 %v720_v63  ;;  %v771_v62 = vsel %vm533_vm0, %v100_v49, 0.0  ;;  %v768_v63 = vsel %vm533_vm0, %v99_v50, 0.0  ;;  %v3243_v50 = vadd.s32 4294967200, %v6778_v19 }
  0x83   :  { %730 = vadd.xlane.f32.xlu1 %v729_v2  ;;  %727 = vadd.xlane.f32.xlu0 %v726_v3  ;;  %v6840_v2 = vsub.s32 %v3201_v44, %v6780_v20  ;;  %v3215_v3 = vadd.s32 4294967232, %v6778_v19 }
  0x87   :  { %736 = vadd.xlane.f32.xlu1 %v735_v6  ;;  %733 = vadd.xlane.f32.xlu0 %v732_v7 }
  0x8b   :  { %742 = vadd.xlane.f32.xlu1 %v741_v10  ;;  %739 = vadd.xlane.f32.xlu0 %v738_v11  ;;  %v3222_v10 = vadd.s32 4294967224, %v6778_v19  ;;  %v101_v11 = vld [vmem:[%s10149_s0 + $0x280] sm:$0xff] }
  0x8d   :  { %v6867_v27 = vsub.s32 %v3222_v10, %v6780_v20  ;;  %v3264_v10 = vadd.s32 4294967176, %v6778_v19 }
  0x8f   :  { %748 = vadd.xlane.f32.xlu1 %v747_v15  ;;  %745 = vadd.xlane.f32.xlu0 %v744_v16 }
  0x90   :  { %v542_v21 = vpop.xlane.xlu1 %541  ;;  %v536_v22 = vpop.xlane.xlu0 %535 }
  0x93   :  { %754 = vadd.xlane.f32.xlu1 %v753_v23  ;;  %751 = vadd.xlane.f32.xlu0 %v750_v24  ;;  %v774_v23 = vsel %vm533_vm0, %v101_v11, 0.0  ;;  %v104_v24 = vld [vmem:[%s10149_s0 + $0x298] sm:$0xff] }
  0x94   :  { %v545_v31 = vpop.xlane.xlu1 %544  ;;  %v539_v32 = vpop.xlane.xlu0 %538  ;;  %v108_v11 = vld [vmem:[%s10149_s0 + $0x2b8] sm:$0xff] }
  0x95   :  { %v2073_v37 = vpack.c.bf16 %v545_v31, %v542_v21  ;;  %v2072_v39 = vpack.c.bf16 %v539_v32, %v536_v22  ;;  %v6859_v22 = vsub.s32 %v3215_v3, %v6780_v20  ;;  %v3236_v31 = vadd.s32 4294967208, %v6778_v19  ;;  %v103_v32 = vld [vmem:[%s10149_s0 + $0x290] sm:$0xff] }
  0x96   :  { %v780_v44 = vsel %vm533_vm0, %v103_v32, 0.0  ;;  %v6902_v3 = vsub.s32 %v3243_v50, %v6780_v20  ;;  %v109_v32 = vld [vmem:[%s10149_s0 + $0x2c0] sm:$0xff] }
  0x97   :  { %v2650_v45 = vunpack.c.l.b16 %v2073_v37  ;;  %v2651_v46 = vunpack.c.h.b16 %v2073_v37  ;;  %v2648_v47 = vunpack.c.l.b16 %v2072_v39  ;;  %v2649_v48 = vunpack.c.h.b16 %v2072_v39  ;;  %760 = vadd.xlane.f32.xlu1 %v759_v33  ;;  %757 = vadd.xlane.f32.xlu0 %v756_v34 }
  0x98   :  { %v551_v51 = vpop.xlane.xlu1 %550  ;;  %v548_v53 = vpop.xlane.xlu0 %547  ;;  %v783_v39 = vsel %vm533_vm0, %v104_v24, 0.0 }
  0x99   :  { %v3177_v56 = vrot.slane %v2650_v45, %v6801_v36  ;;  %v3165_v57 = vrot.slane %v2648_v47, %v6795_v30  ;;  %v3170_v58 = vrot.slane %v2649_v48, %v6804_v38  ;;  %v2074_v61 = vpack.c.bf16 %v551_v51, %v548_v53  ;;  %v106_v45 = vld [vmem:[%s10149_s0 + $0x2a8] sm:$0xff]  ;;  %v105_v53 = vld [vmem:[%s10149_s0 + $0x2a0] sm:$0xff] }
  0x9a   :  { %v3184_v0 = vrot.slane %v2651_v46, %v6813_v42  ;;  %v6885_v48 = vsub.s32 %v3229_v29, %v6780_v20  ;;  %v3250_v51 = vadd.s32 4294967192, %v6778_v19 }
  0x9b   :  { %v3172_v1 = vsel %vm3171_vm1, %v3170_v58, %v3165_v57  ;;  %766 = vadd.xlane.f32.xlu1 %v765_v54  ;;  %763 = vadd.xlane.f32.xlu0 %v762_v55  ;;  %v2652_v6 = vunpack.c.l.b16 %v2074_v61  ;;  %v2653_v7 = vunpack.c.h.b16 %v2074_v61  ;;  %v789_v58 = vsel %vm533_vm0, %v106_v45, 0.0 }
  0x9c   :  { %v3179_v5 = vsel %vm3178_vm2, %v3177_v56, %v3172_v1  ;;  %v557_v8 = vpop.xlane.xlu1 %556  ;;  %v554_v9 = vpop.xlane.xlu0 %553  ;;  %v6895_v56 = vsub.s32 %v3236_v31, %v6780_v20  ;;  %v6905_v4 = vsub.s32 %v3250_v51, %v6780_v20  ;;  %v110_v31 = vld [vmem:[%s10149_s0 + $0x2c8] sm:$0xff] }
  0x9d   :  { %v3186_v12 = vsel %vm3185_vm3, %v3184_v0, %v3179_v5  ;;  %v2075_v14 = vpack.c.bf16 %v557_v8, %v554_v9  ;;  %v3191_v15 = vrot.slane %v2652_v6, %v6824_v52  ;;  %v3198_v16 = vrot.slane %v2653_v7, %v6833_v60 }
  0x9e   :  { %v3257_v6 = vadd.s32 4294967184, %v6778_v19 }
  0x9f   :  { %v2654_v18 = vunpack.c.l.b16 %v2075_v14  ;;  %v2655_v21 = vunpack.c.h.b16 %v2075_v14  ;;  %772 = vadd.xlane.f32.xlu1 %v771_v62  ;;  %769 = vadd.xlane.f32.xlu0 %v768_v63  ;;  %v3193_v25 = vsel %vm3192_vm4, %v3191_v15, %v3186_v12  ;;  %v786_v63 = vsel %vm533_vm0, %v105_v53, 0.0  ;;  %v107_v12 = vld [vmem:[%s10149_s0 + $0x2b0] sm:$0xff] }
  0xa0   :  { %v563_v26 = vpop.xlane.xlu1 %562  ;;  %v560_v28 = vpop.xlane.xlu0 %559  ;;  %v3200_v33 = vsel %vm3199_vm5, %v3198_v16, %v3193_v25  ;;  %v6920_v19 = vsub.s32 %v3257_v6, %v6780_v20  ;;  %v792_v24 = vsel %vm533_vm0, %v107_v12, 0.0 }
  0xa1   :  { %v3205_v34 = vrot.slane %v2654_v18, %v6840_v2  ;;  %v3212_v35 = vrot.slane %v2655_v21, %v6853_v13  ;;  %v2076_v37 = vpack.c.bf16 %v563_v26, %v560_v28  ;;  %v6927_v28 = vsub.s32 %v3264_v10, %v6780_v20 }
  0xa3   :  { %v3207_v40 = vsel %vm3206_vm6, %v3205_v34, %v3200_v33  ;;  %v2656_v41 = vunpack.c.l.b16 %v2076_v37  ;;  %v2657_v43 = vunpack.c.h.b16 %v2076_v37  ;;  %778 = vadd.xlane.f32.xlu1 %v777_v17  ;;  %775 = vadd.xlane.f32.xlu0 %v774_v23  ;;  %v795_v23 = vsel %vm533_vm0, %v108_v11, 0.0 }
  0xa4   :  { %v3214_v46 = vsel %vm3213_vm7, %v3212_v35, %v3207_v40  ;;  %v569_v47 = vpop.xlane.xlu1 %568  ;;  %v566_v49 = vpop.xlane.xlu0 %565 }
  0xa5   :  { %v3219_v54 = vrot.slane %v2656_v41, %v6859_v22  ;;  %v3226_v55 = vrot.slane %v2657_v43, %v6867_v27  ;;  %v2077_v57 = vpack.c.bf16 %v569_v47, %v566_v49  ;;  %v801_v41 = vsel %vm533_vm0, %v110_v31, 0.0  ;;  %v112_v47 = vld [vmem:[%s10149_s0 + $0x2d8] sm:$0xff]  ;;  %v111_v49 = vld [vmem:[%s10149_s0 + $0x2d0] sm:$0xff] }
  0xa6   :  { %v798_v43 = vsel %vm533_vm0, %v109_v32, 0.0 }
  0xa7   :  { %v3221_v59 = vsel %vm3220_vm8, %v3219_v54, %v3214_v46  ;;  %v2658_v61 = vunpack.c.l.b16 %v2077_v57  ;;  %v2659_v62 = vunpack.c.h.b16 %v2077_v57  ;;  %784 = vadd.xlane.f32.xlu1 %v783_v39  ;;  %781 = vadd.xlane.f32.xlu0 %v780_v44 }
  0xa8   :  { %v3228_v0 = vsel %vm3227_vm9, %v3226_v55, %v3221_v59  ;;  %v575_v1 = vpop.xlane.xlu1 %574  ;;  %v572_v5 = vpop.xlane.xlu0 %571  ;;  %v804_v59 = vsel %vm533_vm0, %v111_v49, 0.0 }
  0xa9   :  { %v3233_v7 = vrot.slane %v2658_v61, %v6885_v48  ;;  %v3240_v8 = vrot.slane %v2659_v62, %v6895_v56  ;;  %v2078_v9 = vpack.c.bf16 %v575_v1, %v572_v5  ;;  %v114_v62 = vld [vmem:[%s10149_s0 + $0x2e8] sm:$0xff] }
  0xab   :  { %v3235_v14 = vsel %vm3234_vm10, %v3233_v7, %v3228_v0  ;;  %v2660_v15 = vunpack.c.l.b16 %v2078_v9  ;;  %v2661_v16 = vunpack.c.h.b16 %v2078_v9  ;;  %790 = vadd.xlane.f32.xlu1 %v789_v58  ;;  %787 = vadd.xlane.f32.xlu0 %v786_v63  ;;  %v807_v58 = vsel %vm533_vm0, %v112_v47, 0.0  ;;  %v113_v63 = vld [vmem:[%s10149_s0 + $0x2e0] sm:$0xff] }
  0xac   :  { %v3242_v17 = vsel %vm10154_vm11, %v3240_v8, %v3235_v14  ;;  %v581_v18 = vpop.xlane.xlu1 %580  ;;  %v578_v21 = vpop.xlane.xlu0 %577  ;;  %v813_v9 = vsel %vm533_vm0, %v114_v62, 0.0  ;;  %v810_v10 = vsel %vm533_vm0, %v113_v63, 0.0 }
  0xad   :  { %v3247_v25 = vrot.slane %v2660_v15, %v6902_v3  ;;  %v3254_v26 = vrot.slane %v2661_v16, %v6905_v4  ;;  %v2079_v29 = vpack.c.bf16 %v581_v18, %v578_v21  ;;  %v116_v15 = vld [vmem:[%s10149_s0 + $0x2f8] sm:$0xff]  ;;  %v115_v16 = vld [vmem:[%s10149_s0 + $0x2f0] sm:$0xff] }
  0xae   :  { %v816_v31 = vsel %vm533_vm0, %v115_v16, 0.0 }
  0xaf   :  { %v3249_v33 = vsel %vm3248_vm12, %v3247_v25, %v3242_v17  ;;  %v2662_v34 = vunpack.c.l.b16 %v2079_v29  ;;  %v2663_v35 = vunpack.c.h.b16 %v2079_v29  ;;  %796 = vadd.xlane.f32.xlu1 %v795_v23  ;;  %793 = vadd.xlane.f32.xlu0 %v792_v24  ;;  %v819_v29 = vsel %vm533_vm0, %v116_v15, 0.0 }
  0xb0   :  { %v3256_v37 = vsel %vm10153_vm13, %v3254_v26, %v3249_v33  ;;  %v587_v39 = vpop.xlane.xlu1 %586  ;;  %v584_v40 = vpop.xlane.xlu0 %583 }
  0xb1   :  { %v3261_v44 = vrot.slane %v2662_v34, %v6920_v19  ;;  %v3268_v45 = vrot.slane %v2663_v35, %v6927_v28  ;;  %v2080_v46 = vpack.c.bf16 %v587_v39, %v584_v40  ;;  %v118_v35 = vld [vmem:[%s10149_s0 + $0x308] sm:$0xff] }
  0xb3   :  { %v3263_v50 = vsel %vm3262_vm14, %v3261_v44, %v3256_v37  ;;  %v2664_v51 = vunpack.c.l.b16 %v2080_v46  ;;  %v2665_v53 = vunpack.c.h.b16 %v2080_v46  ;;  %802 = vadd.xlane.f32.xlu1 %v801_v41  ;;  %799 = vadd.xlane.f32.xlu0 %v798_v43  ;;  %v117_v37 = vld [vmem:[%s10149_s0 + $0x300] sm:$0xff]  ;;  %v825_v46 = vsel %vm533_vm0, %v118_v35, 0.0 }
  0xb4   :  { %v6949_v54 = vsel %vm3269_vm15, %v3268_v45, %v3263_v50  ;;  %v593_v55 = vpop.xlane.xlu1 %592  ;;  %v590_v57 = vpop.xlane.xlu0 %589  ;;  %v822_v47 = vsel %vm533_vm0, %v117_v37, 0.0 }
  0xb5   :  { %v2081_v61 = vpack.c.bf16 %v593_v55, %v590_v57  ;;  %v3274_v0 = vrot.slane %v2664_v51, %v6795_v30  ;;  %v3278_v1 = vrot.slane %v2665_v53, %v6804_v38  ;;  %v120_v53 = vld [vmem:[%s10149_s0 + $0x318] sm:$0xff]  ;;  %v119_v55 = vld [vmem:[%s10149_s0 + $0x310] sm:$0xff] }
  0xb7   :  { %v2666_v5 = vunpack.c.l.b16 %v2081_v61  ;;  %v2667_v6 = vunpack.c.h.b16 %v2081_v61  ;;  %808 = vadd.xlane.f32.xlu1 %v807_v58  ;;  %805 = vadd.xlane.f32.xlu0 %v804_v59  ;;  %v3279_v17 = vsel %vm3171_vm1, %v3278_v1, %v3274_v0  ;;  %v831_v0 = vsel %vm533_vm0, %v120_v53, 0.0 }
  0xb8   :  { %v599_v7 = vpop.xlane.xlu1 %598  ;;  %v596_v8 = vpop.xlane.xlu0 %595  ;;  %v828_v1 = vsel %vm533_vm0, %v119_v55, 0.0 }
  0xb9   :  { %v3283_v11 = vrot.slane %v2666_v5, %v6801_v36  ;;  %v3288_v12 = vrot.slane %v2667_v6, %v6813_v42  ;;  %v2082_v14 = vpack.c.bf16 %v599_v7, %v596_v8  ;;  %v122_v8 = vld [vmem:[%s10149_s0 + $0x328] sm:$0xff] }
  0xbb   :  { %v3284_v18 = vsel %vm3178_vm2, %v3283_v11, %v3279_v17  ;;  %v2668_v21 = vunpack.c.l.b16 %v2082_v14  ;;  %v2669_v23 = vunpack.c.h.b16 %v2082_v14  ;;  %814 = vadd.xlane.f32.xlu1 %v813_v9  ;;  %811 = vadd.xlane.f32.xlu0 %v810_v10  ;;  %v121_v9 = vld [vmem:[%s10149_s0 + $0x320] sm:$0xff]  ;;  %v837_v17 = vsel %vm533_vm0, %v122_v8, 0.0 }
  0xbc   :  { %v3289_v24 = vsel %vm3185_vm3, %v3288_v12, %v3284_v18  ;;  %v605_v25 = vpop.xlane.xlu1 %604  ;;  %v602_v26 = vpop.xlane.xlu0 %601  ;;  %v834_v18 = vsel %vm533_vm0, %v121_v9, 0.0 }
  0xbd   :  { %v3293_v32 = vrot.slane %v2668_v21, %v6824_v52  ;;  %v3298_v33 = vrot.slane %v2669_v23, %v6833_v60  ;;  %v2083_v34 = vpack.c.bf16 %v605_v25, %v602_v26  ;;  %v124_v25 = vld [vmem:[%s10149_s0 + $0x338] sm:$0xff]  ;;  %v123_v26 = vld [vmem:[%s10149_s0 + $0x330] sm:$0xff] }
  0xbe   :  { %v843_v37 = vsel %vm533_vm0, %v124_v25, 0.0 }
  0xbf   :  { %v3294_v39 = vsel %vm3192_vm4, %v3293_v32, %v3289_v24  ;;  %v2670_v40 = vunpack.c.l.b16 %v2083_v34  ;;  %v2671_v41 = vunpack.c.h.b16 %v2083_v34  ;;  %820 = vadd.xlane.f32.xlu1 %v819_v29  ;;  %817 = vadd.xlane.f32.xlu0 %v816_v31 }
  0xc0   :  { %v3299_v43 = vsel %vm3199_vm5, %v3298_v33, %v3294_v39  ;;  %v611_v44 = vpop.xlane.xlu1 %610  ;;  %v608_v45 = vpop.xlane.xlu0 %607  ;;  %v840_v39 = vsel %vm533_vm0, %v123_v26, 0.0 }
  0xc1   :  { %v3303_v49 = vrot.slane %v2670_v40, %v6840_v2  ;;  %v3308_v50 = vrot.slane %v2671_v41, %v6853_v13  ;;  %v2084_v51 = vpack.c.bf16 %v611_v44, %v608_v45  ;;  %v126_v44 = vld [vmem:[%s10149_s0 + $0x348] sm:$0xff]  ;;  %v125_v45 = vld [vmem:[%s10149_s0 + $0x340] sm:$0xff] }
  0xc2   :  { %v849_v55 = vsel %vm533_vm0, %v126_v44, 0.0 }
  0xc3   :  { %v3304_v57 = vsel %vm3206_vm6, %v3303_v49, %v3299_v43  ;;  %v2672_v58 = vunpack.c.l.b16 %v2084_v51  ;;  %v2673_v59 = vunpack.c.h.b16 %v2084_v51  ;;  %826 = vadd.xlane.f32.xlu1 %v825_v46  ;;  %823 = vadd.xlane.f32.xlu0 %v822_v47 }
  0xc4   :  { %v3309_v61 = vsel %vm3213_vm7, %v3308_v50, %v3304_v57  ;;  %v617_v62 = vpop.xlane.xlu1 %616  ;;  %v614_v63 = vpop.xlane.xlu0 %613  ;;  %v846_v57 = vsel %vm533_vm0, %v125_v45, 0.0 }
  0xc5   :  { %v3313_v5 = vrot.slane %v2672_v58, %v6859_v22  ;;  %v3318_v6 = vrot.slane %v2673_v59, %v6867_v27  ;;  %v2085_v7 = vpack.c.bf16 %v617_v62, %v614_v63  ;;  %v128_v62 = vld [vmem:[%s10149_s0 + $0x358] sm:$0xff]  ;;  %v127_v63 = vld [vmem:[%s10149_s0 + $0x350] sm:$0xff] }
  0xc6   :  { %v855_v9 = vsel %vm533_vm0, %v128_v62, 0.0 }
  0xc7   :  { %v3314_v10 = vsel %vm3220_vm8, %v3313_v5, %v3309_v61  ;;  %v2674_v11 = vunpack.c.l.b16 %v2085_v7  ;;  %v2675_v12 = vunpack.c.h.b16 %v2085_v7  ;;  %832 = vadd.xlane.f32.xlu1 %v831_v0  ;;  %829 = vadd.xlane.f32.xlu0 %v828_v1 }
  0xc8   :  { %v3319_v14 = vsel %vm3227_vm9, %v3318_v6, %v3314_v10  ;;  %v623_v15 = vpop.xlane.xlu1 %622  ;;  %v620_v16 = vpop.xlane.xlu0 %619  ;;  %v852_v10 = vsel %vm533_vm0, %v127_v63, 0.0 }
  0xc9   :  { %v3323_v21 = vrot.slane %v2674_v11, %v6885_v48  ;;  %v3328_v23 = vrot.slane %v2675_v12, %v6895_v56  ;;  %v2086_v24 = vpack.c.bf16 %v623_v15, %v620_v16  ;;  %v130_v12 = vld [vmem:[%s10149_s0 + $0x368] sm:$0xff] }
  0xcb   :  { %v3324_v29 = vsel %vm3234_vm10, %v3323_v21, %v3319_v14  ;;  %v2676_v31 = vunpack.c.l.b16 %v2086_v24  ;;  %v2677_v32 = vunpack.c.h.b16 %v2086_v24  ;;  %838 = vadd.xlane.f32.xlu1 %v837_v17  ;;  %835 = vadd.xlane.f32.xlu0 %v834_v18  ;;  %v129_v14 = vld [vmem:[%s10149_s0 + $0x360] sm:$0xff]  ;;  %v861_v24 = vsel %vm533_vm0, %v130_v12, 0.0 }
  0xcc   :  { %v3329_v33 = vsel %vm10154_vm11, %v3328_v23, %v3324_v29  ;;  %v629_v34 = vpop.xlane.xlu1 %628  ;;  %v626_v35 = vpop.xlane.xlu0 %625  ;;  %v858_v25 = vsel %vm533_vm0, %v129_v14, 0.0 }
  0xcd   :  { %v3333_v40 = vrot.slane %v2676_v31, %v6902_v3  ;;  %v3338_v41 = vrot.slane %v2677_v32, %v6905_v4  ;;  %v2087_v43 = vpack.c.bf16 %v629_v34, %v626_v35  ;;  %v132_v32 = vld [vmem:[%s10149_s0 + $0x378] sm:$0xff] }
  0xce   :  { %v867_v44 = vsel %vm533_vm0, %v132_v32, 0.0 }
  0xcf   :  { %v3334_v46 = vsel %vm3248_vm12, %v3333_v40, %v3329_v33  ;;  %v2678_v47 = vunpack.c.l.b16 %v2087_v43  ;;  %v2679_v49 = vunpack.c.h.b16 %v2087_v43  ;;  %844 = vadd.xlane.f32.xlu1 %v843_v37  ;;  %841 = vadd.xlane.f32.xlu0 %v840_v39  ;;  %v131_v33 = vld [vmem:[%s10149_s0 + $0x370] sm:$0xff] }
  0xd0   :  { %v3339_v50 = vsel %vm10153_vm13, %v3338_v41, %v3334_v46  ;;  %v635_v51 = vpop.xlane.xlu1 %634  ;;  %v632_v53 = vpop.xlane.xlu0 %631  ;;  %v864_v45 = vsel %vm533_vm0, %v131_v33, 0.0 }
  0xd1   :  { %v3343_v58 = vrot.slane %v2678_v47, %v6920_v19  ;;  %v3348_v59 = vrot.slane %v2679_v49, %v6927_v28  ;;  %v2088_v61 = vpack.c.bf16 %v635_v51, %v632_v53  ;;  %v133_v51 = vld [vmem:[%s10149_s0 + $0x380] sm:$0xff] }
  0xd2   :  { %v870_v63 = vsel %vm533_vm0, %v133_v51, 0.0 }
  0xd3   :  { %v3344_v0 = vsel %vm3262_vm14, %v3343_v58, %v3339_v50  ;;  %v2680_v1 = vunpack.c.l.b16 %v2088_v61  ;;  %v2681_v5 = vunpack.c.h.b16 %v2088_v61  ;;  %850 = vadd.xlane.f32.xlu1 %v849_v55  ;;  %847 = vadd.xlane.f32.xlu0 %v846_v57  ;;  %v134_v50 = vld [vmem:[%s10149_s0 + $0x388] sm:$0xff] }
  0xd4   :  { %v7046_v6 = vsel %vm3269_vm15, %v3348_v59, %v3344_v0  ;;  %v641_v7 = vpop.xlane.xlu1 %640  ;;  %v638_v8 = vpop.xlane.xlu0 %637  ;;  %v873_v62 = vsel %vm533_vm0, %v134_v50, 0.0 }
  0xd5   :  { %v2089_v11 = vpack.c.bf16 %v641_v7, %v638_v8  ;;  %v3353_v15 = vrot.slane %v2680_v1, %v6795_v30  ;;  %v3357_v16 = vrot.slane %v2681_v5, %v6804_v38  ;;  %v136_v7 = vld [vmem:[%s10149_s0 + $0x398] sm:$0xff]  ;;  %v135_v8 = vld [vmem:[%s10149_s0 + $0x390] sm:$0xff] }
  0xd7   :  { %v2682_v17 = vunpack.c.l.b16 %v2089_v11  ;;  %v2683_v18 = vunpack.c.h.b16 %v2089_v11  ;;  %856 = vadd.xlane.f32.xlu1 %v855_v9  ;;  %853 = vadd.xlane.f32.xlu0 %v852_v10  ;;  %v3358_v34 = vsel %vm3171_vm1, %v3357_v16, %v3353_v15  ;;  %v879_v16 = vsel %vm533_vm0, %v136_v7, 0.0 }
  0xd8   :  { %v647_v21 = vpop.xlane.xlu1 %646  ;;  %v644_v23 = vpop.xlane.xlu0 %643 }
  0xd9   :  { %v3362_v26 = vrot.slane %v2682_v17, %v6801_v36  ;;  %v3367_v29 = vrot.slane %v2683_v18, %v6813_v42  ;;  %v2090_v31 = vpack.c.bf16 %v647_v21, %v644_v23  ;;  %v876_v17 = vsel %vm533_vm0, %v135_v8, 0.0 }
  0xdb   :  { %v3363_v35 = vsel %vm3178_vm2, %v3362_v26, %v3358_v34  ;;  %v2684_v37 = vunpack.c.l.b16 %v2090_v31  ;;  %v2685_v39 = vunpack.c.h.b16 %v2090_v31  ;;  %862 = vadd.xlane.f32.xlu1 %v861_v24  ;;  %859 = vadd.xlane.f32.xlu0 %v858_v25  ;;  %v138_v24 = vld [vmem:[%s10149_s0 + $0x3a8] sm:$0xff]  ;;  %v137_v25 = vld [vmem:[%s10149_s0 + $0x3a0] sm:$0xff] }
  0xdc   :  { %v3368_v40 = vsel %vm3185_vm3, %v3367_v29, %v3363_v35  ;;  %v653_v41 = vpop.xlane.xlu1 %652  ;;  %v650_v43 = vpop.xlane.xlu0 %649  ;;  %v885_v35 = vsel %vm533_vm0, %v138_v24, 0.0 }
  0xdd   :  { %v3372_v46 = vrot.slane %v2684_v37, %v6824_v52  ;;  %v3377_v47 = vrot.slane %v2685_v39, %v6833_v60  ;;  %v2091_v49 = vpack.c.bf16 %v653_v41, %v650_v43  ;;  %v882_v37 = vsel %vm533_vm0, %v137_v25, 0.0  ;;  %v140_v43 = vld [vmem:[%s10149_s0 + $0x3b8] sm:$0xff] }
  0xdf   :  { %v3373_v53 = vsel %vm3192_vm4, %v3372_v46, %v3368_v40  ;;  %v2686_v55 = vunpack.c.l.b16 %v2091_v49  ;;  %v2687_v57 = vunpack.c.h.b16 %v2091_v49  ;;  %868 = vadd.xlane.f32.xlu1 %v867_v44  ;;  %865 = vadd.xlane.f32.xlu0 %v864_v45  ;;  %v139_v44 = vld [vmem:[%s10149_s0 + $0x3b0] sm:$0xff] }
  0xe0   :  { %v3378_v58 = vsel %vm3199_vm5, %v3377_v47, %v3373_v53  ;;  %v659_v59 = vpop.xlane.xlu1 %658  ;;  %v656_v61 = vpop.xlane.xlu0 %655  ;;  %v891_v53 = vsel %vm533_vm0, %v140_v43, 0.0 }
  0xe1   :  { %v3382_v0 = vrot.slane %v2686_v55, %v6840_v2  ;;  %v3387_v1 = vrot.slane %v2687_v57, %v6853_v13  ;;  %v2092_v5 = vpack.c.bf16 %v659_v59, %v656_v61  ;;  %v888_v55 = vsel %vm533_vm0, %v139_v44, 0.0  ;;  %v142_v61 = vld [vmem:[%s10149_s0 + $0x3c8] sm:$0xff] }
  0xe3   :  { %v3383_v9 = vsel %vm3206_vm6, %v3382_v0, %v3378_v58  ;;  %v2688_v10 = vunpack.c.l.b16 %v2092_v5  ;;  %v2689_v11 = vunpack.c.h.b16 %v2092_v5  ;;  %874 = vadd.xlane.f32.xlu1 %v873_v62  ;;  %871 = vadd.xlane.f32.xlu0 %v870_v63  ;;  %v141_v62 = vld [vmem:[%s10149_s0 + $0x3c0] sm:$0xff] }
  0xe4   :  { %v3388_v12 = vsel %vm3213_vm7, %v3387_v1, %v3383_v9  ;;  %v665_v14 = vpop.xlane.xlu1 %664  ;;  %v662_v15 = vpop.xlane.xlu0 %661  ;;  %v897_v9 = vsel %vm533_vm0, %v142_v61, 0.0 }
  0xe5   :  { %v3392_v18 = vrot.slane %v2688_v10, %v6859_v22  ;;  %v3397_v21 = vrot.slane %v2689_v11, %v6867_v27  ;;  %v2093_v23 = vpack.c.bf16 %v665_v14, %v662_v15  ;;  %v894_v10 = vsel %vm533_vm0, %v141_v62, 0.0  ;;  %v144_v15 = vld [vmem:[%s10149_s0 + $0x3d8] sm:$0xff] }
  0xe7   :  { %v3393_v26 = vsel %vm3220_vm8, %v3392_v18, %v3388_v12  ;;  %v2690_v29 = vunpack.c.l.b16 %v2093_v23  ;;  %v2691_v31 = vunpack.c.h.b16 %v2093_v23  ;;  %880 = vadd.xlane.f32.xlu1 %v879_v16  ;;  %877 = vadd.xlane.f32.xlu0 %v876_v17  ;;  %v143_v16 = vld [vmem:[%s10149_s0 + $0x3d0] sm:$0xff] }
  0xe8   :  { %v3398_v32 = vsel %vm3227_vm9, %v3397_v21, %v3393_v26  ;;  %v671_v33 = vpop.xlane.xlu1 %670  ;;  %v668_v34 = vpop.xlane.xlu0 %667  ;;  %v903_v26 = vsel %vm533_vm0, %v144_v15, 0.0 }
  0xe9   :  { %v3402_v39 = vrot.slane %v2690_v29, %v6885_v48  ;;  %v3407_v40 = vrot.slane %v2691_v31, %v6895_v56  ;;  %v2094_v41 = vpack.c.bf16 %v671_v33, %v668_v34  ;;  %v900_v29 = vsel %vm533_vm0, %v143_v16, 0.0  ;;  %v145_v33 = vld [vmem:[%s10149_s0 + $0x3e0] sm:$0xff] }
  0xea   :  { %v906_v44 = vsel %vm533_vm0, %v145_v33, 0.0 }
  0xeb   :  { %v3403_v45 = vsel %vm3234_vm10, %v3402_v39, %v3398_v32  ;;  %v2692_v46 = vunpack.c.l.b16 %v2094_v41  ;;  %v2693_v47 = vunpack.c.h.b16 %v2094_v41  ;;  %886 = vadd.xlane.f32.xlu1 %v885_v35  ;;  %883 = vadd.xlane.f32.xlu0 %v882_v37  ;;  %v146_v32 = vld [vmem:[%s10149_s0 + $0x3e8] sm:$0xff] }
  0xec   :  { %v3408_v49 = vsel %vm10154_vm11, %v3407_v40, %v3403_v45  ;;  %v677_v50 = vpop.xlane.xlu1 %676  ;;  %v674_v51 = vpop.xlane.xlu0 %673  ;;  %v909_v43 = vsel %vm533_vm0, %v146_v32, 0.0 }
  0xed   :  { %v3412_v57 = vrot.slane %v2692_v46, %v6902_v3  ;;  %v3417_v58 = vrot.slane %v2693_v47, %v6905_v4  ;;  %v2095_v59 = vpack.c.bf16 %v677_v50, %v674_v51  ;;  %v147_v50 = vld [vmem:[%s10149_s0 + $0x3f0] sm:$0xff] }
  0xef   :  { %v3413_v63 = vsel %vm3248_vm12, %v3412_v57, %v3408_v49  ;;  %v2694_v0 = vunpack.c.l.b16 %v2095_v59  ;;  %v2695_v1 = vunpack.c.h.b16 %v2095_v59  ;;  %892 = vadd.xlane.f32.xlu1 %v891_v53  ;;  %889 = vadd.xlane.f32.xlu0 %v888_v55  ;;  %v148_v49 = vld [vmem:[%s10149_s0 + $0x3f8] sm:$0xff] }
  0xf0   :  { %v3418_v5 = vsel %vm10153_vm13, %v3417_v58, %v3413_v63  ;;  %v683_v7 = vpop.xlane.xlu1 %682  ;;  %v680_v8 = vpop.xlane.xlu0 %679  ;;  %v915_v62 = vsel %vm533_vm0, %v148_v49, 0.0  ;;  %v912_v63 = vsel %vm533_vm0, %v147_v50, 0.0 }
  0xf1   :  { %v3422_v11 = vrot.slane %v2694_v0, %v6920_v19  ;;  %v3427_v12 = vrot.slane %v2695_v1, %v6927_v28  ;;  %v2096_v14 = vpack.c.bf16 %v683_v7, %v680_v8  ;;  %v150_v7 = vld [vmem:[%s10149_s0 + $0x408] sm:$0xff]  ;;  %v149_v8 = vld [vmem:[%s10149_s0 + $0x400] sm:$0xff] }
  0xf2   :  { %v921_v16 = vsel %vm533_vm0, %v150_v7, 0.0 }
  0xf3   :  { %v3423_v17 = vsel %vm3262_vm14, %v3422_v11, %v3418_v5  ;;  %v2696_v18 = vunpack.c.l.b16 %v2096_v14  ;;  %v2697_v21 = vunpack.c.h.b16 %v2096_v14  ;;  %898 = vadd.xlane.f32.xlu1 %v897_v9  ;;  %895 = vadd.xlane.f32.xlu0 %v894_v10 }
  0xf4   :  { %v7143_v23 = vsel %vm3269_vm15, %v3427_v12, %v3423_v17  ;;  %v689_v24 = vpop.xlane.xlu1 %688  ;;  %v686_v25 = vpop.xlane.xlu0 %685  ;;  %v918_v17 = vsel %vm533_vm0, %v149_v8, 0.0 }
  0xf5   :  { %v2097_v31 = vpack.c.bf16 %v689_v24, %v686_v25  ;;  %v3432_v34 = vrot.slane %v2696_v18, %v6795_v30  ;;  %v3436_v35 = vrot.slane %v2697_v21, %v6804_v38  ;;  %v152_v25 = vld [vmem:[%s10149_s0 + $0x418] sm:$0xff] }
  0xf7   :  { %v2698_v37 = vunpack.c.l.b16 %v2097_v31  ;;  %v2699_v39 = vunpack.c.h.b16 %v2097_v31  ;;  %904 = vadd.xlane.f32.xlu1 %v903_v26  ;;  %901 = vadd.xlane.f32.xlu0 %v900_v29  ;;  %v3437_v51 = vsel %vm3171_vm1, %v3436_v35, %v3432_v34  ;;  %v151_v26 = vld [vmem:[%s10149_s0 + $0x410] sm:$0xff] }
  0xf8   :  { %v695_v40 = vpop.xlane.xlu1 %694  ;;  %v692_v41 = vpop.xlane.xlu0 %691 }
  0xf9   :  { %v3441_v45 = vrot.slane %v2698_v37, %v6801_v36  ;;  %v3446_v46 = vrot.slane %v2699_v39, %v6813_v42  ;;  %v2098_v47 = vpack.c.bf16 %v695_v40, %v692_v41  ;;  %v927_v37 = vsel %vm533_vm0, %v152_v25, 0.0 }
  0xfa   :  { %v924_v39 = vsel %vm533_vm0, %v151_v26, 0.0 }
  0xfb   :  { %v3442_v53 = vsel %vm3178_vm2, %v3441_v45, %v3437_v51  ;;  %v2700_v55 = vunpack.c.l.b16 %v2098_v47  ;;  %v2701_v57 = vunpack.c.h.b16 %v2098_v47  ;;  %910 = vadd.xlane.f32.xlu1 %v909_v43  ;;  %907 = vadd.xlane.f32.xlu0 %v906_v44  ;;  %v154_v44 = vld [vmem:[%s10149_s0 + $0x428] sm:$0xff]  ;;  %v153_v45 = vld [vmem:[%s10149_s0 + $0x420] sm:$0xff] }
  0xfc   :  { %v3447_v58 = vsel %vm3185_vm3, %v3446_v46, %v3442_v53  ;;  %v701_v59 = vpop.xlane.xlu1 %700  ;;  %v698_v61 = vpop.xlane.xlu0 %697 }
  0xfd   :  { %v3451_v0 = vrot.slane %v2700_v55, %v6824_v52  ;;  %v3456_v1 = vrot.slane %v2701_v57, %v6833_v60  ;;  %v2099_v5 = vpack.c.bf16 %v701_v59, %v698_v61  ;;  %v933_v55 = vsel %vm533_vm0, %v154_v44, 0.0 }
  0xfe   :  { %v930_v57 = vsel %vm533_vm0, %v153_v45, 0.0 }
  0xff   :  { %v3452_v9 = vsel %vm3192_vm4, %v3451_v0, %v3447_v58  ;;  %v2702_v10 = vunpack.c.l.b16 %v2099_v5  ;;  %v2703_v11 = vunpack.c.h.b16 %v2099_v5  ;;  %916 = vadd.xlane.f32.xlu1 %v915_v62  ;;  %913 = vadd.xlane.f32.xlu0 %v912_v63  ;;  %v156_v62 = vld [vmem:[%s10149_s0 + $0x438] sm:$0xff]  ;;  %v155_v63 = vld [vmem:[%s10149_s0 + $0x430] sm:$0xff] }
 0x100   :  { %v3457_v12 = vsel %vm3199_vm5, %v3456_v1, %v3452_v9  ;;  %v707_v14 = vpop.xlane.xlu1 %706  ;;  %v704_v15 = vpop.xlane.xlu0 %703 }
 0x101   :  { %v3461_v18 = vrot.slane %v2702_v10, %v6840_v2  ;;  %v3466_v21 = vrot.slane %v2703_v11, %v6853_v13  ;;  %v2100_v24 = vpack.c.bf16 %v707_v14, %v704_v15  ;;  %v939_v10 = vsel %vm533_vm0, %v156_v62, 0.0 }
 0x102   :  { %v936_v11 = vsel %vm533_vm0, %v155_v63, 0.0 }
 0x103   :  { %v3462_v29 = vsel %vm3206_vm6, %v3461_v18, %v3457_v12  ;;  %v2704_v31 = vunpack.c.l.b16 %v2100_v24  ;;  %v2705_v32 = vunpack.c.h.b16 %v2100_v24  ;;  %922 = vadd.xlane.f32.xlu1 %v921_v16  ;;  %919 = vadd.xlane.f32.xlu0 %v918_v17  ;;  %v158_v16 = vld [vmem:[%s10149_s0 + $0x448] sm:$0xff]  ;;  %v157_v17 = vld [vmem:[%s10149_s0 + $0x440] sm:$0xff] }
 0x104   :  { %v3467_v33 = vsel %vm3213_vm7, %v3466_v21, %v3462_v29  ;;  %v713_v34 = vpop.xlane.xlu1 %712  ;;  %v710_v35 = vpop.xlane.xlu0 %709 }
 0x105   :  { %v3471_v40 = vrot.slane %v2704_v31, %v6859_v22  ;;  %v3476_v41 = vrot.slane %v2705_v32, %v6867_v27  ;;  %v2101_v43 = vpack.c.bf16 %v713_v34, %v710_v35  ;;  %v945_v31 = vsel %vm533_vm0, %v158_v16, 0.0 }
 0x106   :  { %v942_v32 = vsel %vm533_vm0, %v157_v17, 0.0 }
 0x107   :  { %v3472_v46 = vsel %vm3220_vm8, %v3471_v40, %v3467_v33  ;;  %v2706_v47 = vunpack.c.l.b16 %v2101_v43  ;;  %v2707_v49 = vunpack.c.h.b16 %v2101_v43  ;;  %928 = vadd.xlane.f32.xlu1 %v927_v37  ;;  %925 = vadd.xlane.f32.xlu0 %v924_v39  ;;  %v160_v37 = vld [vmem:[%s10149_s0 + $0x458] sm:$0xff]  ;;  %v159_v39 = vld [vmem:[%s10149_s0 + $0x450] sm:$0xff] }
 0x108   :  { %v3477_v50 = vsel %vm3227_vm9, %v3476_v41, %v3472_v46  ;;  %v719_v51 = vpop.xlane.xlu1 %718  ;;  %v716_v53 = vpop.xlane.xlu0 %715 }
 0x109   :  { %v3481_v58 = vrot.slane %v2706_v47, %v6885_v48  ;;  %v3486_v59 = vrot.slane %v2707_v49, %v6895_v56  ;;  %v2102_v61 = vpack.c.bf16 %v719_v51, %v716_v53  ;;  %v951_v47 = vsel %vm533_vm0, %v160_v37, 0.0  ;;  %v162_v51 = vld [vmem:[%s10149_s0 + $0x468] sm:$0xff]  ;;  %v161_v53 = vld [vmem:[%s10149_s0 + $0x460] sm:$0xff] }
 0x10a   :  { %v948_v49 = vsel %vm533_vm0, %v159_v39, 0.0  ;;  %v957_v63 = vsel %vm533_vm0, %v162_v51, 0.0 }
 0x10b   :  { %v3482_v0 = vsel %vm3234_vm10, %v3481_v58, %v3477_v50  ;;  %v2708_v1 = vunpack.c.l.b16 %v2102_v61  ;;  %v2709_v5 = vunpack.c.h.b16 %v2102_v61  ;;  %934 = vadd.xlane.f32.xlu1 %v933_v55  ;;  %931 = vadd.xlane.f32.xlu0 %v930_v57 }
 0x10c   :  { %v3487_v7 = vsel %vm10154_vm11, %v3486_v59, %v3482_v0  ;;  %v725_v8 = vpop.xlane.xlu1 %724  ;;  %v722_v9 = vpop.xlane.xlu0 %721  ;;  %v954_v0 = vsel %vm533_vm0, %v161_v53, 0.0 }
 0x10d   :  { %v3491_v12 = vrot.slane %v2708_v1, %v6902_v3  ;;  %v3496_v14 = vrot.slane %v2709_v5, %v6905_v4  ;;  %v2103_v15 = vpack.c.bf16 %v725_v8, %v722_v9  ;;  %v164_v8 = vld [vmem:[%s10149_s0 + $0x478] sm:$0xff]  ;;  %v163_v9 = vld [vmem:[%s10149_s0 + $0x470] sm:$0xff] }
 0x10f   :  { %v3492_v18 = vsel %vm3248_vm12, %v3491_v12, %v3487_v7  ;;  %v2710_v21 = vunpack.c.l.b16 %v2103_v15  ;;  %v2711_v24 = vunpack.c.h.b16 %v2103_v15  ;;  %940 = vadd.xlane.f32.xlu1 %v939_v10  ;;  %937 = vadd.xlane.f32.xlu0 %v936_v11 }
 0x110   :  { %v3497_v25 = vsel %vm10153_vm13, %v3496_v14, %v3492_v18  ;;  %v731_v26 = vpop.xlane.xlu1 %730  ;;  %v728_v29 = vpop.xlane.xlu0 %727  ;;  %v963_v18 = vsel %vm533_vm0, %v164_v8, 0.0 }
 0x111   :  { %v3501_v33 = vrot.slane %v2710_v21, %v6920_v19  ;;  %v3506_v34 = vrot.slane %v2711_v24, %v6927_v28  ;;  %v2104_v35 = vpack.c.bf16 %v731_v26, %v728_v29  ;;  %v960_v21 = vsel %vm533_vm0, %v163_v9, 0.0  ;;  %v166_v29 = vld [vmem:[%s10149_s0 + $0x488] sm:$0xff] }
 0x113   :  { %v3502_v40 = vsel %vm3262_vm14, %v3501_v33, %v3497_v25  ;;  %v2712_v41 = vunpack.c.l.b16 %v2104_v35  ;;  %v2713_v43 = vunpack.c.h.b16 %v2104_v35  ;;  %946 = vadd.xlane.f32.xlu1 %v945_v31  ;;  %943 = vadd.xlane.f32.xlu0 %v942_v32  ;;  %v165_v31 = vld [vmem:[%s10149_s0 + $0x480] sm:$0xff] }
 0x114   :  { %v7240_v44 = vsel %vm3269_vm15, %v3506_v34, %v3502_v40  ;;  %v737_v45 = vpop.xlane.xlu1 %736  ;;  %v734_v46 = vpop.xlane.xlu0 %733  ;;  %v969_v40 = vsel %vm533_vm0, %v166_v29, 0.0 }
 0x115   :  { %v2105_v50 = vpack.c.bf16 %v737_v45, %v734_v46  ;;  %v3511_v55 = vrot.slane %v2712_v41, %v6795_v30  ;;  %v3515_v57 = vrot.slane %v2713_v43, %v6804_v38  ;;  %v966_v41 = vsel %vm533_vm0, %v165_v31, 0.0 }
 0x117   :  { %v2714_v58 = vunpack.c.l.b16 %v2105_v50  ;;  %v2715_v59 = vunpack.c.h.b16 %v2105_v50  ;;  %952 = vadd.xlane.f32.xlu1 %v951_v47  ;;  %949 = vadd.xlane.f32.xlu0 %v948_v49  ;;  %v3516_v10 = vsel %vm3171_vm1, %v3515_v57, %v3511_v55  ;;  %v168_v47 = vld [vmem:[%s10149_s0 + $0x498] sm:$0xff]  ;;  %v167_v49 = vld [vmem:[%s10149_s0 + $0x490] sm:$0xff] }
 0x118   :  { %v743_v61 = vpop.xlane.xlu1 %742  ;;  %v740_v62 = vpop.xlane.xlu0 %739 }
 0x119   :  { %v3520_v1 = vrot.slane %v2714_v58, %v6801_v36  ;;  %v3525_v5 = vrot.slane %v2715_v59, %v6813_v42  ;;  %v2106_v7 = vpack.c.bf16 %v743_v61, %v740_v62  ;;  %v975_v59 = vsel %vm533_vm0, %v168_v47, 0.0 }
 0x11a   :  { %v972_v61 = vsel %vm533_vm0, %v167_v49, 0.0 }
 0x11b   :  { %v3521_v11 = vsel %vm3178_vm2, %v3520_v1, %v3516_v10  ;;  %v2716_v12 = vunpack.c.l.b16 %v2106_v7  ;;  %v2717_v14 = vunpack.c.h.b16 %v2106_v7  ;;  %958 = vadd.xlane.f32.xlu1 %v957_v63  ;;  %955 = vadd.xlane.f32.xlu0 %v954_v0  ;;  %v170_v1 = vld [vmem:[%s10149_s0 + $0x4a8] sm:$0xff] }
 0x11c   :  { %v3526_v15 = vsel %vm3185_vm3, %v3525_v5, %v3521_v11  ;;  %v749_v16 = vpop.xlane.xlu1 %748  ;;  %v746_v17 = vpop.xlane.xlu0 %745  ;;  %v169_v5 = vld [vmem:[%s10149_s0 + $0x4a0] sm:$0xff] }
 0x11d   :  { %v3530_v24 = vrot.slane %v2716_v12, %v6824_v52  ;;  %v3535_v25 = vrot.slane %v2717_v14, %v6833_v60  ;;  %v2107_v26 = vpack.c.bf16 %v749_v16, %v746_v17  ;;  %v981_v14 = vsel %vm533_vm0, %v170_v1, 0.0 }
 0x11f   :  { %v3531_v32 = vsel %vm3192_vm4, %v3530_v24, %v3526_v15  ;;  %v2718_v33 = vunpack.c.l.b16 %v2107_v26  ;;  %v2719_v34 = vunpack.c.h.b16 %v2107_v26  ;;  %964 = vadd.xlane.f32.xlu1 %v963_v18  ;;  %961 = vadd.xlane.f32.xlu0 %v960_v21  ;;  %v978_v15 = vsel %vm533_vm0, %v169_v5, 0.0  ;;  %v172_v21 = vld [vmem:[%s10149_s0 + $0x4b8] sm:$0xff]  ;;  %v171_v24 = vld [vmem:[%s10149_s0 + $0x4b0] sm:$0xff] }
 0x120   :  { %v3536_v35 = vsel %vm3199_vm5, %v3535_v25, %v3531_v32  ;;  %v755_v37 = vpop.xlane.xlu1 %754  ;;  %v752_v39 = vpop.xlane.xlu0 %751 }
 0x121   :  { %v3540_v43 = vrot.slane %v2718_v33, %v6840_v2  ;;  %v3545_v45 = vrot.slane %v2719_v34, %v6853_v13  ;;  %v2108_v46 = vpack.c.bf16 %v755_v37, %v752_v39  ;;  %v987_v34 = vsel %vm533_vm0, %v172_v21, 0.0 }
 0x123   :  { %v3541_v50 = vsel %vm3206_vm6, %v3540_v43, %v3536_v35  ;;  %v2720_v51 = vunpack.c.l.b16 %v2108_v46  ;;  %v2721_v53 = vunpack.c.h.b16 %v2108_v46  ;;  %970 = vadd.xlane.f32.xlu1 %v969_v40  ;;  %967 = vadd.xlane.f32.xlu0 %v966_v41  ;;  %v984_v35 = vsel %vm533_vm0, %v171_v24, 0.0  ;;  %v174_v41 = vld [vmem:[%s10149_s0 + $0x4c8] sm:$0xff]  ;;  %v173_v43 = vld [vmem:[%s10149_s0 + $0x4c0] sm:$0xff] }
 0x124   :  { %v3546_v55 = vsel %vm3213_vm7, %v3545_v45, %v3541_v50  ;;  %v761_v57 = vpop.xlane.xlu1 %760  ;;  %v758_v58 = vpop.xlane.xlu0 %757 }
 0x125   :  { %v3550_v62 = vrot.slane %v2720_v51, %v6859_v22  ;;  %v3555_v63 = vrot.slane %v2721_v53, %v6867_v27  ;;  %v2109_v0 = vpack.c.bf16 %v761_v57, %v758_v58  ;;  %v993_v53 = vsel %vm533_vm0, %v174_v41, 0.0 }
 0x127   :  { %v3551_v7 = vsel %vm3220_vm8, %v3550_v62, %v3546_v55  ;;  %v2722_v8 = vunpack.c.l.b16 %v2109_v0  ;;  %v2723_v9 = vunpack.c.h.b16 %v2109_v0  ;;  %976 = vadd.xlane.f32.xlu1 %v975_v59  ;;  %973 = vadd.xlane.f32.xlu0 %v972_v61  ;;  %v990_v55 = vsel %vm533_vm0, %v173_v43, 0.0  ;;  %v176_v61 = vld [vmem:[%s10149_s0 + $0x4d8] sm:$0xff]  ;;  %v175_v62 = vld [vmem:[%s10149_s0 + $0x4d0] sm:$0xff] }
 0x128   :  { %v3556_v10 = vsel %vm3227_vm9, %v3555_v63, %v3551_v7  ;;  %v767_v11 = vpop.xlane.xlu1 %766  ;;  %v764_v12 = vpop.xlane.xlu0 %763 }
 0x129   :  { %v3560_v16 = vrot.slane %v2722_v8, %v6885_v48  ;;  %v3565_v17 = vrot.slane %v2723_v9, %v6895_v56  ;;  %v2110_v18 = vpack.c.bf16 %v767_v11, %v764_v12  ;;  %v999_v9 = vsel %vm533_vm0, %v176_v61, 0.0 }
 0x12b   :  { %v3561_v25 = vsel %vm3234_vm10, %v3560_v16, %v3556_v10  ;;  %v2724_v26 = vunpack.c.l.b16 %v2110_v18  ;;  %v2725_v29 = vunpack.c.h.b16 %v2110_v18  ;;  %982 = vadd.xlane.f32.xlu1 %v981_v14  ;;  %979 = vadd.xlane.f32.xlu0 %v978_v15  ;;  %v996_v10 = vsel %vm533_vm0, %v175_v62, 0.0  ;;  %v178_v14 = vld [vmem:[%s10149_s0 + $0x4e8] sm:$0xff]  ;;  %v177_v15 = vld [vmem:[%s10149_s0 + $0x4e0] sm:$0xff] }
 0x12c   :  { %v3566_v31 = vsel %vm10154_vm11, %v3565_v17, %v3561_v25  ;;  %v773_v32 = vpop.xlane.xlu1 %772  ;;  %v770_v33 = vpop.xlane.xlu0 %769  ;;  %v1005_v25 = vsel %vm533_vm0, %v178_v14, 0.0 }
 0x12d   :  { %v3570_v37 = vrot.slane %v2724_v26, %v6902_v3  ;;  %v3575_v39 = vrot.slane %v2725_v29, %v6905_v4  ;;  %v2111_v40 = vpack.c.bf16 %v773_v32, %v770_v33  ;;  %v1002_v26 = vsel %vm533_vm0, %v177_v15, 0.0  ;;  %v180_v33 = vld [vmem:[%s10149_s0 + $0x4f8] sm:$0xff] }
 0x12f   :  { %v3571_v45 = vsel %vm3248_vm12, %v3570_v37, %v3566_v31  ;;  %v2726_v46 = vunpack.c.l.b16 %v2111_v40  ;;  %v2727_v47 = vunpack.c.h.b16 %v2111_v40  ;;  %988 = vadd.xlane.f32.xlu1 %v987_v34  ;;  %985 = vadd.xlane.f32.xlu0 %v984_v35  ;;  %v179_v34 = vld [vmem:[%s10149_s0 + $0x4f0] sm:$0xff] }
 0x130   :  { %v3576_v49 = vsel %vm10153_vm13, %v3575_v39, %v3571_v45  ;;  %v779_v50 = vpop.xlane.xlu1 %778  ;;  %v776_v51 = vpop.xlane.xlu0 %775  ;;  %vm5720_vm13 = vcmask 1041409  }
 0x131   :  { %v3580_v57 = vrot.slane %v2726_v46, %v6920_v19  ;;  %v3585_v58 = vrot.slane %v2727_v47, %v6927_v28  ;;  %v2112_v59 = vpack.c.bf16 %v779_v50, %v776_v51  ;;  %v1011_v46 = vsel %vm533_vm0, %v180_v33, 0.0 }
 0x132   :  { %v1008_v47 = vsel %vm533_vm0, %v179_v34, 0.0 }
 0x133   :  { %v3581_v63 = vsel %vm3262_vm14, %v3580_v57, %v3576_v49  ;;  %v2728_v0 = vunpack.c.l.b16 %v2112_v59  ;;  %v2729_v1 = vunpack.c.h.b16 %v2112_v59  ;;  %994 = vadd.xlane.f32.xlu1 %v993_v53  ;;  %991 = vadd.xlane.f32.xlu0 %v990_v55  ;;  %v182_v53 = vld [vmem:[%s10149_s0 + $0x508] sm:$0xff]  ;;  %v181_v55 = vld [vmem:[%s10149_s0 + $0x500] sm:$0xff] }
 0x134   :  { %v3586_v5 = vsel %vm3269_vm15, %v3585_v58, %v3581_v63  ;;  %v785_v7 = vpop.xlane.xlu1 %784  ;;  %v782_v8 = vpop.xlane.xlu0 %781 }
 0x135   :  { %v7341_v11 = vsel %vm5720_vm13, %v3586_v5, %v6949_v54  ;;  %v2113_v12 = vpack.c.bf16 %v785_v7, %v782_v8  ;;  %v3590_v16 = vrot.slane %v2728_v0, %v6795_v30  ;;  %v3594_v17 = vrot.slane %v2729_v1, %v6804_v38 }
 0x136   :  { %v1017_v0 = vsel %vm533_vm0, %v182_v53, 0.0  ;;  %v1014_v1 = vsel %vm533_vm0, %v181_v55, 0.0 }
 0x137   :  { %v2730_v18 = vunpack.c.l.b16 %v2113_v12  ;;  %v2731_v21 = vunpack.c.h.b16 %v2113_v12  ;;  %1000 = vadd.xlane.f32.xlu1 %v999_v9  ;;  %997 = vadd.xlane.f32.xlu0 %v996_v10  ;;  %v3595_v35 = vsel %vm3171_vm1, %v3594_v17, %v3590_v16  ;;  %v184_v9 = vld [vmem:[%s10149_s0 + $0x518] sm:$0xff]  ;;  %v183_v10 = vld [vmem:[%s10149_s0 + $0x510] sm:$0xff] }
 0x138   :  { %v791_v24 = vpop.xlane.xlu1 %790  ;;  %v788_v54 = vpop.xlane.xlu0 %787 }
 0x139   :  { %v3599_v29 = vrot.slane %v2730_v18, %v6801_v36  ;;  %v3604_v31 = vrot.slane %v2731_v21, %v6813_v42  ;;  %v2114_v32 = vpack.c.bf16 %v791_v24, %v788_v54  ;;  %v1023_v21 = vsel %vm533_vm0, %v184_v9, 0.0 }
 0x13a   :  { %v1020_v24 = vsel %vm533_vm0, %v183_v10, 0.0 }
 0x13b   :  { %v3600_v37 = vsel %vm3178_vm2, %v3599_v29, %v3595_v35  ;;  %v2732_v39 = vunpack.c.l.b16 %v2114_v32  ;;  %v2733_v40 = vunpack.c.h.b16 %v2114_v32  ;;  %1006 = vadd.xlane.f32.xlu1 %v1005_v25  ;;  %1003 = vadd.xlane.f32.xlu0 %v1002_v26  ;;  %v186_v29 = vld [vmem:[%s10149_s0 + $0x528] sm:$0xff] }
 0x13c   :  { %v3605_v41 = vsel %vm3185_vm3, %v3604_v31, %v3600_v37  ;;  %v797_v43 = vpop.xlane.xlu1 %796  ;;  %v794_v45 = vpop.xlane.xlu0 %793  ;;  %v185_v31 = vld [vmem:[%s10149_s0 + $0x520] sm:$0xff] }
 0x13d   :  { %v3609_v49 = vrot.slane %v2732_v39, %v6824_v52  ;;  %v3614_v50 = vrot.slane %v2733_v40, %v6833_v60  ;;  %v2115_v51 = vpack.c.bf16 %v797_v43, %v794_v45  ;;  %v1029_v40 = vsel %vm533_vm0, %v186_v29, 0.0 }
 0x13f   :  { %v3610_v57 = vsel %vm3192_vm4, %v3609_v49, %v3605_v41  ;;  %v2734_v58 = vunpack.c.l.b16 %v2115_v51  ;;  %v2735_v59 = vunpack.c.h.b16 %v2115_v51  ;;  %1012 = vadd.xlane.f32.xlu1 %v1011_v46  ;;  %1009 = vadd.xlane.f32.xlu0 %v1008_v47  ;;  %v1026_v41 = vsel %vm533_vm0, %v185_v31, 0.0  ;;  %v188_v47 = vld [vmem:[%s10149_s0 + $0x538] sm:$0xff]  ;;  %v187_v49 = vld [vmem:[%s10149_s0 + $0x530] sm:$0xff] }
 0x140   :  { %v3615_v61 = vsel %vm3199_vm5, %v3614_v50, %v3610_v57  ;;  %v803_v62 = vpop.xlane.xlu1 %802  ;;  %v800_v63 = vpop.xlane.xlu0 %799 }
 0x141   :  { %v3619_v5 = vrot.slane %v2734_v58, %v6840_v2  ;;  %v3624_v7 = vrot.slane %v2735_v59, %v6853_v13  ;;  %v2116_v8 = vpack.c.bf16 %v803_v62, %v800_v63  ;;  %v1035_v59 = vsel %vm533_vm0, %v188_v47, 0.0 }
 0x143   :  { %v3620_v12 = vsel %vm3206_vm6, %v3619_v5, %v3615_v61  ;;  %v2736_v14 = vunpack.c.l.b16 %v2116_v8  ;;  %v2737_v15 = vunpack.c.h.b16 %v2116_v8  ;;  %1018 = vadd.xlane.f32.xlu1 %v1017_v0  ;;  %1015 = vadd.xlane.f32.xlu0 %v1014_v1  ;;  %v1032_v61 = vsel %vm533_vm0, %v187_v49, 0.0  ;;  %v190_v1 = vld [vmem:[%s10149_s0 + $0x548] sm:$0xff]  ;;  %v189_v5 = vld [vmem:[%s10149_s0 + $0x540] sm:$0xff] }
 0x144   :  { %v3625_v16 = vsel %vm3213_vm7, %v3624_v7, %v3620_v12  ;;  %v809_v17 = vpop.xlane.xlu1 %808  ;;  %v806_v18 = vpop.xlane.xlu0 %805 }
 0x145   :  { %v3629_v54 = vrot.slane %v2736_v14, %v6859_v22  ;;  %v3634_v25 = vrot.slane %v2737_v15, %v6867_v27  ;;  %v2117_v26 = vpack.c.bf16 %v809_v17, %v806_v18  ;;  %v1041_v15 = vsel %vm533_vm0, %v190_v1, 0.0 }
 0x147   :  { %v3630_v32 = vsel %vm3220_vm8, %v3629_v54, %v3625_v16  ;;  %v2738_v33 = vunpack.c.l.b16 %v2117_v26  ;;  %v2739_v34 = vunpack.c.h.b16 %v2117_v26  ;;  %1024 = vadd.xlane.f32.xlu1 %v1023_v21  ;;  %1021 = vadd.xlane.f32.xlu0 %v1020_v24  ;;  %v1038_v16 = vsel %vm533_vm0, %v189_v5, 0.0  ;;  %v192_v24 = vld [vmem:[%s10149_s0 + $0x558] sm:$0xff]  ;;  %v191_v54 = vld [vmem:[%s10149_s0 + $0x550] sm:$0xff] }
 0x148   :  { %v3635_v35 = vsel %vm3227_vm9, %v3634_v25, %v3630_v32  ;;  %v815_v37 = vpop.xlane.xlu1 %814  ;;  %v812_v39 = vpop.xlane.xlu0 %811 }
 0x149   :  { %v3639_v43 = vrot.slane %v2738_v33, %v6885_v48  ;;  %v3644_v45 = vrot.slane %v2739_v34, %v6895_v56  ;;  %v2118_v46 = vpack.c.bf16 %v815_v37, %v812_v39  ;;  %v1047_v34 = vsel %vm533_vm0, %v192_v24, 0.0 }
 0x14b   :  { %v3640_v50 = vsel %vm3234_vm10, %v3639_v43, %v3635_v35  ;;  %v2740_v51 = vunpack.c.l.b16 %v2118_v46  ;;  %v2741_v53 = vunpack.c.h.b16 %v2118_v46  ;;  %1030 = vadd.xlane.f32.xlu1 %v1029_v40  ;;  %1027 = vadd.xlane.f32.xlu0 %v1026_v41  ;;  %v1044_v35 = vsel %vm533_vm0, %v191_v54, 0.0  ;;  %v194_v40 = vld [vmem:[%s10149_s0 + $0x568] sm:$0xff]  ;;  %v193_v41 = vld [vmem:[%s10149_s0 + $0x560] sm:$0xff] }
 0x14c   :  { %v3645_v55 = vsel %vm10154_vm11, %v3644_v45, %v3640_v50  ;;  %v821_v57 = vpop.xlane.xlu1 %820  ;;  %v818_v58 = vpop.xlane.xlu0 %817  ;;  %vm10155_vm11 = vcmask 917312   ;;  %v1053_v50 = vsel %vm533_vm0, %v194_v40, 0.0 }
 0x14d   :  { %v3649_v62 = vrot.slane %v2740_v51, %v6902_v3  ;;  %v3654_v63 = vrot.slane %v2741_v53, %v6905_v4  ;;  %v2119_v0 = vpack.c.bf16 %v821_v57, %v818_v58  ;;  %v1050_v51 = vsel %vm533_vm0, %v193_v41, 0.0  ;;  %v196_v58 = vld [vmem:[%s10149_s0 + $0x578] sm:$0xff] }
 0x14f   :  { %v3650_v7 = vsel %vm3248_vm12, %v3649_v62, %v3645_v55  ;;  %v2742_v8 = vunpack.c.l.b16 %v2119_v0  ;;  %v2743_v9 = vunpack.c.h.b16 %v2119_v0  ;;  %1036 = vadd.xlane.f32.xlu1 %v1035_v59  ;;  %1033 = vadd.xlane.f32.xlu0 %v1032_v61  ;;  %v195_v59 = vld [vmem:[%s10149_s0 + $0x570] sm:$0xff] }
 0x150   :  { %v3655_v10 = vsel %vm10155_vm11, %v3654_v63, %v3650_v7  ;;  %v827_v12 = vpop.xlane.xlu1 %826  ;;  %v824_v14 = vpop.xlane.xlu0 %823  ;;  %vm10156_vm11 = vcmask 786112  }
 0x151   :  { %v3659_v17 = vrot.slane %v2742_v8, %v6920_v19  ;;  %v3664_v18 = vrot.slane %v2743_v9, %v6927_v28  ;;  %v2120_v21 = vpack.c.bf16 %v827_v12, %v824_v14  ;;  %v1059_v8 = vsel %vm533_vm0, %v196_v58, 0.0 }
 0x152   :  { %v1056_v9 = vsel %vm533_vm0, %v195_v59, 0.0 }
 0x153   :  { %v3660_v25 = vsel %vm3262_vm14, %v3659_v17, %v3655_v10  ;;  %v2744_v26 = vunpack.c.l.b16 %v2120_v21  ;;  %v2745_v29 = vunpack.c.h.b16 %v2120_v21  ;;  %1042 = vadd.xlane.f32.xlu1 %v1041_v15  ;;  %1039 = vadd.xlane.f32.xlu0 %v1038_v16  ;;  %v198_v15 = vld [vmem:[%s10149_s0 + $0x588] sm:$0xff]  ;;  %v197_v16 = vld [vmem:[%s10149_s0 + $0x580] sm:$0xff] }
 0x154   :  { %v3665_v31 = vsel %vm3269_vm15, %v3664_v18, %v3660_v25  ;;  %v833_v32 = vpop.xlane.xlu1 %832  ;;  %v830_v33 = vpop.xlane.xlu0 %829 }
 0x155   :  { %v7440_v37 = vsel %vm5720_vm13, %v3665_v31, %v7046_v6  ;;  %v2121_v39 = vpack.c.bf16 %v833_v32, %v830_v33  ;;  %v3669_v43 = vrot.slane %v2744_v26, %v6795_v30  ;;  %v3673_v45 = vrot.slane %v2745_v29, %v6804_v38 }
 0x156   :  { %v1065_v26 = vsel %vm533_vm0, %v198_v15, 0.0  ;;  %v1062_v29 = vsel %vm533_vm0, %v197_v16, 0.0 }
 0x157   :  { %v2746_v46 = vunpack.c.l.b16 %v2121_v39  ;;  %v2747_v47 = vunpack.c.h.b16 %v2121_v39  ;;  %1048 = vadd.xlane.f32.xlu1 %v1047_v34  ;;  %1045 = vadd.xlane.f32.xlu0 %v1044_v35  ;;  %v3674_v61 = vsel %vm3171_vm1, %v3673_v45, %v3669_v43  ;;  %v200_v34 = vld [vmem:[%s10149_s0 + $0x598] sm:$0xff]  ;;  %v199_v35 = vld [vmem:[%s10149_s0 + $0x590] sm:$0xff] }
 0x158   :  { %v839_v49 = vpop.xlane.xlu1 %838  ;;  %v836_v6 = vpop.xlane.xlu0 %835 }
 0x159   :  { %v3678_v53 = vrot.slane %v2746_v46, %v6801_v36  ;;  %v3683_v55 = vrot.slane %v2747_v47, %v6813_v42  ;;  %v2122_v57 = vpack.c.bf16 %v839_v49, %v836_v6  ;;  %v1071_v47 = vsel %vm533_vm0, %v200_v34, 0.0 }
 0x15a   :  { %v1068_v49 = vsel %vm533_vm0, %v199_v35, 0.0 }
 0x15b   :  { %v3679_v62 = vsel %vm3178_vm2, %v3678_v53, %v3674_v61  ;;  %v2748_v63 = vunpack.c.l.b16 %v2122_v57  ;;  %v2749_v0 = vunpack.c.h.b16 %v2122_v57  ;;  %1054 = vadd.xlane.f32.xlu1 %v1053_v50  ;;  %1051 = vadd.xlane.f32.xlu0 %v1050_v51  ;;  %v202_v53 = vld [vmem:[%s10149_s0 + $0x5a8] sm:$0xff] }
 0x15c   :  { %v3684_v1 = vsel %vm3185_vm3, %v3683_v55, %v3679_v62  ;;  %v845_v5 = vpop.xlane.xlu1 %844  ;;  %v842_v7 = vpop.xlane.xlu0 %841  ;;  %v201_v55 = vld [vmem:[%s10149_s0 + $0x5a0] sm:$0xff] }
 0x15d   :  { %v3688_v10 = vrot.slane %v2748_v63, %v6824_v52  ;;  %v3693_v12 = vrot.slane %v2749_v0, %v6833_v60  ;;  %v2123_v14 = vpack.c.bf16 %v845_v5, %v842_v7  ;;  %v1077_v0 = vsel %vm533_vm0, %v202_v53, 0.0 }
 0x15f   :  { %v3689_v17 = vsel %vm3192_vm4, %v3688_v10, %v3684_v1  ;;  %v2750_v18 = vunpack.c.l.b16 %v2123_v14  ;;  %v2751_v21 = vunpack.c.h.b16 %v2123_v14  ;;  %1060 = vadd.xlane.f32.xlu1 %v1059_v8  ;;  %1057 = vadd.xlane.f32.xlu0 %v1056_v9  ;;  %v1074_v1 = vsel %vm533_vm0, %v201_v55, 0.0  ;;  %v204_v9 = vld [vmem:[%s10149_s0 + $0x5b8] sm:$0xff]  ;;  %v203_v10 = vld [vmem:[%s10149_s0 + $0x5b0] sm:$0xff] }
 0x160   :  { %v3694_v24 = vsel %vm3199_vm5, %v3693_v12, %v3689_v17  ;;  %v851_v54 = vpop.xlane.xlu1 %850  ;;  %v848_v25 = vpop.xlane.xlu0 %847 }
 0x161   :  { %v3698_v31 = vrot.slane %v2750_v18, %v6840_v2  ;;  %v3703_v32 = vrot.slane %v2751_v21, %v6853_v13  ;;  %v2124_v33 = vpack.c.bf16 %v851_v54, %v848_v25  ;;  %v1083_v21 = vsel %vm533_vm0, %v204_v9, 0.0 }
 0x163   :  { %v3699_v39 = vsel %vm3206_vm6, %v3698_v31, %v3694_v24  ;;  %v2752_v40 = vunpack.c.l.b16 %v2124_v33  ;;  %v2753_v41 = vunpack.c.h.b16 %v2124_v33  ;;  %1066 = vadd.xlane.f32.xlu1 %v1065_v26  ;;  %1063 = vadd.xlane.f32.xlu0 %v1062_v29  ;;  %v1080_v24 = vsel %vm533_vm0, %v203_v10, 0.0  ;;  %v206_v29 = vld [vmem:[%s10149_s0 + $0x5c8] sm:$0xff]  ;;  %v205_v31 = vld [vmem:[%s10149_s0 + $0x5c0] sm:$0xff] }
 0x164   :  { %v3704_v43 = vsel %vm3213_vm7, %v3703_v32, %v3699_v39  ;;  %v857_v45 = vpop.xlane.xlu1 %856  ;;  %v854_v46 = vpop.xlane.xlu0 %853 }
 0x165   :  { %v3708_v6 = vrot.slane %v2752_v40, %v6859_v22  ;;  %v3713_v50 = vrot.slane %v2753_v41, %v6867_v27  ;;  %v2125_v51 = vpack.c.bf16 %v857_v45, %v854_v46  ;;  %v1089_v41 = vsel %vm533_vm0, %v206_v29, 0.0 }
 0x167   :  { %v3709_v57 = vsel %vm3220_vm8, %v3708_v6, %v3704_v43  ;;  %v2754_v58 = vunpack.c.l.b16 %v2125_v51  ;;  %v2755_v59 = vunpack.c.h.b16 %v2125_v51  ;;  %1072 = vadd.xlane.f32.xlu1 %v1071_v47  ;;  %1069 = vadd.xlane.f32.xlu0 %v1068_v49  ;;  %v1086_v43 = vsel %vm533_vm0, %v205_v31, 0.0  ;;  %v208_v49 = vld [vmem:[%s10149_s0 + $0x5d8] sm:$0xff]  ;;  %v207_v6 = vld [vmem:[%s10149_s0 + $0x5d0] sm:$0xff] }
 0x168   :  { %v3714_v61 = vsel %vm3227_vm9, %v3713_v50, %v3709_v57  ;;  %v863_v62 = vpop.xlane.xlu1 %862  ;;  %v860_v63 = vpop.xlane.xlu0 %859 }
 0x169   :  { %v3718_v5 = vrot.slane %v2754_v58, %v6885_v48  ;;  %v3723_v7 = vrot.slane %v2755_v59, %v6895_v56  ;;  %v2126_v8 = vpack.c.bf16 %v863_v62, %v860_v63  ;;  %v1095_v59 = vsel %vm533_vm0, %v208_v49, 0.0 }
 0x16b   :  { %v3719_v12 = vsel %vm3234_vm10, %v3718_v5, %v3714_v61  ;;  %v2756_v14 = vunpack.c.l.b16 %v2126_v8  ;;  %v2757_v15 = vunpack.c.h.b16 %v2126_v8  ;;  %1078 = vadd.xlane.f32.xlu1 %v1077_v0  ;;  %1075 = vadd.xlane.f32.xlu0 %v1074_v1  ;;  %v1092_v61 = vsel %vm533_vm0, %v207_v6, 0.0  ;;  %v210_v0 = vld [vmem:[%s10149_s0 + $0x5e8] sm:$0xff]  ;;  %v209_v1 = vld [vmem:[%s10149_s0 + $0x5e0] sm:$0xff] }
 0x16c   :  { %v3724_v16 = vsel %vm10156_vm11, %v3723_v7, %v3719_v12  ;;  %v869_v17 = vpop.xlane.xlu1 %868  ;;  %v866_v18 = vpop.xlane.xlu0 %865  ;;  %vm10157_vm11 = vcmask 917312   ;;  %v1101_v12 = vsel %vm533_vm0, %v210_v0, 0.0 }
 0x16d   :  { %v3728_v54 = vrot.slane %v2756_v14, %v6902_v3  ;;  %v3733_v25 = vrot.slane %v2757_v15, %v6905_v4  ;;  %v2127_v26 = vpack.c.bf16 %v869_v17, %v866_v18  ;;  %v1098_v14 = vsel %vm533_vm0, %v209_v1, 0.0  ;;  %v212_v18 = vld [vmem:[%s10149_s0 + $0x5f8] sm:$0xff] }
 0x16f   :  { %v3729_v32 = vsel %vm3248_vm12, %v3728_v54, %v3724_v16  ;;  %v2758_v33 = vunpack.c.l.b16 %v2127_v26  ;;  %v2759_v34 = vunpack.c.h.b16 %v2127_v26  ;;  %1084 = vadd.xlane.f32.xlu1 %v1083_v21  ;;  %1081 = vadd.xlane.f32.xlu0 %v1080_v24  ;;  %v211_v21 = vld [vmem:[%s10149_s0 + $0x5f0] sm:$0xff] }
 0x170   :  { %v3734_v35 = vsel %vm10157_vm11, %v3733_v25, %v3729_v32  ;;  %v875_v39 = vpop.xlane.xlu1 %874  ;;  %v872_v40 = vpop.xlane.xlu0 %871  ;;  %vm10158_vm11 = vcmask 786112  }
 0x171   :  { %v3738_v45 = vrot.slane %v2758_v33, %v6920_v19  ;;  %v3743_v46 = vrot.slane %v2759_v34, %v6927_v28  ;;  %v2128_v47 = vpack.c.bf16 %v875_v39, %v872_v40  ;;  %v1107_v33 = vsel %vm533_vm0, %v212_v18, 0.0 }
 0x172   :  { %v1104_v34 = vsel %vm533_vm0, %v211_v21, 0.0 }
 0x173   :  { %v3739_v50 = vsel %vm3262_vm14, %v3738_v45, %v3734_v35  ;;  %v2760_v51 = vunpack.c.l.b16 %v2128_v47  ;;  %v2761_v53 = vunpack.c.h.b16 %v2128_v47  ;;  %1090 = vadd.xlane.f32.xlu1 %v1089_v41  ;;  %1087 = vadd.xlane.f32.xlu0 %v1086_v43  ;;  %v214_v41 = vld [vmem:[%s10149_s0 + $0x608] sm:$0xff]  ;;  %v213_v43 = vld [vmem:[%s10149_s0 + $0x600] sm:$0xff] }
 0x174   :  { %v3744_v55 = vsel %vm3269_vm15, %v3743_v46, %v3739_v50  ;;  %v881_v57 = vpop.xlane.xlu1 %880  ;;  %v878_v58 = vpop.xlane.xlu0 %877 }
 0x175   :  { %v7539_v62 = vsel %vm5720_vm13, %v3744_v55, %v7143_v23  ;;  %v2129_v63 = vpack.c.bf16 %v881_v57, %v878_v58  ;;  %v3748_v5 = vrot.slane %v2760_v51, %v6795_v30  ;;  %v3752_v7 = vrot.slane %v2761_v53, %v6804_v38 }
 0x176   :  { %v1113_v51 = vsel %vm533_vm0, %v214_v41, 0.0  ;;  %v1110_v53 = vsel %vm533_vm0, %v213_v43, 0.0 }
 0x177   :  { %v2762_v8 = vunpack.c.l.b16 %v2129_v63  ;;  %v2763_v9 = vunpack.c.h.b16 %v2129_v63  ;;  %1096 = vadd.xlane.f32.xlu1 %v1095_v59  ;;  %1093 = vadd.xlane.f32.xlu0 %v1092_v61  ;;  %v3753_v24 = vsel %vm3171_vm1, %v3752_v7, %v3748_v5  ;;  %v216_v59 = vld [vmem:[%s10149_s0 + $0x618] sm:$0xff]  ;;  %v215_v61 = vld [vmem:[%s10149_s0 + $0x610] sm:$0xff] }
 0x178   :  { %v887_v10 = vpop.xlane.xlu1 %886  ;;  %v884_v23 = vpop.xlane.xlu0 %883 }
 0x179   :  { %v3757_v15 = vrot.slane %v2762_v8, %v6801_v36  ;;  %v3762_v16 = vrot.slane %v2763_v9, %v6813_v42  ;;  %v2130_v17 = vpack.c.bf16 %v887_v10, %v884_v23  ;;  %v1119_v9 = vsel %vm533_vm0, %v216_v59, 0.0 }
 0x17a   :  { %v1116_v10 = vsel %vm533_vm0, %v215_v61, 0.0 }
 0x17b   :  { %v3758_v54 = vsel %vm3178_vm2, %v3757_v15, %v3753_v24  ;;  %v2764_v25 = vunpack.c.l.b16 %v2130_v17  ;;  %v2765_v26 = vunpack.c.h.b16 %v2130_v17  ;;  %1102 = vadd.xlane.f32.xlu1 %v1101_v12  ;;  %1099 = vadd.xlane.f32.xlu0 %v1098_v14  ;;  %v218_v15 = vld [vmem:[%s10149_s0 + $0x628] sm:$0xff] }
 0x17c   :  { %v3763_v29 = vsel %vm3185_vm3, %v3762_v16, %v3758_v54  ;;  %v893_v31 = vpop.xlane.xlu1 %892  ;;  %v890_v32 = vpop.xlane.xlu0 %889  ;;  %v217_v16 = vld [vmem:[%s10149_s0 + $0x620] sm:$0xff] }
 0x17d   :  { %v3767_v35 = vrot.slane %v2764_v25, %v6824_v52  ;;  %v3772_v39 = vrot.slane %v2765_v26, %v6833_v60  ;;  %v2131_v40 = vpack.c.bf16 %v893_v31, %v890_v32  ;;  %v1125_v26 = vsel %vm533_vm0, %v218_v15, 0.0 }
 0x17f   :  { %v3768_v45 = vsel %vm3192_vm4, %v3767_v35, %v3763_v29  ;;  %v2766_v46 = vunpack.c.l.b16 %v2131_v40  ;;  %v2767_v47 = vunpack.c.h.b16 %v2131_v40  ;;  %1108 = vadd.xlane.f32.xlu1 %v1107_v33  ;;  %1105 = vadd.xlane.f32.xlu0 %v1104_v34  ;;  %v1122_v29 = vsel %vm533_vm0, %v217_v16, 0.0  ;;  %v220_v34 = vld [vmem:[%s10149_s0 + $0x638] sm:$0xff]  ;;  %v219_v35 = vld [vmem:[%s10149_s0 + $0x630] sm:$0xff] }
 0x180   :  { %v3773_v49 = vsel %vm3199_vm5, %v3772_v39, %v3768_v45  ;;  %v899_v6 = vpop.xlane.xlu1 %898  ;;  %v896_v50 = vpop.xlane.xlu0 %895 }
 0x181   :  { %v3777_v55 = vrot.slane %v2766_v46, %v6840_v2  ;;  %v3782_v57 = vrot.slane %v2767_v47, %v6853_v13  ;;  %v2132_v58 = vpack.c.bf16 %v899_v6, %v896_v50  ;;  %v1131_v47 = vsel %vm533_vm0, %v220_v34, 0.0 }
 0x183   :  { %v3778_v63 = vsel %vm3206_vm6, %v3777_v55, %v3773_v49  ;;  %v2768_v0 = vunpack.c.l.b16 %v2132_v58  ;;  %v2769_v1 = vunpack.c.h.b16 %v2132_v58  ;;  %1114 = vadd.xlane.f32.xlu1 %v1113_v51  ;;  %1111 = vadd.xlane.f32.xlu0 %v1110_v53  ;;  %v1128_v49 = vsel %vm533_vm0, %v219_v35, 0.0  ;;  %v222_v53 = vld [vmem:[%s10149_s0 + $0x648] sm:$0xff]  ;;  %v221_v55 = vld [vmem:[%s10149_s0 + $0x640] sm:$0xff] }
 0x184   :  { %v3783_v5 = vsel %vm3213_vm7, %v3782_v57, %v3778_v63  ;;  %v905_v7 = vpop.xlane.xlu1 %904  ;;  %v902_v8 = vpop.xlane.xlu0 %901 }
 0x185   :  { %v3787_v23 = vrot.slane %v2768_v0, %v6859_v22  ;;  %v3792_v12 = vrot.slane %v2769_v1, %v6867_v27  ;;  %v2133_v14 = vpack.c.bf16 %v905_v7, %v902_v8  ;;  %v1137_v1 = vsel %vm533_vm0, %v222_v53, 0.0 }
 0x187   :  { %v3788_v17 = vsel %vm3220_vm8, %v3787_v23, %v3783_v5  ;;  %v2770_v18 = vunpack.c.l.b16 %v2133_v14  ;;  %v2771_v21 = vunpack.c.h.b16 %v2133_v14  ;;  %1120 = vadd.xlane.f32.xlu1 %v1119_v9  ;;  %1117 = vadd.xlane.f32.xlu0 %v1116_v10  ;;  %v1134_v5 = vsel %vm533_vm0, %v221_v55, 0.0  ;;  %v224_v10 = vld [vmem:[%s10149_s0 + $0x658] sm:$0xff]  ;;  %v223_v23 = vld [vmem:[%s10149_s0 + $0x650] sm:$0xff] }
 0x188   :  { %v3793_v24 = vsel %vm3227_vm9, %v3792_v12, %v3788_v17  ;;  %v911_v54 = vpop.xlane.xlu1 %910  ;;  %v908_v25 = vpop.xlane.xlu0 %907 }
 0x189   :  { %v3797_v31 = vrot.slane %v2770_v18, %v6885_v48  ;;  %v3802_v32 = vrot.slane %v2771_v21, %v6895_v56  ;;  %v2134_v33 = vpack.c.bf16 %v911_v54, %v908_v25  ;;  %v1143_v21 = vsel %vm533_vm0, %v224_v10, 0.0 }
 0x18b   :  { %v3798_v39 = vsel %vm3234_vm10, %v3797_v31, %v3793_v24  ;;  %v2772_v40 = vunpack.c.l.b16 %v2134_v33  ;;  %v2773_v41 = vunpack.c.h.b16 %v2134_v33  ;;  %1126 = vadd.xlane.f32.xlu1 %v1125_v26  ;;  %1123 = vadd.xlane.f32.xlu0 %v1122_v29  ;;  %v1140_v24 = vsel %vm533_vm0, %v223_v23, 0.0  ;;  %v226_v26 = vld [vmem:[%s10149_s0 + $0x668] sm:$0xff]  ;;  %v225_v29 = vld [vmem:[%s10149_s0 + $0x660] sm:$0xff] }
 0x18c   :  { %v3803_v43 = vsel %vm10158_vm11, %v3802_v32, %v3798_v39  ;;  %v917_v45 = vpop.xlane.xlu1 %916  ;;  %v914_v46 = vpop.xlane.xlu0 %913  ;;  %vm10159_vm11 = vcmask 917312   ;;  %v1149_v39 = vsel %vm533_vm0, %v226_v26, 0.0 }
 0x18d   :  { %v3807_v6 = vrot.slane %v2772_v40, %v6902_v3  ;;  %v3812_v50 = vrot.slane %v2773_v41, %v6905_v4  ;;  %v2135_v51 = vpack.c.bf16 %v917_v45, %v914_v46  ;;  %v1146_v40 = vsel %vm533_vm0, %v225_v29, 0.0  ;;  %v228_v46 = vld [vmem:[%s10149_s0 + $0x678] sm:$0xff] }
 0x18f   :  { %v3808_v57 = vsel %vm3248_vm12, %v3807_v6, %v3803_v43  ;;  %v2774_v58 = vunpack.c.l.b16 %v2135_v51  ;;  %v2775_v59 = vunpack.c.h.b16 %v2135_v51  ;;  %1132 = vadd.xlane.f32.xlu1 %v1131_v47  ;;  %1129 = vadd.xlane.f32.xlu0 %v1128_v49  ;;  %v227_v47 = vld [vmem:[%s10149_s0 + $0x670] sm:$0xff] }
 0x190   :  { %v3813_v61 = vsel %vm10159_vm11, %v3812_v50, %v3808_v57  ;;  %v923_v63 = vpop.xlane.xlu1 %922  ;;  %v920_v0 = vpop.xlane.xlu0 %919 }
 0x191   :  { %v3817_v7 = vrot.slane %v2774_v58, %v6920_v19  ;;  %v3822_v8 = vrot.slane %v2775_v59, %v6927_v28  ;;  %v2136_v9 = vpack.c.bf16 %v923_v63, %v920_v0  ;;  %v1155_v58 = vsel %vm533_vm0, %v228_v46, 0.0 }
 0x192   :  { %v1152_v59 = vsel %vm533_vm0, %v227_v47, 0.0 }
 0x193   :  { %v3818_v12 = vsel %vm3262_vm14, %v3817_v7, %v3813_v61  ;;  %v2776_v14 = vunpack.c.l.b16 %v2136_v9  ;;  %v2777_v15 = vunpack.c.h.b16 %v2136_v9  ;;  %1138 = vadd.xlane.f32.xlu1 %v1137_v1  ;;  %1135 = vadd.xlane.f32.xlu0 %v1134_v5  ;;  %v230_v1 = vld [vmem:[%s10149_s0 + $0x688] sm:$0xff]  ;;  %v229_v5 = vld [vmem:[%s10149_s0 + $0x680] sm:$0xff] }
 0x194   :  { %v3823_v16 = vsel %vm3269_vm15, %v3822_v8, %v3818_v12  ;;  %v929_v17 = vpop.xlane.xlu1 %928  ;;  %v926_v18 = vpop.xlane.xlu0 %925 }
 0x195   :  { %v7638_v54 = vsel %vm5720_vm13, %v3823_v16, %v7240_v44  ;;  %v2137_v25 = vpack.c.bf16 %v929_v17, %v926_v18  ;;  %v3827_v31 = vrot.slane %v2776_v14, %v6795_v30  ;;  %v3831_v32 = vrot.slane %v2777_v15, %v6804_v38 }
 0x196   :  { %v1161_v14 = vsel %vm533_vm0, %v230_v1, 0.0  ;;  %v1158_v15 = vsel %vm533_vm0, %v229_v5, 0.0  ;;  %vm10160_vm13 = vcmask 786112  }
 0x197   :  { %v2778_v33 = vunpack.c.l.b16 %v2137_v25  ;;  %v2779_v34 = vunpack.c.h.b16 %v2137_v25  ;;  %1144 = vadd.xlane.f32.xlu1 %v1143_v21  ;;  %1141 = vadd.xlane.f32.xlu0 %v1140_v24  ;;  %v3832_v49 = vsel %vm3171_vm1, %v3831_v32, %v3827_v31  ;;  %v232_v21 = vld [vmem:[%s10149_s0 + $0x698] sm:$0xff]  ;;  %v231_v24 = vld [vmem:[%s10149_s0 + $0x690] sm:$0xff] }
 0x198   :  { %v935_v35 = vpop.xlane.xlu1 %934  ;;  %v932_v44 = vpop.xlane.xlu0 %931 }
 0x199   :  { %v3836_v41 = vrot.slane %v2778_v33, %v6801_v36  ;;  %v3841_v43 = vrot.slane %v2779_v34, %v6813_v42  ;;  %v2138_v45 = vpack.c.bf16 %v935_v35, %v932_v44  ;;  %v1167_v34 = vsel %vm533_vm0, %v232_v21, 0.0 }
 0x19a   :  { %v1164_v35 = vsel %vm533_vm0, %v231_v24, 0.0 }
 0x19b   :  { %v3837_v6 = vsel %vm3178_vm2, %v3836_v41, %v3832_v49  ;;  %v2780_v50 = vunpack.c.l.b16 %v2138_v45  ;;  %v2781_v51 = vunpack.c.h.b16 %v2138_v45  ;;  %1150 = vadd.xlane.f32.xlu1 %v1149_v39  ;;  %1147 = vadd.xlane.f32.xlu0 %v1146_v40  ;;  %v234_v41 = vld [vmem:[%s10149_s0 + $0x6a8] sm:$0xff] }
 0x19c   :  { %v3842_v53 = vsel %vm3185_vm3, %v3841_v43, %v3837_v6  ;;  %v941_v55 = vpop.xlane.xlu1 %940  ;;  %v938_v57 = vpop.xlane.xlu0 %937  ;;  %v233_v43 = vld [vmem:[%s10149_s0 + $0x6a0] sm:$0xff] }
 0x19d   :  { %v3846_v61 = vrot.slane %v2780_v50, %v6824_v52  ;;  %v3851_v63 = vrot.slane %v2781_v51, %v6833_v60  ;;  %v2139_v0 = vpack.c.bf16 %v941_v55, %v938_v57  ;;  %v1173_v51 = vsel %vm533_vm0, %v234_v41, 0.0 }
 0x19f   :  { %v3847_v7 = vsel %vm3192_vm4, %v3846_v61, %v3842_v53  ;;  %v2782_v8 = vunpack.c.l.b16 %v2139_v0  ;;  %v2783_v9 = vunpack.c.h.b16 %v2139_v0  ;;  %1156 = vadd.xlane.f32.xlu1 %v1155_v58  ;;  %1153 = vadd.xlane.f32.xlu0 %v1152_v59  ;;  %v1170_v53 = vsel %vm533_vm0, %v233_v43, 0.0  ;;  %v236_v59 = vld [vmem:[%s10149_s0 + $0x6b8] sm:$0xff]  ;;  %v235_v61 = vld [vmem:[%s10149_s0 + $0x6b0] sm:$0xff] }
 0x1a0   :  { %v3852_v10 = vsel %vm3199_vm5, %v3851_v63, %v3847_v7  ;;  %v947_v23 = vpop.xlane.xlu1 %946  ;;  %v944_v12 = vpop.xlane.xlu0 %943 }
 0x1a1   :  { %v3856_v16 = vrot.slane %v2782_v8, %v6840_v2  ;;  %v3861_v17 = vrot.slane %v2783_v9, %v6853_v13  ;;  %v2140_v18 = vpack.c.bf16 %v947_v23, %v944_v12  ;;  %v1179_v9 = vsel %vm533_vm0, %v236_v59, 0.0 }
 0x1a3   :  { %v3857_v25 = vsel %vm3206_vm6, %v3856_v16, %v3852_v10  ;;  %v2784_v26 = vunpack.c.l.b16 %v2140_v18  ;;  %v2785_v29 = vunpack.c.h.b16 %v2140_v18  ;;  %1162 = vadd.xlane.f32.xlu1 %v1161_v14  ;;  %1159 = vadd.xlane.f32.xlu0 %v1158_v15  ;;  %v1176_v10 = vsel %vm533_vm0, %v235_v61, 0.0  ;;  %v238_v15 = vld [vmem:[%s10149_s0 + $0x6c8] sm:$0xff]  ;;  %v237_v16 = vld [vmem:[%s10149_s0 + $0x6c0] sm:$0xff] }
 0x1a4   :  { %v3862_v31 = vsel %vm3213_vm7, %v3861_v17, %v3857_v25  ;;  %v953_v32 = vpop.xlane.xlu1 %952  ;;  %v950_v33 = vpop.xlane.xlu0 %949 }
 0x1a5   :  { %v3866_v44 = vrot.slane %v2784_v26, %v6859_v22  ;;  %v3871_v39 = vrot.slane %v2785_v29, %v6867_v27  ;;  %v2141_v40 = vpack.c.bf16 %v953_v32, %v950_v33  ;;  %v1185_v29 = vsel %vm533_vm0, %v238_v15, 0.0 }
 0x1a7   :  { %v3867_v45 = vsel %vm3220_vm8, %v3866_v44, %v3862_v31  ;;  %v2786_v46 = vunpack.c.l.b16 %v2141_v40  ;;  %v2787_v47 = vunpack.c.h.b16 %v2141_v40  ;;  %1168 = vadd.xlane.f32.xlu1 %v1167_v34  ;;  %1165 = vadd.xlane.f32.xlu0 %v1164_v35  ;;  %v1182_v31 = vsel %vm533_vm0, %v237_v16, 0.0  ;;  %v240_v35 = vld [vmem:[%s10149_s0 + $0x6d8] sm:$0xff]  ;;  %v239_v44 = vld [vmem:[%s10149_s0 + $0x6d0] sm:$0xff] }
 0x1a8   :  { %v3872_v49 = vsel %vm3227_vm9, %v3871_v39, %v3867_v45  ;;  %v959_v6 = vpop.xlane.xlu1 %958  ;;  %v956_v50 = vpop.xlane.xlu0 %955 }
 0x1a9   :  { %v3876_v55 = vrot.slane %v2786_v46, %v6885_v48  ;;  %v3881_v57 = vrot.slane %v2787_v47, %v6895_v56  ;;  %v2142_v58 = vpack.c.bf16 %v959_v6, %v956_v50  ;;  %v1191_v47 = vsel %vm533_vm0, %v240_v35, 0.0 }
 0x1ab   :  { %v3877_v63 = vsel %vm3234_vm10, %v3876_v55, %v3872_v49  ;;  %v2788_v0 = vunpack.c.l.b16 %v2142_v58  ;;  %v2789_v1 = vunpack.c.h.b16 %v2142_v58  ;;  %1174 = vadd.xlane.f32.xlu1 %v1173_v51  ;;  %1171 = vadd.xlane.f32.xlu0 %v1170_v53  ;;  %v1188_v49 = vsel %vm533_vm0, %v239_v44, 0.0  ;;  %v242_v51 = vld [vmem:[%s10149_s0 + $0x6e8] sm:$0xff]  ;;  %v241_v53 = vld [vmem:[%s10149_s0 + $0x6e0] sm:$0xff] }
 0x1ac   :  { %v3882_v5 = vsel %vm10160_vm13, %v3881_v57, %v3877_v63  ;;  %v965_v7 = vpop.xlane.xlu1 %964  ;;  %v962_v8 = vpop.xlane.xlu0 %961  ;;  %vm5722_vm13 = vcmask 1042434   ;;  %v1197_v63 = vsel %vm533_vm0, %v242_v51, 0.0 }
 0x1ad   :  { %v3886_v23 = vrot.slane %v2788_v0, %v6902_v3  ;;  %v3891_v12 = vrot.slane %v2789_v1, %v6905_v4  ;;  %v2143_v14 = vpack.c.bf16 %v965_v7, %v962_v8  ;;  %v1194_v0 = vsel %vm533_vm0, %v241_v53, 0.0  ;;  %v244_v8 = vld [vmem:[%s10149_s0 + $0x6f8] sm:$0xff] }
 0x1af   :  { %v3887_v17 = vsel %vm3248_vm12, %v3886_v23, %v3882_v5  ;;  %v2790_v18 = vunpack.c.l.b16 %v2143_v14  ;;  %v2791_v21 = vunpack.c.h.b16 %v2143_v14  ;;  %1180 = vadd.xlane.f32.xlu1 %v1179_v9  ;;  %1177 = vadd.xlane.f32.xlu0 %v1176_v10  ;;  %v243_v9 = vld [vmem:[%s10149_s0 + $0x6f0] sm:$0xff] }
 0x1b0   :  { %v3892_v24 = vsel %vm10159_vm11, %v3891_v12, %v3887_v17  ;;  %v971_v25 = vpop.xlane.xlu1 %970  ;;  %v968_v26 = vpop.xlane.xlu0 %967  ;;  %vm10161_vm11 = vcmask 786112  }
 0x1b1   :  { %v3896_v32 = vrot.slane %v2790_v18, %v6920_v19  ;;  %v3901_v33 = vrot.slane %v2791_v21, %v6927_v28  ;;  %v2144_v34 = vpack.c.bf16 %v971_v25, %v968_v26  ;;  %v1203_v18 = vsel %vm533_vm0, %v244_v8, 0.0 }
 0x1b2   :  { %v1200_v21 = vsel %vm533_vm0, %v243_v9, 0.0 }
 0x1b3   :  { %v3897_v39 = vsel %vm3262_vm14, %v3896_v32, %v3892_v24  ;;  %v2792_v40 = vunpack.c.l.b16 %v2144_v34  ;;  %v2793_v41 = vunpack.c.h.b16 %v2144_v34  ;;  %1186 = vadd.xlane.f32.xlu1 %v1185_v29  ;;  %1183 = vadd.xlane.f32.xlu0 %v1182_v31  ;;  %v246_v29 = vld [vmem:[%s10149_s0 + $0x708] sm:$0xff]  ;;  %v245_v31 = vld [vmem:[%s10149_s0 + $0x700] sm:$0xff] }
 0x1b4   :  { %v3902_v43 = vsel %vm3269_vm15, %v3901_v33, %v3897_v39  ;;  %v977_v45 = vpop.xlane.xlu1 %976  ;;  %v974_v46 = vpop.xlane.xlu0 %973 }
 0x1b5   :  { %v7737_v6 = vsel %vm5722_vm13, %v3902_v43, %v7341_v11  ;;  %v2145_v50 = vpack.c.bf16 %v977_v45, %v974_v46  ;;  %v3906_v55 = vrot.slane %v2792_v40, %v6795_v30  ;;  %v3910_v57 = vrot.slane %v2793_v41, %v6804_v38 }
 0x1b6   :  { %v1209_v40 = vsel %vm533_vm0, %v246_v29, 0.0  ;;  %v1206_v41 = vsel %vm533_vm0, %v245_v31, 0.0 }
 0x1b7   :  { %v2794_v58 = vunpack.c.l.b16 %v2145_v50  ;;  %v2795_v59 = vunpack.c.h.b16 %v2145_v50  ;;  %1192 = vadd.xlane.f32.xlu1 %v1191_v47  ;;  %1189 = vadd.xlane.f32.xlu0 %v1188_v49  ;;  %v3911_v10 = vsel %vm3171_vm1, %v3910_v57, %v3906_v55  ;;  %v248_v47 = vld [vmem:[%s10149_s0 + $0x718] sm:$0xff]  ;;  %v247_v49 = vld [vmem:[%s10149_s0 + $0x710] sm:$0xff] }
 0x1b8   :  { %v983_v61 = vpop.xlane.xlu1 %982  ;;  %v980_v11 = vpop.xlane.xlu0 %979 }
 0x1b9   :  { %v3915_v1 = vrot.slane %v2794_v58, %v6801_v36  ;;  %v3920_v5 = vrot.slane %v2795_v59, %v6813_v42  ;;  %v2146_v7 = vpack.c.bf16 %v983_v61, %v980_v11  ;;  %v1215_v59 = vsel %vm533_vm0, %v248_v47, 0.0 }
 0x1ba   :  { %v1212_v61 = vsel %vm533_vm0, %v247_v49, 0.0 }
 0x1bb   :  { %v3916_v23 = vsel %vm3178_vm2, %v3915_v1, %v3911_v10  ;;  %v2796_v12 = vunpack.c.l.b16 %v2146_v7  ;;  %v2797_v14 = vunpack.c.h.b16 %v2146_v7  ;;  %1198 = vadd.xlane.f32.xlu1 %v1197_v63  ;;  %1195 = vadd.xlane.f32.xlu0 %v1194_v0  ;;  %v250_v1 = vld [vmem:[%s10149_s0 + $0x728] sm:$0xff] }
 0x1bc   :  { %v3921_v15 = vsel %vm3185_vm3, %v3920_v5, %v3916_v23  ;;  %v989_v16 = vpop.xlane.xlu1 %988  ;;  %v986_v17 = vpop.xlane.xlu0 %985  ;;  %v249_v5 = vld [vmem:[%s10149_s0 + $0x720] sm:$0xff] }
 0x1bd   :  { %v3925_v24 = vrot.slane %v2796_v12, %v6824_v52  ;;  %v3930_v25 = vrot.slane %v2797_v14, %v6833_v60  ;;  %v2147_v26 = vpack.c.bf16 %v989_v16, %v986_v17  ;;  %v1221_v14 = vsel %vm533_vm0, %v250_v1, 0.0 }
 0x1bf   :  { %v3926_v32 = vsel %vm3192_vm4, %v3925_v24, %v3921_v15  ;;  %v2798_v33 = vunpack.c.l.b16 %v2147_v26  ;;  %v2799_v34 = vunpack.c.h.b16 %v2147_v26  ;;  %1204 = vadd.xlane.f32.xlu1 %v1203_v18  ;;  %1201 = vadd.xlane.f32.xlu0 %v1200_v21  ;;  %v1218_v15 = vsel %vm533_vm0, %v249_v5, 0.0  ;;  %v252_v21 = vld [vmem:[%s10149_s0 + $0x738] sm:$0xff]  ;;  %v251_v24 = vld [vmem:[%s10149_s0 + $0x730] sm:$0xff] }
 0x1c0   :  { %v3931_v35 = vsel %vm3199_vm5, %v3930_v25, %v3926_v32  ;;  %v995_v44 = vpop.xlane.xlu1 %994  ;;  %v992_v39 = vpop.xlane.xlu0 %991 }
 0x1c1   :  { %v3935_v43 = vrot.slane %v2798_v33, %v6840_v2  ;;  %v3940_v45 = vrot.slane %v2799_v34, %v6853_v13  ;;  %v2148_v46 = vpack.c.bf16 %v995_v44, %v992_v39  ;;  %v1227_v34 = vsel %vm533_vm0, %v252_v21, 0.0 }
 0x1c3   :  { %v3936_v50 = vsel %vm3206_vm6, %v3935_v43, %v3931_v35  ;;  %v2800_v51 = vunpack.c.l.b16 %v2148_v46  ;;  %v2801_v53 = vunpack.c.h.b16 %v2148_v46  ;;  %1210 = vadd.xlane.f32.xlu1 %v1209_v40  ;;  %1207 = vadd.xlane.f32.xlu0 %v1206_v41  ;;  %v1224_v35 = vsel %vm533_vm0, %v251_v24, 0.0  ;;  %v254_v41 = vld [vmem:[%s10149_s0 + $0x748] sm:$0xff]  ;;  %v253_v43 = vld [vmem:[%s10149_s0 + $0x740] sm:$0xff] }
 0x1c4   :  { %v3941_v55 = vsel %vm3213_vm7, %v3940_v45, %v3936_v50  ;;  %v1001_v57 = vpop.xlane.xlu1 %1000  ;;  %v998_v58 = vpop.xlane.xlu0 %997 }
 0x1c5   :  { %v3945_v11 = vrot.slane %v2800_v51, %v6859_v22  ;;  %v3950_v63 = vrot.slane %v2801_v53, %v6867_v27  ;;  %v2149_v0 = vpack.c.bf16 %v1001_v57, %v998_v58  ;;  %v1233_v53 = vsel %vm533_vm0, %v254_v41, 0.0 }
 0x1c7   :  { %v3946_v7 = vsel %vm3220_vm8, %v3945_v11, %v3941_v55  ;;  %v2802_v8 = vunpack.c.l.b16 %v2149_v0  ;;  %v2803_v9 = vunpack.c.h.b16 %v2149_v0  ;;  %1216 = vadd.xlane.f32.xlu1 %v1215_v59  ;;  %1213 = vadd.xlane.f32.xlu0 %v1212_v61  ;;  %v1230_v55 = vsel %vm533_vm0, %v253_v43, 0.0  ;;  %v256_v61 = vld [vmem:[%s10149_s0 + $0x758] sm:$0xff]  ;;  %v255_v11 = vld [vmem:[%s10149_s0 + $0x750] sm:$0xff] }
 0x1c8   :  { %v3951_v10 = vsel %vm3227_vm9, %v3950_v63, %v3946_v7  ;;  %v1007_v23 = vpop.xlane.xlu1 %1006  ;;  %v1004_v12 = vpop.xlane.xlu0 %1003 }
 0x1c9   :  { %v3955_v16 = vrot.slane %v2802_v8, %v6885_v48  ;;  %v3960_v17 = vrot.slane %v2803_v9, %v6895_v56  ;;  %v2150_v18 = vpack.c.bf16 %v1007_v23, %v1004_v12  ;;  %v1239_v9 = vsel %vm533_vm0, %v256_v61, 0.0  ;;  %v258_v12 = vld [vmem:[%s10149_s0 + $0x768] sm:$0xff] }
 0x1cb   :  { %v3956_v25 = vsel %vm3234_vm10, %v3955_v16, %v3951_v10  ;;  %v2804_v26 = vunpack.c.l.b16 %v2150_v18  ;;  %v2805_v29 = vunpack.c.h.b16 %v2150_v18  ;;  %1222 = vadd.xlane.f32.xlu1 %v1221_v14  ;;  %1219 = vadd.xlane.f32.xlu0 %v1218_v15  ;;  %v1236_v10 = vsel %vm533_vm0, %v255_v11, 0.0  ;;  %v257_v14 = vld [vmem:[%s10149_s0 + $0x760] sm:$0xff] }
 0x1cc   :  { %v3961_v31 = vsel %vm10161_vm11, %v3960_v17, %v3956_v25  ;;  %v1013_v32 = vpop.xlane.xlu1 %1012  ;;  %v1010_v33 = vpop.xlane.xlu0 %1009  ;;  %vm10162_vm11 = vcmask 917312  }
 0x1cd   :  { %v3965_v44 = vrot.slane %v2804_v26, %v6902_v3  ;;  %v3970_v39 = vrot.slane %v2805_v29, %v6905_v4  ;;  %v2151_v40 = vpack.c.bf16 %v1013_v32, %v1010_v33  ;;  %v1245_v26 = vsel %vm533_vm0, %v258_v12, 0.0  ;;  %v260_v33 = vld [vmem:[%s10149_s0 + $0x778] sm:$0xff] }
 0x1ce   :  { %v1242_v29 = vsel %vm533_vm0, %v257_v14, 0.0 }
 0x1cf   :  { %v3966_v45 = vsel %vm3248_vm12, %v3965_v44, %v3961_v31  ;;  %v2806_v46 = vunpack.c.l.b16 %v2151_v40  ;;  %v2807_v47 = vunpack.c.h.b16 %v2151_v40  ;;  %1228 = vadd.xlane.f32.xlu1 %v1227_v34  ;;  %1225 = vadd.xlane.f32.xlu0 %v1224_v35  ;;  %v259_v34 = vld [vmem:[%s10149_s0 + $0x770] sm:$0xff] }
 0x1d0   :  { %v3971_v49 = vsel %vm10162_vm11, %v3970_v39, %v3966_v45  ;;  %v1019_v50 = vpop.xlane.xlu1 %1018  ;;  %v1016_v51 = vpop.xlane.xlu0 %1015  ;;  %vm10163_vm11 = vcmask 786112  }
 0x1d1   :  { %v3975_v57 = vrot.slane %v2806_v46, %v6920_v19  ;;  %v3980_v58 = vrot.slane %v2807_v47, %v6927_v28  ;;  %v2152_v59 = vpack.c.bf16 %v1019_v50, %v1016_v51  ;;  %v1251_v46 = vsel %vm533_vm0, %v260_v33, 0.0 }
 0x1d2   :  { %v1248_v47 = vsel %vm533_vm0, %v259_v34, 0.0 }
 0x1d3   :  { %v3976_v63 = vsel %vm3262_vm14, %v3975_v57, %v3971_v49  ;;  %v2808_v0 = vunpack.c.l.b16 %v2152_v59  ;;  %v2809_v1 = vunpack.c.h.b16 %v2152_v59  ;;  %1234 = vadd.xlane.f32.xlu1 %v1233_v53  ;;  %1231 = vadd.xlane.f32.xlu0 %v1230_v55  ;;  %v262_v53 = vld [vmem:[%s10149_s0 + $0x788] sm:$0xff]  ;;  %v261_v55 = vld [vmem:[%s10149_s0 + $0x780] sm:$0xff] }
 0x1d4   :  { %v3981_v5 = vsel %vm3269_vm15, %v3980_v58, %v3976_v63  ;;  %v1025_v7 = vpop.xlane.xlu1 %1024  ;;  %v1022_v8 = vpop.xlane.xlu0 %1021 }
 0x1d5   :  { %v2153_v23 = vpack.c.bf16 %v1025_v7, %v1022_v8  ;;  %v7842_v15 = vsel %vm5722_vm13, %v3981_v5, %v7440_v37  ;;  %v3985_v16 = vrot.slane %v2808_v0, %v6795_v30  ;;  %v3989_v17 = vrot.slane %v2809_v1, %v6804_v38 }
 0x1d6   :  { %v1257_v0 = vsel %vm533_vm0, %v262_v53, 0.0  ;;  %v1254_v1 = vsel %vm533_vm0, %v261_v55, 0.0 }
 0x1d7   :  { %v2810_v18 = vunpack.c.l.b16 %v2153_v23  ;;  %v2811_v21 = vunpack.c.h.b16 %v2153_v23  ;;  %1240 = vadd.xlane.f32.xlu1 %v1239_v9  ;;  %1237 = vadd.xlane.f32.xlu0 %v1236_v10  ;;  %v3990_v35 = vsel %vm3171_vm1, %v3989_v17, %v3985_v16  ;;  %v264_v9 = vld [vmem:[%s10149_s0 + $0x798] sm:$0xff]  ;;  %v263_v10 = vld [vmem:[%s10149_s0 + $0x790] sm:$0xff] }
 0x1d8   :  { %v1031_v24 = vpop.xlane.xlu1 %1030  ;;  %v1028_v25 = vpop.xlane.xlu0 %1027 }
 0x1d9   :  { %v3994_v31 = vrot.slane %v2810_v18, %v6801_v36  ;;  %v3999_v32 = vrot.slane %v2811_v21, %v6813_v42  ;;  %v2154_v37 = vpack.c.bf16 %v1031_v24, %v1028_v25  ;;  %v1263_v21 = vsel %vm533_vm0, %v264_v9, 0.0 }
 0x1da   :  { %v1260_v24 = vsel %vm533_vm0, %v263_v10, 0.0 }
 0x1db   :  { %v3995_v44 = vsel %vm3178_vm2, %v3994_v31, %v3990_v35  ;;  %v2812_v39 = vunpack.c.l.b16 %v2154_v37  ;;  %v2813_v40 = vunpack.c.h.b16 %v2154_v37  ;;  %1246 = vadd.xlane.f32.xlu1 %v1245_v26  ;;  %1243 = vadd.xlane.f32.xlu0 %v1242_v29  ;;  %v266_v31 = vld [vmem:[%s10149_s0 + $0x7a8] sm:$0xff] }
 0x1dc   :  { %v4000_v41 = vsel %vm3185_vm3, %v3999_v32, %v3995_v44  ;;  %v1037_v43 = vpop.xlane.xlu1 %1036  ;;  %v1034_v45 = vpop.xlane.xlu0 %1033  ;;  %v265_v32 = vld [vmem:[%s10149_s0 + $0x7a0] sm:$0xff] }
 0x1dd   :  { %v4004_v49 = vrot.slane %v2812_v39, %v6824_v52  ;;  %v4009_v50 = vrot.slane %v2813_v40, %v6833_v60  ;;  %v2155_v51 = vpack.c.bf16 %v1037_v43, %v1034_v45  ;;  %v1269_v40 = vsel %vm533_vm0, %v266_v31, 0.0 }
 0x1df   :  { %v4005_v57 = vsel %vm3192_vm4, %v4004_v49, %v4000_v41  ;;  %v2814_v58 = vunpack.c.l.b16 %v2155_v51  ;;  %v2815_v59 = vunpack.c.h.b16 %v2155_v51  ;;  %1252 = vadd.xlane.f32.xlu1 %v1251_v46  ;;  %1249 = vadd.xlane.f32.xlu0 %v1248_v47  ;;  %v1266_v41 = vsel %vm533_vm0, %v265_v32, 0.0  ;;  %v268_v47 = vld [vmem:[%s10149_s0 + $0x7b8] sm:$0xff]  ;;  %v267_v49 = vld [vmem:[%s10149_s0 + $0x7b0] sm:$0xff] }
 0x1e0   :  { %v4010_v61 = vsel %vm3199_vm5, %v4009_v50, %v4005_v57  ;;  %v1043_v11 = vpop.xlane.xlu1 %1042  ;;  %v1040_v63 = vpop.xlane.xlu0 %1039 }
 0x1e1   :  { %v4014_v5 = vrot.slane %v2814_v58, %v6840_v2  ;;  %v4019_v7 = vrot.slane %v2815_v59, %v6853_v13  ;;  %v2156_v8 = vpack.c.bf16 %v1043_v11, %v1040_v63  ;;  %v1275_v59 = vsel %vm533_vm0, %v268_v47, 0.0 }
 0x1e3   :  { %v4015_v23 = vsel %vm3206_vm6, %v4014_v5, %v4010_v61  ;;  %v2816_v12 = vunpack.c.l.b16 %v2156_v8  ;;  %v2817_v14 = vunpack.c.h.b16 %v2156_v8  ;;  %1258 = vadd.xlane.f32.xlu1 %v1257_v0  ;;  %1255 = vadd.xlane.f32.xlu0 %v1254_v1  ;;  %v1272_v61 = vsel %vm533_vm0, %v267_v49, 0.0  ;;  %v270_v1 = vld [vmem:[%s10149_s0 + $0x7c8] sm:$0xff]  ;;  %v269_v5 = vld [vmem:[%s10149_s0 + $0x7c0] sm:$0xff] }
 0x1e4   :  { %v4020_v16 = vsel %vm3213_vm7, %v4019_v7, %v4015_v23  ;;  %v1049_v17 = vpop.xlane.xlu1 %1048  ;;  %v1046_v18 = vpop.xlane.xlu0 %1045 }
 0x1e5   :  { %v4024_v25 = vrot.slane %v2816_v12, %v6859_v22  ;;  %v4029_v26 = vrot.slane %v2817_v14, %v6867_v27  ;;  %v2157_v29 = vpack.c.bf16 %v1049_v17, %v1046_v18  ;;  %v1281_v14 = vsel %vm533_vm0, %v270_v1, 0.0 }
 0x1e7   :  { %v4025_v37 = vsel %vm3220_vm8, %v4024_v25, %v4020_v16  ;;  %v2818_v33 = vunpack.c.l.b16 %v2157_v29  ;;  %v2819_v34 = vunpack.c.h.b16 %v2157_v29  ;;  %1264 = vadd.xlane.f32.xlu1 %v1263_v21  ;;  %1261 = vadd.xlane.f32.xlu0 %v1260_v24  ;;  %v1278_v16 = vsel %vm533_vm0, %v269_v5, 0.0  ;;  %v272_v24 = vld [vmem:[%s10149_s0 + $0x7d8] sm:$0xff]  ;;  %v271_v25 = vld [vmem:[%s10149_s0 + $0x7d0] sm:$0xff] }
 0x1e8   :  { %v4030_v35 = vsel %vm3227_vm9, %v4029_v26, %v4025_v37  ;;  %v1055_v44 = vpop.xlane.xlu1 %1054  ;;  %v1052_v39 = vpop.xlane.xlu0 %1051 }
 0x1e9   :  { %v4034_v43 = vrot.slane %v2818_v33, %v6885_v48  ;;  %v4039_v45 = vrot.slane %v2819_v34, %v6895_v56  ;;  %v2158_v46 = vpack.c.bf16 %v1055_v44, %v1052_v39  ;;  %v1287_v34 = vsel %vm533_vm0, %v272_v24, 0.0 }
 0x1eb   :  { %v4035_v50 = vsel %vm3234_vm10, %v4034_v43, %v4030_v35  ;;  %v2820_v51 = vunpack.c.l.b16 %v2158_v46  ;;  %v2821_v53 = vunpack.c.h.b16 %v2158_v46  ;;  %1270 = vadd.xlane.f32.xlu1 %v1269_v40  ;;  %1267 = vadd.xlane.f32.xlu0 %v1266_v41  ;;  %v1284_v35 = vsel %vm533_vm0, %v271_v25, 0.0  ;;  %v274_v40 = vld [vmem:[%s10149_s0 + $0x7e8] sm:$0xff]  ;;  %v273_v41 = vld [vmem:[%s10149_s0 + $0x7e0] sm:$0xff] }
 0x1ec   :  { %v4040_v55 = vsel %vm10163_vm11, %v4039_v45, %v4035_v50  ;;  %v1061_v57 = vpop.xlane.xlu1 %1060  ;;  %v1058_v58 = vpop.xlane.xlu0 %1057  ;;  %vm10164_vm11 = vcmask 917312   ;;  %v1293_v50 = vsel %vm533_vm0, %v274_v40, 0.0 }
 0x1ed   :  { %v4044_v11 = vrot.slane %v2820_v51, %v6902_v3  ;;  %v4049_v63 = vrot.slane %v2821_v53, %v6905_v4  ;;  %v2159_v0 = vpack.c.bf16 %v1061_v57, %v1058_v58  ;;  %v1290_v51 = vsel %vm533_vm0, %v273_v41, 0.0  ;;  %v276_v58 = vld [vmem:[%s10149_s0 + $0x7f8] sm:$0xff] }
 0x1ef   :  { %v4045_v7 = vsel %vm3248_vm12, %v4044_v11, %v4040_v55  ;;  %v2822_v8 = vunpack.c.l.b16 %v2159_v0  ;;  %v2823_v9 = vunpack.c.h.b16 %v2159_v0  ;;  %1276 = vadd.xlane.f32.xlu1 %v1275_v59  ;;  %1273 = vadd.xlane.f32.xlu0 %v1272_v61  ;;  %v275_v59 = vld [vmem:[%s10149_s0 + $0x7f0] sm:$0xff] }
 0x1f0   :  { %v4050_v10 = vsel %vm10164_vm11, %v4049_v63, %v4045_v7  ;;  %v1067_v23 = vpop.xlane.xlu1 %1066  ;;  %v1064_v12 = vpop.xlane.xlu0 %1063  ;;  %vm10165_vm11 = vcmask 786112  }
 0x1f1   :  { %v4054_v17 = vrot.slane %v2822_v8, %v6920_v19  ;;  %v4059_v18 = vrot.slane %v2823_v9, %v6927_v28  ;;  %v2160_v21 = vpack.c.bf16 %v1067_v23, %v1064_v12  ;;  %v1299_v8 = vsel %vm533_vm0, %v276_v58, 0.0 }
 0x1f2   :  { %v1296_v9 = vsel %vm533_vm0, %v275_v59, 0.0 }
 0x1f3   :  { %v4055_v26 = vsel %vm3262_vm14, %v4054_v17, %v4050_v10  ;;  %v2824_v29 = vunpack.c.l.b16 %v2160_v21  ;;  %v2825_v31 = vunpack.c.h.b16 %v2160_v21  ;;  %1282 = vadd.xlane.f32.xlu1 %v1281_v14  ;;  %1279 = vadd.xlane.f32.xlu0 %v1278_v16  ;;  %v278_v14 = vld [vmem:[%s10149_s0 + $0x808] sm:$0xff]  ;;  %v277_v16 = vld [vmem:[%s10149_s0 + $0x800] sm:$0xff] }
 0x1f4   :  { %v4060_v32 = vsel %vm3269_vm15, %v4059_v18, %v4055_v26  ;;  %v1073_v37 = vpop.xlane.xlu1 %1072  ;;  %v1070_v33 = vpop.xlane.xlu0 %1069 }
 0x1f5   :  { %v7935_v44 = vsel %vm5722_vm13, %v4060_v32, %v7539_v62  ;;  %v2161_v39 = vpack.c.bf16 %v1073_v37, %v1070_v33  ;;  %v4064_v43 = vrot.slane %v2824_v29, %v6795_v30  ;;  %v4068_v45 = vrot.slane %v2825_v31, %v6804_v38 }
 0x1f6   :  { %v1305_v29 = vsel %vm533_vm0, %v278_v14, 0.0  ;;  %v1302_v31 = vsel %vm533_vm0, %v277_v16, 0.0 }
 0x1f7   :  { %v2826_v46 = vunpack.c.l.b16 %v2161_v39  ;;  %v2827_v47 = vunpack.c.h.b16 %v2161_v39  ;;  %1288 = vadd.xlane.f32.xlu1 %v1287_v34  ;;  %1285 = vadd.xlane.f32.xlu0 %v1284_v35  ;;  %v4069_v61 = vsel %vm3171_vm1, %v4068_v45, %v4064_v43  ;;  %v280_v34 = vld [vmem:[%s10149_s0 + $0x818] sm:$0xff]  ;;  %v279_v35 = vld [vmem:[%s10149_s0 + $0x810] sm:$0xff] }
 0x1f8   :  { %v1079_v49 = vpop.xlane.xlu1 %1078  ;;  %v1076_v62 = vpop.xlane.xlu0 %1075 }
 0x1f9   :  { %v4073_v53 = vrot.slane %v2826_v46, %v6801_v36  ;;  %v4078_v55 = vrot.slane %v2827_v47, %v6813_v42  ;;  %v2162_v57 = vpack.c.bf16 %v1079_v49, %v1076_v62  ;;  %v1311_v47 = vsel %vm533_vm0, %v280_v34, 0.0 }
 0x1fa   :  { %v1308_v49 = vsel %vm533_vm0, %v279_v35, 0.0 }
 0x1fb   :  { %v4074_v11 = vsel %vm3178_vm2, %v4073_v53, %v4069_v61  ;;  %v2828_v63 = vunpack.c.l.b16 %v2162_v57  ;;  %v2829_v0 = vunpack.c.h.b16 %v2162_v57  ;;  %1294 = vadd.xlane.f32.xlu1 %v1293_v50  ;;  %1291 = vadd.xlane.f32.xlu0 %v1290_v51  ;;  %v282_v53 = vld [vmem:[%s10149_s0 + $0x828] sm:$0xff] }
 0x1fc   :  { %v4079_v1 = vsel %vm3185_vm3, %v4078_v55, %v4074_v11  ;;  %v1085_v5 = vpop.xlane.xlu1 %1084  ;;  %v1082_v7 = vpop.xlane.xlu0 %1081  ;;  %v281_v55 = vld [vmem:[%s10149_s0 + $0x820] sm:$0xff] }
 0x1fd   :  { %v4083_v10 = vrot.slane %v2828_v63, %v6824_v52  ;;  %v4088_v23 = vrot.slane %v2829_v0, %v6833_v60  ;;  %v2163_v12 = vpack.c.bf16 %v1085_v5, %v1082_v7  ;;  %v1317_v0 = vsel %vm533_vm0, %v282_v53, 0.0 }
 0x1ff   :  { %v4084_v17 = vsel %vm3192_vm4, %v4083_v10, %v4079_v1  ;;  %v2830_v18 = vunpack.c.l.b16 %v2163_v12  ;;  %v2831_v21 = vunpack.c.h.b16 %v2163_v12  ;;  %1300 = vadd.xlane.f32.xlu1 %v1299_v8  ;;  %1297 = vadd.xlane.f32.xlu0 %v1296_v9  ;;  %v1314_v1 = vsel %vm533_vm0, %v281_v55, 0.0  ;;  %v284_v9 = vld [vmem:[%s10149_s0 + $0x838] sm:$0xff]  ;;  %v283_v10 = vld [vmem:[%s10149_s0 + $0x830] sm:$0xff] }
 0x200   :  { %v4089_v24 = vsel %vm3199_vm5, %v4088_v23, %v4084_v17  ;;  %v1091_v25 = vpop.xlane.xlu1 %1090  ;;  %v1088_v26 = vpop.xlane.xlu0 %1087 }
 0x201   :  { %v4093_v32 = vrot.slane %v2830_v18, %v6840_v2  ;;  %v4098_v37 = vrot.slane %v2831_v21, %v6853_v13  ;;  %v2164_v33 = vpack.c.bf16 %v1091_v25, %v1088_v26  ;;  %v1323_v21 = vsel %vm533_vm0, %v284_v9, 0.0 }
 0x203   :  { %v4094_v39 = vsel %vm3206_vm6, %v4093_v32, %v4089_v24  ;;  %v2832_v40 = vunpack.c.l.b16 %v2164_v33  ;;  %v2833_v41 = vunpack.c.h.b16 %v2164_v33  ;;  %1306 = vadd.xlane.f32.xlu1 %v1305_v29  ;;  %1303 = vadd.xlane.f32.xlu0 %v1302_v31  ;;  %v1320_v24 = vsel %vm533_vm0, %v283_v10, 0.0  ;;  %v286_v31 = vld [vmem:[%s10149_s0 + $0x848] sm:$0xff]  ;;  %v285_v32 = vld [vmem:[%s10149_s0 + $0x840] sm:$0xff] }
 0x204   :  { %v4099_v43 = vsel %vm3213_vm7, %v4098_v37, %v4094_v39  ;;  %v1097_v45 = vpop.xlane.xlu1 %1096  ;;  %v1094_v46 = vpop.xlane.xlu0 %1093 }
 0x205   :  { %v4103_v62 = vrot.slane %v2832_v40, %v6859_v22  ;;  %v4108_v50 = vrot.slane %v2833_v41, %v6867_v27  ;;  %v2165_v51 = vpack.c.bf16 %v1097_v45, %v1094_v46  ;;  %v1329_v41 = vsel %vm533_vm0, %v286_v31, 0.0 }
 0x207   :  { %v4104_v57 = vsel %vm3220_vm8, %v4103_v62, %v4099_v43  ;;  %v2834_v58 = vunpack.c.l.b16 %v2165_v51  ;;  %v2835_v59 = vunpack.c.h.b16 %v2165_v51  ;;  %1312 = vadd.xlane.f32.xlu1 %v1311_v47  ;;  %1309 = vadd.xlane.f32.xlu0 %v1308_v49  ;;  %v1326_v43 = vsel %vm533_vm0, %v285_v32, 0.0  ;;  %v288_v49 = vld [vmem:[%s10149_s0 + $0x858] sm:$0xff]  ;;  %v287_v62 = vld [vmem:[%s10149_s0 + $0x850] sm:$0xff] }
 0x208   :  { %v4109_v61 = vsel %vm3227_vm9, %v4108_v50, %v4104_v57  ;;  %v1103_v11 = vpop.xlane.xlu1 %1102  ;;  %v1100_v63 = vpop.xlane.xlu0 %1099 }
 0x209   :  { %v4113_v5 = vrot.slane %v2834_v58, %v6885_v48  ;;  %v4118_v7 = vrot.slane %v2835_v59, %v6895_v56  ;;  %v2166_v8 = vpack.c.bf16 %v1103_v11, %v1100_v63  ;;  %v1335_v59 = vsel %vm533_vm0, %v288_v49, 0.0  ;;  %v290_v63 = vld [vmem:[%s10149_s0 + $0x868] sm:$0xff] }
 0x20b   :  { %v4114_v23 = vsel %vm3234_vm10, %v4113_v5, %v4109_v61  ;;  %v2836_v12 = vunpack.c.l.b16 %v2166_v8  ;;  %v2837_v14 = vunpack.c.h.b16 %v2166_v8  ;;  %1318 = vadd.xlane.f32.xlu1 %v1317_v0  ;;  %1315 = vadd.xlane.f32.xlu0 %v1314_v1  ;;  %v1332_v61 = vsel %vm533_vm0, %v287_v62, 0.0  ;;  %v289_v0 = vld [vmem:[%s10149_s0 + $0x860] sm:$0xff] }
 0x20c   :  { %v4119_v16 = vsel %vm10165_vm11, %v4118_v7, %v4114_v23  ;;  %v1109_v17 = vpop.xlane.xlu1 %1108  ;;  %v1106_v18 = vpop.xlane.xlu0 %1105  ;;  %vm10166_vm11 = vcmask 917312  }
 0x20d   :  { %v4123_v25 = vrot.slane %v2836_v12, %v6902_v3  ;;  %v4128_v26 = vrot.slane %v2837_v14, %v6905_v4  ;;  %v2167_v29 = vpack.c.bf16 %v1109_v17, %v1106_v18  ;;  %v1341_v12 = vsel %vm533_vm0, %v290_v63, 0.0  ;;  %v292_v18 = vld [vmem:[%s10149_s0 + $0x878] sm:$0xff] }
 0x20e   :  { %v1338_v14 = vsel %vm533_vm0, %v289_v0, 0.0 }
 0x20f   :  { %v4124_v37 = vsel %vm3248_vm12, %v4123_v25, %v4119_v16  ;;  %v2838_v33 = vunpack.c.l.b16 %v2167_v29  ;;  %v2839_v34 = vunpack.c.h.b16 %v2167_v29  ;;  %1324 = vadd.xlane.f32.xlu1 %v1323_v21  ;;  %1321 = vadd.xlane.f32.xlu0 %v1320_v24  ;;  %v291_v21 = vld [vmem:[%s10149_s0 + $0x870] sm:$0xff] }
 0x210   :  { %v4129_v35 = vsel %vm10166_vm11, %v4128_v26, %v4124_v37  ;;  %v1115_v39 = vpop.xlane.xlu1 %1114  ;;  %v1112_v40 = vpop.xlane.xlu0 %1111 }
 0x211   :  { %v4133_v45 = vrot.slane %v2838_v33, %v6920_v19  ;;  %v4138_v46 = vrot.slane %v2839_v34, %v6927_v28  ;;  %v2168_v47 = vpack.c.bf16 %v1115_v39, %v1112_v40  ;;  %v1347_v33 = vsel %vm533_vm0, %v292_v18, 0.0 }
 0x212   :  { %v1344_v34 = vsel %vm533_vm0, %v291_v21, 0.0 }
 0x213   :  { %v4134_v50 = vsel %vm3262_vm14, %v4133_v45, %v4129_v35  ;;  %v2840_v51 = vunpack.c.l.b16 %v2168_v47  ;;  %v2841_v53 = vunpack.c.h.b16 %v2168_v47  ;;  %1330 = vadd.xlane.f32.xlu1 %v1329_v41  ;;  %1327 = vadd.xlane.f32.xlu0 %v1326_v43  ;;  %v294_v41 = vld [vmem:[%s10149_s0 + $0x888] sm:$0xff]  ;;  %v293_v43 = vld [vmem:[%s10149_s0 + $0x880] sm:$0xff] }
 0x214   :  { %v4139_v55 = vsel %vm3269_vm15, %v4138_v46, %v4134_v50  ;;  %v1121_v57 = vpop.xlane.xlu1 %1120  ;;  %v1118_v58 = vpop.xlane.xlu0 %1117 }
 0x215   :  { %v2169_v11 = vpack.c.bf16 %v1121_v57, %v1118_v58  ;;  %v8040_v1 = vsel %vm5722_vm13, %v4139_v55, %v7638_v54  ;;  %v4143_v5 = vrot.slane %v2840_v51, %v6795_v30  ;;  %v4147_v7 = vrot.slane %v2841_v53, %v6804_v38 }
 0x216   :  { %v1353_v51 = vsel %vm533_vm0, %v294_v41, 0.0  ;;  %v1350_v53 = vsel %vm533_vm0, %v293_v43, 0.0  ;;  %vm10167_vm13 = vcmask 786112  }
 0x217   :  { %v2842_v8 = vunpack.c.l.b16 %v2169_v11  ;;  %v2843_v9 = vunpack.c.h.b16 %v2169_v11  ;;  %1336 = vadd.xlane.f32.xlu1 %v1335_v59  ;;  %1333 = vadd.xlane.f32.xlu0 %v1332_v61  ;;  %v4148_v24 = vsel %vm3171_vm1, %v4147_v7, %v4143_v5  ;;  %v296_v59 = vld [vmem:[%s10149_s0 + $0x898] sm:$0xff]  ;;  %v295_v61 = vld [vmem:[%s10149_s0 + $0x890] sm:$0xff] }
 0x218   :  { %v1127_v10 = vpop.xlane.xlu1 %1126  ;;  %v1124_v23 = vpop.xlane.xlu0 %1123 }
 0x219   :  { %v4152_v16 = vrot.slane %v2842_v8, %v6801_v36  ;;  %v4157_v17 = vrot.slane %v2843_v9, %v6813_v42  ;;  %v2170_v54 = vpack.c.bf16 %v1127_v10, %v1124_v23  ;;  %v1359_v9 = vsel %vm533_vm0, %v296_v59, 0.0 }
 0x21a   :  { %v1356_v10 = vsel %vm533_vm0, %v295_v61, 0.0 }
 0x21b   :  { %v4153_v25 = vsel %vm3178_vm2, %v4152_v16, %v4148_v24  ;;  %v2844_v26 = vunpack.c.l.b16 %v2170_v54  ;;  %v2845_v29 = vunpack.c.h.b16 %v2170_v54  ;;  %1342 = vadd.xlane.f32.xlu1 %v1341_v12  ;;  %1339 = vadd.xlane.f32.xlu0 %v1338_v14  ;;  %v298_v16 = vld [vmem:[%s10149_s0 + $0x8a8] sm:$0xff] }
 0x21c   :  { %v4158_v31 = vsel %vm3185_vm3, %v4157_v17, %v4153_v25  ;;  %v1133_v32 = vpop.xlane.xlu1 %1132  ;;  %v1130_v37 = vpop.xlane.xlu0 %1129  ;;  %v297_v17 = vld [vmem:[%s10149_s0 + $0x8a0] sm:$0xff] }
 0x21d   :  { %v4162_v35 = vrot.slane %v2844_v26, %v6824_v52  ;;  %v4167_v39 = vrot.slane %v2845_v29, %v6833_v60  ;;  %v2171_v40 = vpack.c.bf16 %v1133_v32, %v1130_v37  ;;  %v1365_v29 = vsel %vm533_vm0, %v298_v16, 0.0 }
 0x21f   :  { %v4163_v45 = vsel %vm3192_vm4, %v4162_v35, %v4158_v31  ;;  %v2846_v46 = vunpack.c.l.b16 %v2171_v40  ;;  %v2847_v47 = vunpack.c.h.b16 %v2171_v40  ;;  %1348 = vadd.xlane.f32.xlu1 %v1347_v33  ;;  %1345 = vadd.xlane.f32.xlu0 %v1344_v34  ;;  %v1362_v31 = vsel %vm533_vm0, %v297_v17, 0.0  ;;  %v300_v34 = vld [vmem:[%s10149_s0 + $0x8b8] sm:$0xff]  ;;  %v299_v35 = vld [vmem:[%s10149_s0 + $0x8b0] sm:$0xff] }
 0x220   :  { %v4168_v49 = vsel %vm3199_vm5, %v4167_v39, %v4163_v45  ;;  %v1139_v62 = vpop.xlane.xlu1 %1138  ;;  %v1136_v50 = vpop.xlane.xlu0 %1135 }
 0x221   :  { %v4172_v55 = vrot.slane %v2846_v46, %v6840_v2  ;;  %v4177_v57 = vrot.slane %v2847_v47, %v6853_v13  ;;  %v2172_v58 = vpack.c.bf16 %v1139_v62, %v1136_v50  ;;  %v1371_v47 = vsel %vm533_vm0, %v300_v34, 0.0 }
 0x223   :  { %v4173_v11 = vsel %vm3206_vm6, %v4172_v55, %v4168_v49  ;;  %v2848_v63 = vunpack.c.l.b16 %v2172_v58  ;;  %v2849_v0 = vunpack.c.h.b16 %v2172_v58  ;;  %1354 = vadd.xlane.f32.xlu1 %v1353_v51  ;;  %1351 = vadd.xlane.f32.xlu0 %v1350_v53  ;;  %v1368_v49 = vsel %vm533_vm0, %v299_v35, 0.0  ;;  %v302_v53 = vld [vmem:[%s10149_s0 + $0x8c8] sm:$0xff]  ;;  %v301_v55 = vld [vmem:[%s10149_s0 + $0x8c0] sm:$0xff] }
 0x224   :  { %v4178_v5 = vsel %vm3213_vm7, %v4177_v57, %v4173_v11  ;;  %v1145_v7 = vpop.xlane.xlu1 %1144  ;;  %v1142_v8 = vpop.xlane.xlu0 %1141 }
 0x225   :  { %v4182_v23 = vrot.slane %v2848_v63, %v6859_v22  ;;  %v4187_v12 = vrot.slane %v2849_v0, %v6867_v27  ;;  %v2173_v14 = vpack.c.bf16 %v1145_v7, %v1142_v8  ;;  %v1377_v0 = vsel %vm533_vm0, %v302_v53, 0.0 }
 0x227   :  { %v4183_v54 = vsel %vm3220_vm8, %v4182_v23, %v4178_v5  ;;  %v2850_v18 = vunpack.c.l.b16 %v2173_v14  ;;  %v2851_v21 = vunpack.c.h.b16 %v2173_v14  ;;  %1360 = vadd.xlane.f32.xlu1 %v1359_v9  ;;  %1357 = vadd.xlane.f32.xlu0 %v1356_v10  ;;  %v1374_v5 = vsel %vm533_vm0, %v301_v55, 0.0  ;;  %v304_v10 = vld [vmem:[%s10149_s0 + $0x8d8] sm:$0xff]  ;;  %v303_v23 = vld [vmem:[%s10149_s0 + $0x8d0] sm:$0xff] }
 0x228   :  { %v4188_v24 = vsel %vm3227_vm9, %v4187_v12, %v4183_v54  ;;  %v1151_v25 = vpop.xlane.xlu1 %1150  ;;  %v1148_v26 = vpop.xlane.xlu0 %1147 }
 0x229   :  { %v4192_v32 = vrot.slane %v2850_v18, %v6885_v48  ;;  %v4197_v37 = vrot.slane %v2851_v21, %v6895_v56  ;;  %v2174_v33 = vpack.c.bf16 %v1151_v25, %v1148_v26  ;;  %v1383_v21 = vsel %vm533_vm0, %v304_v10, 0.0 }
 0x22b   :  { %v4193_v39 = vsel %vm3234_vm10, %v4192_v32, %v4188_v24  ;;  %v2852_v40 = vunpack.c.l.b16 %v2174_v33  ;;  %v2853_v41 = vunpack.c.h.b16 %v2174_v33  ;;  %1366 = vadd.xlane.f32.xlu1 %v1365_v29  ;;  %1363 = vadd.xlane.f32.xlu0 %v1362_v31  ;;  %v1380_v24 = vsel %vm533_vm0, %v303_v23, 0.0  ;;  %v306_v29 = vld [vmem:[%s10149_s0 + $0x8e8] sm:$0xff]  ;;  %v305_v31 = vld [vmem:[%s10149_s0 + $0x8e0] sm:$0xff] }
 0x22c   :  { %v4198_v43 = vsel %vm10167_vm13, %v4197_v37, %v4193_v39  ;;  %v1157_v45 = vpop.xlane.xlu1 %1156  ;;  %v1154_v46 = vpop.xlane.xlu0 %1153  ;;  %vm5724_vm13 = vcmask 1043459   ;;  %v1389_v39 = vsel %vm533_vm0, %v306_v29, 0.0 }
 0x22d   :  { %v4202_v62 = vrot.slane %v2852_v40, %v6902_v3  ;;  %v4207_v50 = vrot.slane %v2853_v41, %v6905_v4  ;;  %v2175_v51 = vpack.c.bf16 %v1157_v45, %v1154_v46  ;;  %v1386_v40 = vsel %vm533_vm0, %v305_v31, 0.0  ;;  %v308_v46 = vld [vmem:[%s10149_s0 + $0x8f8] sm:$0xff] }
 0x22f   :  { %v4203_v57 = vsel %vm3248_vm12, %v4202_v62, %v4198_v43  ;;  %v2854_v58 = vunpack.c.l.b16 %v2175_v51  ;;  %v2855_v59 = vunpack.c.h.b16 %v2175_v51  ;;  %1372 = vadd.xlane.f32.xlu1 %v1371_v47  ;;  %1369 = vadd.xlane.f32.xlu0 %v1368_v49  ;;  %v307_v47 = vld [vmem:[%s10149_s0 + $0x8f0] sm:$0xff] }
 0x230   :  { %v4208_v61 = vsel %vm10166_vm11, %v4207_v50, %v4203_v57  ;;  %v1163_v11 = vpop.xlane.xlu1 %1162  ;;  %v1160_v63 = vpop.xlane.xlu0 %1159  ;;  %vm10168_vm11 = vcmask 786112  }
 0x231   :  { %v4212_v7 = vrot.slane %v2854_v58, %v6920_v19  ;;  %v4217_v8 = vrot.slane %v2855_v59, %v6927_v28  ;;  %v2176_v9 = vpack.c.bf16 %v1163_v11, %v1160_v63  ;;  %v1395_v58 = vsel %vm533_vm0, %v308_v46, 0.0 }
 0x232   :  { %v1392_v59 = vsel %vm533_vm0, %v307_v47, 0.0 }
 0x233   :  { %v4213_v12 = vsel %vm3262_vm14, %v4212_v7, %v4208_v61  ;;  %v2856_v14 = vunpack.c.l.b16 %v2176_v9  ;;  %v2857_v16 = vunpack.c.h.b16 %v2176_v9  ;;  %1378 = vadd.xlane.f32.xlu1 %v1377_v0  ;;  %1375 = vadd.xlane.f32.xlu0 %v1374_v5  ;;  %v310_v0 = vld [vmem:[%s10149_s0 + $0x908] sm:$0xff]  ;;  %v309_v5 = vld [vmem:[%s10149_s0 + $0x900] sm:$0xff] }
 0x234   :  { %v4218_v17 = vsel %vm3269_vm15, %v4217_v8, %v4213_v12  ;;  %v1169_v54 = vpop.xlane.xlu1 %1168  ;;  %v1166_v18 = vpop.xlane.xlu0 %1165 }
 0x235   :  { %v8133_v25 = vsel %vm5724_vm13, %v4218_v17, %v7737_v6  ;;  %v2177_v26 = vpack.c.bf16 %v1169_v54, %v1166_v18  ;;  %v4222_v32 = vrot.slane %v2856_v14, %v6795_v30  ;;  %v4226_v37 = vrot.slane %v2857_v16, %v6804_v38 }
 0x236   :  { %v1401_v14 = vsel %vm533_vm0, %v310_v0, 0.0  ;;  %v1398_v16 = vsel %vm533_vm0, %v309_v5, 0.0 }
 0x237   :  { %v2858_v33 = vunpack.c.l.b16 %v2177_v26  ;;  %v2859_v34 = vunpack.c.h.b16 %v2177_v26  ;;  %1384 = vadd.xlane.f32.xlu1 %v1383_v21  ;;  %1381 = vadd.xlane.f32.xlu0 %v1380_v24  ;;  %v4227_v49 = vsel %vm3171_vm1, %v4226_v37, %v4222_v32  ;;  %v312_v21 = vld [vmem:[%s10149_s0 + $0x918] sm:$0xff]  ;;  %v311_v24 = vld [vmem:[%s10149_s0 + $0x910] sm:$0xff] }
 0x238   :  { %v1175_v35 = vpop.xlane.xlu1 %1174  ;;  %v1172_v6 = vpop.xlane.xlu0 %1171 }
 0x239   :  { %v4231_v41 = vrot.slane %v2858_v33, %v6801_v36  ;;  %v4236_v43 = vrot.slane %v2859_v34, %v6813_v42  ;;  %v2178_v45 = vpack.c.bf16 %v1175_v35, %v1172_v6  ;;  %v1407_v34 = vsel %vm533_vm0, %v312_v21, 0.0 }
 0x23a   :  { %v1404_v35 = vsel %vm533_vm0, %v311_v24, 0.0 }
 0x23b   :  { %v4232_v62 = vsel %vm3178_vm2, %v4231_v41, %v4227_v49  ;;  %v2860_v50 = vunpack.c.l.b16 %v2178_v45  ;;  %v2861_v51 = vunpack.c.h.b16 %v2178_v45  ;;  %1390 = vadd.xlane.f32.xlu1 %v1389_v39  ;;  %1387 = vadd.xlane.f32.xlu0 %v1386_v40  ;;  %v314_v41 = vld [vmem:[%s10149_s0 + $0x928] sm:$0xff] }
 0x23c   :  { %v4237_v53 = vsel %vm3185_vm3, %v4236_v43, %v4232_v62  ;;  %v1181_v55 = vpop.xlane.xlu1 %1180  ;;  %v1178_v57 = vpop.xlane.xlu0 %1177  ;;  %v313_v43 = vld [vmem:[%s10149_s0 + $0x920] sm:$0xff] }
 0x23d   :  { %v4241_v61 = vrot.slane %v2860_v50, %v6824_v52  ;;  %v4246_v11 = vrot.slane %v2861_v51, %v6833_v60  ;;  %v2179_v63 = vpack.c.bf16 %v1181_v55, %v1178_v57  ;;  %v1413_v51 = vsel %vm533_vm0, %v314_v41, 0.0 }
 0x23f   :  { %v4242_v7 = vsel %vm3192_vm4, %v4241_v61, %v4237_v53  ;;  %v2862_v8 = vunpack.c.l.b16 %v2179_v63  ;;  %v2863_v9 = vunpack.c.h.b16 %v2179_v63  ;;  %1396 = vadd.xlane.f32.xlu1 %v1395_v58  ;;  %1393 = vadd.xlane.f32.xlu0 %v1392_v59  ;;  %v1410_v53 = vsel %vm533_vm0, %v313_v43, 0.0  ;;  %v316_v59 = vld [vmem:[%s10149_s0 + $0x938] sm:$0xff]  ;;  %v315_v61 = vld [vmem:[%s10149_s0 + $0x930] sm:$0xff] }
 0x240   :  { %v4247_v10 = vsel %vm3199_vm5, %v4246_v11, %v4242_v7  ;;  %v1187_v23 = vpop.xlane.xlu1 %1186  ;;  %v1184_v12 = vpop.xlane.xlu0 %1183 }
 0x241   :  { %v4251_v17 = vrot.slane %v2862_v8, %v6840_v2  ;;  %v4256_v54 = vrot.slane %v2863_v9, %v6853_v13  ;;  %v2180_v18 = vpack.c.bf16 %v1187_v23, %v1184_v12  ;;  %v1419_v9 = vsel %vm533_vm0, %v316_v59, 0.0 }
 0x243   :  { %v4252_v26 = vsel %vm3206_vm6, %v4251_v17, %v4247_v10  ;;  %v2864_v29 = vunpack.c.l.b16 %v2180_v18  ;;  %v2865_v31 = vunpack.c.h.b16 %v2180_v18  ;;  %1402 = vadd.xlane.f32.xlu1 %v1401_v14  ;;  %1399 = vadd.xlane.f32.xlu0 %v1398_v16  ;;  %v1416_v10 = vsel %vm533_vm0, %v315_v61, 0.0  ;;  %v318_v16 = vld [vmem:[%s10149_s0 + $0x948] sm:$0xff]  ;;  %v317_v17 = vld [vmem:[%s10149_s0 + $0x940] sm:$0xff] }
 0x244   :  { %v4257_v32 = vsel %vm3213_vm7, %v4256_v54, %v4252_v26  ;;  %v1193_v37 = vpop.xlane.xlu1 %1192  ;;  %v1190_v33 = vpop.xlane.xlu0 %1189 }
 0x245   :  { %v4261_v6 = vrot.slane %v2864_v29, %v6859_v22  ;;  %v4266_v39 = vrot.slane %v2865_v31, %v6867_v27  ;;  %v2181_v40 = vpack.c.bf16 %v1193_v37, %v1190_v33  ;;  %v1425_v31 = vsel %vm533_vm0, %v318_v16, 0.0 }
 0x247   :  { %v4262_v45 = vsel %vm3220_vm8, %v4261_v6, %v4257_v32  ;;  %v2866_v46 = vunpack.c.l.b16 %v2181_v40  ;;  %v2867_v47 = vunpack.c.h.b16 %v2181_v40  ;;  %1408 = vadd.xlane.f32.xlu1 %v1407_v34  ;;  %1405 = vadd.xlane.f32.xlu0 %v1404_v35  ;;  %v1422_v32 = vsel %vm533_vm0, %v317_v17, 0.0  ;;  %v320_v35 = vld [vmem:[%s10149_s0 + $0x958] sm:$0xff]  ;;  %v319_v6 = vld [vmem:[%s10149_s0 + $0x950] sm:$0xff] }
 0x248   :  { %v4267_v49 = vsel %vm3227_vm9, %v4266_v39, %v4262_v45  ;;  %v1199_v62 = vpop.xlane.xlu1 %1198  ;;  %v1196_v50 = vpop.xlane.xlu0 %1195 }
 0x249   :  { %v4271_v55 = vrot.slane %v2866_v46, %v6885_v48  ;;  %v4276_v57 = vrot.slane %v2867_v47, %v6895_v56  ;;  %v2182_v58 = vpack.c.bf16 %v1199_v62, %v1196_v50  ;;  %v1431_v47 = vsel %vm533_vm0, %v320_v35, 0.0  ;;  %v322_v50 = vld [vmem:[%s10149_s0 + $0x968] sm:$0xff] }
 0x24b   :  { %v4272_v11 = vsel %vm3234_vm10, %v4271_v55, %v4267_v49  ;;  %v2868_v63 = vunpack.c.l.b16 %v2182_v58  ;;  %v2869_v0 = vunpack.c.h.b16 %v2182_v58  ;;  %1414 = vadd.xlane.f32.xlu1 %v1413_v51  ;;  %1411 = vadd.xlane.f32.xlu0 %v1410_v53  ;;  %v1428_v49 = vsel %vm533_vm0, %v319_v6, 0.0  ;;  %v321_v51 = vld [vmem:[%s10149_s0 + $0x960] sm:$0xff] }
 0x24c   :  { %v4277_v5 = vsel %vm10168_vm11, %v4276_v57, %v4272_v11  ;;  %v1205_v7 = vpop.xlane.xlu1 %1204  ;;  %v1202_v8 = vpop.xlane.xlu0 %1201  ;;  %vm10169_vm11 = vcmask 917312  }
 0x24d   :  { %v4281_v23 = vrot.slane %v2868_v63, %v6902_v3  ;;  %v4286_v12 = vrot.slane %v2869_v0, %v6905_v4  ;;  %v2183_v14 = vpack.c.bf16 %v1205_v7, %v1202_v8  ;;  %v1437_v63 = vsel %vm533_vm0, %v322_v50, 0.0  ;;  %v324_v8 = vld [vmem:[%s10149_s0 + $0x978] sm:$0xff] }
 0x24e   :  { %v1434_v0 = vsel %vm533_vm0, %v321_v51, 0.0 }
 0x24f   :  { %v4282_v54 = vsel %vm3248_vm12, %v4281_v23, %v4277_v5  ;;  %v2870_v18 = vunpack.c.l.b16 %v2183_v14  ;;  %v2871_v21 = vunpack.c.h.b16 %v2183_v14  ;;  %1420 = vadd.xlane.f32.xlu1 %v1419_v9  ;;  %1417 = vadd.xlane.f32.xlu0 %v1416_v10  ;;  %v323_v9 = vld [vmem:[%s10149_s0 + $0x970] sm:$0xff] }
 0x250   :  { %v4287_v24 = vsel %vm10169_vm11, %v4286_v12, %v4282_v54  ;;  %v1211_v26 = vpop.xlane.xlu1 %1210  ;;  %v1208_v29 = vpop.xlane.xlu0 %1207  ;;  %vm10170_vm11 = vcmask 786112  }
 0x251   :  { %v4291_v37 = vrot.slane %v2870_v18, %v6920_v19  ;;  %v4296_v33 = vrot.slane %v2871_v21, %v6927_v28  ;;  %v2184_v34 = vpack.c.bf16 %v1211_v26, %v1208_v29  ;;  %v1443_v18 = vsel %vm533_vm0, %v324_v8, 0.0 }
 0x252   :  { %v1440_v21 = vsel %vm533_vm0, %v323_v9, 0.0 }
 0x253   :  { %v4292_v39 = vsel %vm3262_vm14, %v4291_v37, %v4287_v24  ;;  %v2872_v40 = vunpack.c.l.b16 %v2184_v34  ;;  %v2873_v41 = vunpack.c.h.b16 %v2184_v34  ;;  %1426 = vadd.xlane.f32.xlu1 %v1425_v31  ;;  %1423 = vadd.xlane.f32.xlu0 %v1422_v32  ;;  %v326_v31 = vld [vmem:[%s10149_s0 + $0x988] sm:$0xff]  ;;  %v325_v32 = vld [vmem:[%s10149_s0 + $0x980] sm:$0xff] }
 0x254   :  { %v4297_v43 = vsel %vm3269_vm15, %v4296_v33, %v4292_v39  ;;  %v1217_v45 = vpop.xlane.xlu1 %1216  ;;  %v1214_v46 = vpop.xlane.xlu0 %1213 }
 0x255   :  { %v2185_v62 = vpack.c.bf16 %v1217_v45, %v1214_v46  ;;  %v8238_v53 = vsel %vm5724_vm13, %v4297_v43, %v7842_v15  ;;  %v4301_v55 = vrot.slane %v2872_v40, %v6795_v30  ;;  %v4305_v57 = vrot.slane %v2873_v41, %v6804_v38 }
 0x256   :  { %v1449_v40 = vsel %vm533_vm0, %v326_v31, 0.0  ;;  %v1446_v41 = vsel %vm533_vm0, %v325_v32, 0.0 }
 0x257   :  { %v2874_v58 = vunpack.c.l.b16 %v2185_v62  ;;  %v2875_v59 = vunpack.c.h.b16 %v2185_v62  ;;  %1432 = vadd.xlane.f32.xlu1 %v1431_v47  ;;  %1429 = vadd.xlane.f32.xlu0 %v1428_v49  ;;  %v4306_v10 = vsel %vm3171_vm1, %v4305_v57, %v4301_v55  ;;  %v328_v47 = vld [vmem:[%s10149_s0 + $0x998] sm:$0xff]  ;;  %v327_v49 = vld [vmem:[%s10149_s0 + $0x990] sm:$0xff] }
 0x258   :  { %v1223_v61 = vpop.xlane.xlu1 %1222  ;;  %v1220_v11 = vpop.xlane.xlu0 %1219 }
 0x259   :  { %v4310_v5 = vrot.slane %v2874_v58, %v6801_v36  ;;  %v4315_v7 = vrot.slane %v2875_v59, %v6813_v42  ;;  %v2186_v15 = vpack.c.bf16 %v1223_v61, %v1220_v11  ;;  %v1455_v59 = vsel %vm533_vm0, %v328_v47, 0.0 }
 0x25a   :  { %v1452_v61 = vsel %vm533_vm0, %v327_v49, 0.0 }
 0x25b   :  { %v4311_v23 = vsel %vm3178_vm2, %v4310_v5, %v4306_v10  ;;  %v2876_v12 = vunpack.c.l.b16 %v2186_v15  ;;  %v2877_v14 = vunpack.c.h.b16 %v2186_v15  ;;  %1438 = vadd.xlane.f32.xlu1 %v1437_v63  ;;  %1435 = vadd.xlane.f32.xlu0 %v1434_v0  ;;  %v330_v5 = vld [vmem:[%s10149_s0 + $0x9a8] sm:$0xff] }
 0x25c   :  { %v4316_v16 = vsel %vm3185_vm3, %v4315_v7, %v4311_v23  ;;  %v1229_v17 = vpop.xlane.xlu1 %1228  ;;  %v1226_v54 = vpop.xlane.xlu0 %1225  ;;  %v329_v7 = vld [vmem:[%s10149_s0 + $0x9a0] sm:$0xff] }
 0x25d   :  { %v4320_v24 = vrot.slane %v2876_v12, %v6824_v52  ;;  %v4325_v26 = vrot.slane %v2877_v14, %v6833_v60  ;;  %v2187_v29 = vpack.c.bf16 %v1229_v17, %v1226_v54  ;;  %v1461_v14 = vsel %vm533_vm0, %v330_v5, 0.0 }
 0x25f   :  { %v4321_v37 = vsel %vm3192_vm4, %v4320_v24, %v4316_v16  ;;  %v2878_v33 = vunpack.c.l.b16 %v2187_v29  ;;  %v2879_v34 = vunpack.c.h.b16 %v2187_v29  ;;  %1444 = vadd.xlane.f32.xlu1 %v1443_v18  ;;  %1441 = vadd.xlane.f32.xlu0 %v1440_v21  ;;  %v1458_v16 = vsel %vm533_vm0, %v329_v7, 0.0  ;;  %v332_v21 = vld [vmem:[%s10149_s0 + $0x9b8] sm:$0xff]  ;;  %v331_v24 = vld [vmem:[%s10149_s0 + $0x9b0] sm:$0xff] }
 0x260   :  { %v4326_v35 = vsel %vm3199_vm5, %v4325_v26, %v4321_v37  ;;  %v1235_v6 = vpop.xlane.xlu1 %1234  ;;  %v1232_v39 = vpop.xlane.xlu0 %1231 }
 0x261   :  { %v4330_v43 = vrot.slane %v2878_v33, %v6840_v2  ;;  %v4335_v45 = vrot.slane %v2879_v34, %v6853_v13  ;;  %v2188_v46 = vpack.c.bf16 %v1235_v6, %v1232_v39  ;;  %v1467_v34 = vsel %vm533_vm0, %v332_v21, 0.0 }
 0x263   :  { %v4331_v62 = vsel %vm3206_vm6, %v4330_v43, %v4326_v35  ;;  %v2880_v50 = vunpack.c.l.b16 %v2188_v46  ;;  %v2881_v51 = vunpack.c.h.b16 %v2188_v46  ;;  %1450 = vadd.xlane.f32.xlu1 %v1449_v40  ;;  %1447 = vadd.xlane.f32.xlu0 %v1446_v41  ;;  %v1464_v35 = vsel %vm533_vm0, %v331_v24, 0.0  ;;  %v334_v41 = vld [vmem:[%s10149_s0 + $0x9c8] sm:$0xff]  ;;  %v333_v43 = vld [vmem:[%s10149_s0 + $0x9c0] sm:$0xff] }
 0x264   :  { %v4336_v55 = vsel %vm3213_vm7, %v4335_v45, %v4331_v62  ;;  %v1241_v57 = vpop.xlane.xlu1 %1240  ;;  %v1238_v58 = vpop.xlane.xlu0 %1237 }
 0x265   :  { %v4340_v11 = vrot.slane %v2880_v50, %v6859_v22  ;;  %v4345_v63 = vrot.slane %v2881_v51, %v6867_v27  ;;  %v2189_v0 = vpack.c.bf16 %v1241_v57, %v1238_v58  ;;  %v1473_v51 = vsel %vm533_vm0, %v334_v41, 0.0 }
 0x267   :  { %v4341_v15 = vsel %vm3220_vm8, %v4340_v11, %v4336_v55  ;;  %v2882_v8 = vunpack.c.l.b16 %v2189_v0  ;;  %v2883_v9 = vunpack.c.h.b16 %v2189_v0  ;;  %1456 = vadd.xlane.f32.xlu1 %v1455_v59  ;;  %1453 = vadd.xlane.f32.xlu0 %v1452_v61  ;;  %v1470_v55 = vsel %vm533_vm0, %v333_v43, 0.0  ;;  %v336_v61 = vld [vmem:[%s10149_s0 + $0x9d8] sm:$0xff]  ;;  %v335_v11 = vld [vmem:[%s10149_s0 + $0x9d0] sm:$0xff] }
 0x268   :  { %v4346_v10 = vsel %vm3227_vm9, %v4345_v63, %v4341_v15  ;;  %v1247_v23 = vpop.xlane.xlu1 %1246  ;;  %v1244_v12 = vpop.xlane.xlu0 %1243 }
 0x269   :  { %v4350_v17 = vrot.slane %v2882_v8, %v6885_v48  ;;  %v4355_v54 = vrot.slane %v2883_v9, %v6895_v56  ;;  %v2190_v18 = vpack.c.bf16 %v1247_v23, %v1244_v12  ;;  %v1479_v9 = vsel %vm533_vm0, %v336_v61, 0.0 }
 0x26b   :  { %v4351_v26 = vsel %vm3234_vm10, %v4350_v17, %v4346_v10  ;;  %v2884_v29 = vunpack.c.l.b16 %v2190_v18  ;;  %v2885_v31 = vunpack.c.h.b16 %v2190_v18  ;;  %1462 = vadd.xlane.f32.xlu1 %v1461_v14  ;;  %1459 = vadd.xlane.f32.xlu0 %v1458_v16  ;;  %v1476_v10 = vsel %vm533_vm0, %v335_v11, 0.0  ;;  %v338_v14 = vld [vmem:[%s10149_s0 + $0x9e8] sm:$0xff]  ;;  %v337_v16 = vld [vmem:[%s10149_s0 + $0x9e0] sm:$0xff] }
 0x26c   :  { %v4356_v32 = vsel %vm10170_vm11, %v4355_v54, %v4351_v26  ;;  %v1253_v37 = vpop.xlane.xlu1 %1252  ;;  %v1250_v33 = vpop.xlane.xlu0 %1249  ;;  %vm10171_vm11 = vcmask 917312   ;;  %v1485_v26 = vsel %vm533_vm0, %v338_v14, 0.0 }
 0x26d   :  { %v4360_v6 = vrot.slane %v2884_v29, %v6902_v3  ;;  %v4365_v39 = vrot.slane %v2885_v31, %v6905_v4  ;;  %v2191_v40 = vpack.c.bf16 %v1253_v37, %v1250_v33  ;;  %v1482_v29 = vsel %vm533_vm0, %v337_v16, 0.0  ;;  %v357_v33 = vld [vmem:[%s10149_s0 + $0xa80] sm:$0xff] }
 0x26f   :  { %v4361_v45 = vsel %vm3248_vm12, %v4360_v6, %v4356_v32  ;;  %v2886_v46 = vunpack.c.l.b16 %v2191_v40  ;;  %v2887_v47 = vunpack.c.h.b16 %v2191_v40  ;;  %1468 = vadd.xlane.f32.xlu1 %v1467_v34  ;;  %1465 = vadd.xlane.f32.xlu0 %v1464_v35  ;;  %v339_v34 = vld [vmem:[%s10149_s0 + $0x9f0] sm:$0xff] }
 0x270   :  { %v4366_v49 = vsel %vm10171_vm11, %v4365_v39, %v4361_v45  ;;  %v1259_v62 = vpop.xlane.xlu1 %1258  ;;  %v1256_v50 = vpop.xlane.xlu0 %1255  ;;  %vm10172_vm11 = vcmask 786112  }
 0x271   :  { %v4370_v57 = vrot.slane %v2886_v46, %v6920_v19  ;;  %v4375_v58 = vrot.slane %v2887_v47, %v6927_v28  ;;  %v2192_v59 = vpack.c.bf16 %v1259_v62, %v1256_v50  ;;  %v1542_v46 = vsel %vm533_vm0, %v357_v33, 0.0 }
 0x272   :  { %v1488_v47 = vsel %vm533_vm0, %v339_v34, 0.0 }
 0x273   :  { %v4371_v63 = vsel %vm3262_vm14, %v4370_v57, %v4366_v49  ;;  %v2888_v0 = vunpack.c.l.b16 %v2192_v59  ;;  %v2889_v5 = vunpack.c.h.b16 %v2192_v59  ;;  %1474 = vadd.xlane.f32.xlu1 %v1473_v51  ;;  %1471 = vadd.xlane.f32.xlu0 %v1470_v55  ;;  %v389_v51 = vld [vmem:[%s10149_s0 + $0xb80] sm:$0xff]  ;;  %v358_v55 = vld [vmem:[%s10149_s0 + $0xa88] sm:$0xff] }
 0x274   :  { %v4376_v7 = vsel %vm3269_vm15, %v4375_v58, %v4371_v63  ;;  %v1265_v15 = vpop.xlane.xlu1 %1264  ;;  %v1262_v8 = vpop.xlane.xlu0 %1261 }
 0x275   :  { %v8331_v23 = vsel %vm5724_vm13, %v4376_v7, %v7935_v44  ;;  %v2193_v12 = vpack.c.bf16 %v1265_v15, %v1262_v8  ;;  %v4380_v17 = vrot.slane %v2888_v0, %v6795_v30  ;;  %v4384_v54 = vrot.slane %v2889_v5, %v6804_v38 }
 0x276   :  { %v1638_v0 = vsel %vm533_vm0, %v389_v51, 0.0  ;;  %v1545_v5 = vsel %vm533_vm0, %v358_v55, 0.0 }
 0x277   :  { %v2890_v18 = vunpack.c.l.b16 %v2193_v12  ;;  %v2891_v21 = vunpack.c.h.b16 %v2193_v12  ;;  %1480 = vadd.xlane.f32.xlu1 %v1479_v9  ;;  %1477 = vadd.xlane.f32.xlu0 %v1476_v10  ;;  %v4385_v35 = vsel %vm3171_vm1, %v4384_v54, %v4380_v17  ;;  %v341_v9 = vld [vmem:[%s10149_s0 + $0xa00] sm:$0xff]  ;;  %v390_v10 = vld [vmem:[%s10149_s0 + $0xb88] sm:$0xff] }
 0x278   :  { %v1271_v24 = vpop.xlane.xlu1 %1270  ;;  %v1268_v44 = vpop.xlane.xlu0 %1267 }
 0x279   :  { %v4389_v31 = vrot.slane %v2890_v18, %v6801_v36  ;;  %v4394_v32 = vrot.slane %v2891_v21, %v6813_v42  ;;  %v2194_v37 = vpack.c.bf16 %v1271_v24, %v1268_v44  ;;  %v1494_v21 = vsel %vm533_vm0, %v341_v9, 0.0 }
 0x27a   :  { %v1641_v24 = vsel %vm533_vm0, %v390_v10, 0.0 }
 0x27b   :  { %v4390_v6 = vsel %vm3178_vm2, %v4389_v31, %v4385_v35  ;;  %v2892_v39 = vunpack.c.l.b16 %v2194_v37  ;;  %v2893_v40 = vunpack.c.h.b16 %v2194_v37  ;;  %1486 = vadd.xlane.f32.xlu1 %v1485_v26  ;;  %1483 = vadd.xlane.f32.xlu0 %v1482_v29  ;;  %v359_v31 = vld [vmem:[%s10149_s0 + $0xa90] sm:$0xff] }
 0x27c   :  { %v4395_v41 = vsel %vm3185_vm3, %v4394_v32, %v4390_v6  ;;  %v1277_v43 = vpop.xlane.xlu1 %1276  ;;  %v1274_v45 = vpop.xlane.xlu0 %1273  ;;  %v342_v32 = vld [vmem:[%s10149_s0 + $0xa08] sm:$0xff] }
 0x27d   :  { %v4399_v49 = vrot.slane %v2892_v39, %v6824_v52  ;;  %v4404_v62 = vrot.slane %v2893_v40, %v6833_v60  ;;  %v2195_v50 = vpack.c.bf16 %v1277_v43, %v1274_v45  ;;  %v1548_v40 = vsel %vm533_vm0, %v359_v31, 0.0 }
 0x27f   :  { %v4400_v57 = vsel %vm3192_vm4, %v4399_v49, %v4395_v41  ;;  %v2894_v58 = vunpack.c.l.b16 %v2195_v50  ;;  %v2895_v59 = vunpack.c.h.b16 %v2195_v50  ;;  %1543 = vadd.xlane.f32.xlu1 %v1542_v46  ;;  %1489 = vadd.xlane.f32.xlu0 %v1488_v47  ;;  %v1497_v41 = vsel %vm533_vm0, %v342_v32, 0.0  ;;  %v373_v47 = vld [vmem:[%s10149_s0 + $0xb00] sm:$0xff]  ;;  %v360_v49 = vld [vmem:[%s10149_s0 + $0xa98] sm:$0xff] }
 0x280   :  { %v4405_v61 = vsel %vm3199_vm5, %v4404_v62, %v4400_v57  ;;  %v1283_v11 = vpop.xlane.xlu1 %1282  ;;  %v1280_v63 = vpop.xlane.xlu0 %1279 }
 0x281   :  { %v4409_v7 = vrot.slane %v2894_v58, %v6840_v2  ;;  %v4414_v15 = vrot.slane %v2895_v59, %v6853_v13  ;;  %v2196_v8 = vpack.c.bf16 %v1283_v11, %v1280_v63  ;;  %v1590_v59 = vsel %vm533_vm0, %v373_v47, 0.0 }
 0x283   :  { %v4410_v12 = vsel %vm3206_vm6, %v4409_v7, %v4405_v61  ;;  %v2896_v14 = vunpack.c.l.b16 %v2196_v8  ;;  %v2897_v16 = vunpack.c.h.b16 %v2196_v8  ;;  %1639 = vadd.xlane.f32.xlu1 %v1638_v0  ;;  %1546 = vadd.xlane.f32.xlu0 %v1545_v5  ;;  %v1551_v61 = vsel %vm533_vm0, %v360_v49, 0.0  ;;  %v391_v5 = vld [vmem:[%s10149_s0 + $0xb90] sm:$0xff]  ;;  %v374_v7 = vld [vmem:[%s10149_s0 + $0xb08] sm:$0xff] }
 0x284   :  { %v4415_v17 = vsel %vm3213_vm7, %v4414_v15, %v4410_v12  ;;  %v1289_v54 = vpop.xlane.xlu1 %1288  ;;  %v1286_v18 = vpop.xlane.xlu0 %1285 }
 0x285   :  { %v4419_v44 = vrot.slane %v2896_v14, %v6859_v22  ;;  %v4424_v26 = vrot.slane %v2897_v16, %v6867_v27  ;;  %v2197_v29 = vpack.c.bf16 %v1289_v54, %v1286_v18  ;;  %v1644_v16 = vsel %vm533_vm0, %v391_v5, 0.0 }
 0x287   :  { %v4420_v37 = vsel %vm3220_vm8, %v4419_v44, %v4415_v17  ;;  %v2898_v33 = vunpack.c.l.b16 %v2197_v29  ;;  %v2899_v34 = vunpack.c.h.b16 %v2197_v29  ;;  %1495 = vadd.xlane.f32.xlu1 %v1494_v21  ;;  %1642 = vadd.xlane.f32.xlu0 %v1641_v24  ;;  %v1593_v17 = vsel %vm533_vm0, %v374_v7, 0.0  ;;  %v421_v24 = vld [vmem:[%s10149_s0 + $0xc80] sm:$0xff]  ;;  %v392_v44 = vld [vmem:[%s10149_s0 + $0xb98] sm:$0xff] }
 0x288   :  { %v4425_v35 = vsel %vm3227_vm9, %v4424_v26, %v4420_v37  ;;  %v1295_v6 = vpop.xlane.xlu1 %1294  ;;  %v1292_v39 = vpop.xlane.xlu0 %1291 }
 0x289   :  { %v4429_v43 = vrot.slane %v2898_v33, %v6885_v48  ;;  %v4434_v45 = vrot.slane %v2899_v34, %v6895_v56  ;;  %v2198_v46 = vpack.c.bf16 %v1295_v6, %v1292_v39  ;;  %v1734_v34 = vsel %vm533_vm0, %v421_v24, 0.0  ;;  %v453_v39 = vld [vmem:[%s10149_s0 + $0xd80] sm:$0xff] }
 0x28b   :  { %v4430_v62 = vsel %vm3234_vm10, %v4429_v43, %v4425_v35  ;;  %v2900_v50 = vunpack.c.l.b16 %v2198_v46  ;;  %v2901_v51 = vunpack.c.h.b16 %v2198_v46  ;;  %1549 = vadd.xlane.f32.xlu1 %v1548_v40  ;;  %1498 = vadd.xlane.f32.xlu0 %v1497_v41  ;;  %v1647_v35 = vsel %vm533_vm0, %v392_v44, 0.0  ;;  %v422_v40 = vld [vmem:[%s10149_s0 + $0xc88] sm:$0xff] }
 0x28c   :  { %v4435_v55 = vsel %vm10172_vm11, %v4434_v45, %v4430_v62  ;;  %v1301_v57 = vpop.xlane.xlu1 %1300  ;;  %v1298_v58 = vpop.xlane.xlu0 %1297  ;;  %vm10173_vm11 = vcmask 917312  }
 0x28d   :  { %v4439_v11 = vrot.slane %v2900_v50, %v6902_v3  ;;  %v4444_v63 = vrot.slane %v2901_v51, %v6905_v4  ;;  %v2199_v0 = vpack.c.bf16 %v1301_v57, %v1298_v58  ;;  %v1830_v50 = vsel %vm533_vm0, %v453_v39, 0.0  ;;  %v343_v58 = vld [vmem:[%s10149_s0 + $0xa10] sm:$0xff] }
 0x28e   :  { %v1737_v51 = vsel %vm533_vm0, %v422_v40, 0.0 }
 0x28f   :  { %v4440_v15 = vsel %vm3248_vm12, %v4439_v11, %v4435_v55  ;;  %v2902_v8 = vunpack.c.l.b16 %v2199_v0  ;;  %v2903_v9 = vunpack.c.h.b16 %v2199_v0  ;;  %1591 = vadd.xlane.f32.xlu1 %v1590_v59  ;;  %1552 = vadd.xlane.f32.xlu0 %v1551_v61  ;;  %v454_v59 = vld [vmem:[%s10149_s0 + $0xd88] sm:$0xff] }
 0x290   :  { %v4445_v10 = vsel %vm10173_vm11, %v4444_v63, %v4440_v15  ;;  %v1307_v12 = vpop.xlane.xlu1 %1306  ;;  %v1304_v14 = vpop.xlane.xlu0 %1303 }
 0x291   :  { %v4449_v54 = vrot.slane %v2902_v8, %v6920_v19  ;;  %v4454_v18 = vrot.slane %v2903_v9, %v6927_v28  ;;  %v2200_v21 = vpack.c.bf16 %v1307_v12, %v1304_v14  ;;  %v1500_v8 = vsel %vm533_vm0, %v343_v58, 0.0 }
 0x292   :  { %v1833_v9 = vsel %vm533_vm0, %v454_v59, 0.0 }
 0x293   :  { %v4450_v26 = vsel %vm3262_vm14, %v4449_v54, %v4445_v10  ;;  %v2904_v29 = vunpack.c.l.b16 %v2200_v21  ;;  %v2905_v31 = vunpack.c.h.b16 %v2200_v21  ;;  %1645 = vadd.xlane.f32.xlu1 %v1644_v16  ;;  %1594 = vadd.xlane.f32.xlu0 %v1593_v17  ;;  %v375_v16 = vld [vmem:[%s10149_s0 + $0xb10] sm:$0xff]  ;;  %v344_v17 = vld [vmem:[%s10149_s0 + $0xa18] sm:$0xff] }
 0x294   :  { %v4455_v32 = vsel %vm3269_vm15, %v4454_v18, %v4450_v26  ;;  %v1313_v37 = vpop.xlane.xlu1 %1312  ;;  %v1310_v33 = vpop.xlane.xlu0 %1309 }
 0x295   :  { %v2201_v6 = vpack.c.bf16 %v1313_v37, %v1310_v33  ;;  %v8436_v41 = vsel %vm5724_vm13, %v4455_v32, %v8040_v1  ;;  %v4459_v43 = vrot.slane %v2904_v29, %v6795_v30  ;;  %v4463_v45 = vrot.slane %v2905_v31, %v6804_v38 }
 0x296   :  { %v1596_v29 = vsel %vm533_vm0, %v375_v16, 0.0  ;;  %v1503_v31 = vsel %vm533_vm0, %v344_v17, 0.0  ;;  %vm10174_vm13 = vcmask 786112  }
 0x297   :  { %v2906_v46 = vunpack.c.l.b16 %v2201_v6  ;;  %v2907_v47 = vunpack.c.h.b16 %v2201_v6  ;;  %1735 = vadd.xlane.f32.xlu1 %v1734_v34  ;;  %1648 = vadd.xlane.f32.xlu0 %v1647_v35  ;;  %v4464_v61 = vsel %vm3171_vm1, %v4463_v45, %v4459_v43  ;;  %v405_v34 = vld [vmem:[%s10149_s0 + $0xc00] sm:$0xff]  ;;  %v376_v35 = vld [vmem:[%s10149_s0 + $0xb18] sm:$0xff] }
 0x298   :  { %v1319_v49 = vpop.xlane.xlu1 %1318  ;;  %v1316_v62 = vpop.xlane.xlu0 %1315 }
 0x299   :  { %v4468_v55 = vrot.slane %v2906_v46, %v6801_v36  ;;  %v4473_v57 = vrot.slane %v2907_v47, %v6813_v42  ;;  %v2202_v1 = vpack.c.bf16 %v1319_v49, %v1316_v62  ;;  %v1686_v47 = vsel %vm533_vm0, %v405_v34, 0.0 }
 0x29a   :  { %v1599_v49 = vsel %vm533_vm0, %v376_v35, 0.0 }
 0x29b   :  { %v4469_v11 = vsel %vm3178_vm2, %v4468_v55, %v4464_v61  ;;  %v2908_v63 = vunpack.c.l.b16 %v2202_v1  ;;  %v2909_v0 = vunpack.c.h.b16 %v2202_v1  ;;  %1831 = vadd.xlane.f32.xlu1 %v1830_v50  ;;  %1738 = vadd.xlane.f32.xlu0 %v1737_v51  ;;  %v423_v55 = vld [vmem:[%s10149_s0 + $0xc90] sm:$0xff] }
 0x29c   :  { %v4474_v5 = vsel %vm3185_vm3, %v4473_v57, %v4469_v11  ;;  %v1325_v7 = vpop.xlane.xlu1 %1324  ;;  %v1322_v15 = vpop.xlane.xlu0 %1321  ;;  %v406_v57 = vld [vmem:[%s10149_s0 + $0xc08] sm:$0xff] }
 0x29d   :  { %v4478_v10 = vrot.slane %v2908_v63, %v6824_v52  ;;  %v4483_v12 = vrot.slane %v2909_v0, %v6833_v60  ;;  %v2203_v14 = vpack.c.bf16 %v1325_v7, %v1322_v15  ;;  %v1740_v0 = vsel %vm533_vm0, %v423_v55, 0.0 }
 0x29f   :  { %v4479_v54 = vsel %vm3192_vm4, %v4478_v10, %v4474_v5  ;;  %v2910_v18 = vunpack.c.l.b16 %v2203_v14  ;;  %v2911_v21 = vunpack.c.h.b16 %v2203_v14  ;;  %1501 = vadd.xlane.f32.xlu1 %v1500_v8  ;;  %1834 = vadd.xlane.f32.xlu0 %v1833_v9  ;;  %v1689_v5 = vsel %vm533_vm0, %v406_v57, 0.0  ;;  %v437_v9 = vld [vmem:[%s10149_s0 + $0xd00] sm:$0xff]  ;;  %v424_v10 = vld [vmem:[%s10149_s0 + $0xc98] sm:$0xff] }
 0x2a0   :  { %v4484_v24 = vsel %vm3199_vm5, %v4483_v12, %v4479_v54  ;;  %v1331_v44 = vpop.xlane.xlu1 %1330  ;;  %v1328_v26 = vpop.xlane.xlu0 %1327 }
 0x2a1   :  { %v4488_v32 = vrot.slane %v2910_v18, %v6840_v2  ;;  %v4493_v37 = vrot.slane %v2911_v21, %v6853_v13  ;;  %v2204_v33 = vpack.c.bf16 %v1331_v44, %v1328_v26  ;;  %v1782_v21 = vsel %vm533_vm0, %v437_v9, 0.0 }
 0x2a3   :  { %v4489_v6 = vsel %vm3206_vm6, %v4488_v32, %v4484_v24  ;;  %v2912_v39 = vunpack.c.l.b16 %v2204_v33  ;;  %v2913_v40 = vunpack.c.h.b16 %v2204_v33  ;;  %1597 = vadd.xlane.f32.xlu1 %v1596_v29  ;;  %1504 = vadd.xlane.f32.xlu0 %v1503_v31  ;;  %v1743_v24 = vsel %vm533_vm0, %v424_v10, 0.0  ;;  %v455_v31 = vld [vmem:[%s10149_s0 + $0xd90] sm:$0xff]  ;;  %v438_v32 = vld [vmem:[%s10149_s0 + $0xd08] sm:$0xff] }
 0x2a4   :  { %v4494_v43 = vsel %vm3213_vm7, %v4493_v37, %v4489_v6  ;;  %v1337_v45 = vpop.xlane.xlu1 %1336  ;;  %v1334_v46 = vpop.xlane.xlu0 %1333 }
 0x2a5   :  { %v4498_v62 = vrot.slane %v2912_v39, %v6859_v22  ;;  %v4503_v50 = vrot.slane %v2913_v40, %v6867_v27  ;;  %v2205_v51 = vpack.c.bf16 %v1337_v45, %v1334_v46  ;;  %v1836_v40 = vsel %vm533_vm0, %v455_v31, 0.0 }
 0x2a7   :  { %v4499_v1 = vsel %vm3220_vm8, %v4498_v62, %v4494_v43  ;;  %v2914_v58 = vunpack.c.l.b16 %v2205_v51  ;;  %v2915_v59 = vunpack.c.h.b16 %v2205_v51  ;;  %1687 = vadd.xlane.f32.xlu1 %v1686_v47  ;;  %1600 = vadd.xlane.f32.xlu0 %v1599_v49  ;;  %v1785_v43 = vsel %vm533_vm0, %v438_v32, 0.0  ;;  %v485_v49 = vld [vmem:[%s10149_s0 + $0xe80] sm:$0xff]  ;;  %v456_v62 = vld [vmem:[%s10149_s0 + $0xd98] sm:$0xff] }
 0x2a8   :  { %v4504_v61 = vsel %vm3227_vm9, %v4503_v50, %v4499_v1  ;;  %v1343_v11 = vpop.xlane.xlu1 %1342  ;;  %v1340_v63 = vpop.xlane.xlu0 %1339 }
 0x2a9   :  { %v4508_v7 = vrot.slane %v2914_v58, %v6885_v48  ;;  %v4513_v15 = vrot.slane %v2915_v59, %v6895_v56  ;;  %v2206_v8 = vpack.c.bf16 %v1343_v11, %v1340_v63  ;;  %v1926_v59 = vsel %vm533_vm0, %v485_v49, 0.0  ;;  %v517_v63 = vld [vmem:[%s10149_s0 + $0xf80] sm:$0xff] }
 0x2ab   :  { %v4509_v12 = vsel %vm3234_vm10, %v4508_v7, %v4504_v61  ;;  %v2916_v14 = vunpack.c.l.b16 %v2206_v8  ;;  %v2917_v16 = vunpack.c.h.b16 %v2206_v8  ;;  %1741 = vadd.xlane.f32.xlu1 %v1740_v0  ;;  %1690 = vadd.xlane.f32.xlu0 %v1689_v5  ;;  %v1839_v61 = vsel %vm533_vm0, %v456_v62, 0.0  ;;  %v486_v0 = vld [vmem:[%s10149_s0 + $0xe88] sm:$0xff] }
 0x2ac   :  { %v4514_v17 = vsel %vm10174_vm13, %v4513_v15, %v4509_v12  ;;  %v1349_v54 = vpop.xlane.xlu1 %1348  ;;  %v1346_v18 = vpop.xlane.xlu0 %1345  ;;  %vm5726_vm13 = vcmask 1044484  }
 0x2ad   :  { %v4518_v44 = vrot.slane %v2916_v14, %v6902_v3  ;;  %v4523_v26 = vrot.slane %v2917_v16, %v6905_v4  ;;  %v2207_v29 = vpack.c.bf16 %v1349_v54, %v1346_v18  ;;  %v2022_v14 = vsel %vm533_vm0, %v517_v63, 0.0  ;;  %v361_v18 = vld [vmem:[%s10149_s0 + $0xaa0] sm:$0xff] }
 0x2ae   :  { %v1929_v16 = vsel %vm533_vm0, %v486_v0, 0.0 }
 0x2af   :  { %v4519_v37 = vsel %vm3248_vm12, %v4518_v44, %v4514_v17  ;;  %v2918_v33 = vunpack.c.l.b16 %v2207_v29  ;;  %v2919_v34 = vunpack.c.h.b16 %v2207_v29  ;;  %1783 = vadd.xlane.f32.xlu1 %v1782_v21  ;;  %1744 = vadd.xlane.f32.xlu0 %v1743_v24  ;;  %v518_v21 = vld [vmem:[%s10149_s0 + $0xf88] sm:$0xff] }
 0x2b0   :  { %v4524_v35 = vsel %vm10173_vm11, %v4523_v26, %v4519_v37  ;;  %v1355_v6 = vpop.xlane.xlu1 %1354  ;;  %v1352_v39 = vpop.xlane.xlu0 %1351  ;;  %vm10175_vm11 = vcmask 786112  }
 0x2b1   :  { %v4528_v45 = vrot.slane %v2918_v33, %v6920_v19  ;;  %v4533_v46 = vrot.slane %v2919_v34, %v6927_v28  ;;  %v2208_v47 = vpack.c.bf16 %v1355_v6, %v1352_v39  ;;  %v1554_v33 = vsel %vm533_vm0, %v361_v18, 0.0 }
 0x2b2   :  { %v2025_v34 = vsel %vm533_vm0, %v518_v21, 0.0 }
 0x2b3   :  { %v4529_v50 = vsel %vm3262_vm14, %v4528_v45, %v4524_v35  ;;  %v2920_v51 = vunpack.c.l.b16 %v2208_v47  ;;  %v2921_v55 = vunpack.c.h.b16 %v2208_v47  ;;  %1837 = vadd.xlane.f32.xlu1 %v1836_v40  ;;  %1786 = vadd.xlane.f32.xlu0 %v1785_v43  ;;  %v393_v40 = vld [vmem:[%s10149_s0 + $0xba0] sm:$0xff]  ;;  %v362_v43 = vld [vmem:[%s10149_s0 + $0xaa8] sm:$0xff] }
 0x2b4   :  { %v4534_v57 = vsel %vm3269_vm15, %v4533_v46, %v4529_v50  ;;  %v1361_v1 = vpop.xlane.xlu1 %1360  ;;  %v1358_v58 = vpop.xlane.xlu0 %1357 }
 0x2b5   :  { %v2209_v11 = vpack.c.bf16 %v1361_v1, %v1358_v58  ;;  %v8535_v5 = vsel %vm5726_vm13, %v4534_v57, %v8133_v25  ;;  %v4538_v7 = vrot.slane %v2920_v51, %v6795_v30  ;;  %v4542_v15 = vrot.slane %v2921_v55, %v6804_v38 }
 0x2b6   :  { %v1650_v51 = vsel %vm533_vm0, %v393_v40, 0.0  ;;  %v1557_v55 = vsel %vm533_vm0, %v362_v43, 0.0 }
 0x2b7   :  { %v2922_v8 = vunpack.c.l.b16 %v2209_v11  ;;  %v2923_v9 = vunpack.c.h.b16 %v2209_v11  ;;  %1927 = vadd.xlane.f32.xlu1 %v1926_v59  ;;  %1840 = vadd.xlane.f32.xlu0 %v1839_v61  ;;  %v4543_v24 = vsel %vm3171_vm1, %v4542_v15, %v4538_v7  ;;  %v407_v59 = vld [vmem:[%s10149_s0 + $0xc10] sm:$0xff]  ;;  %v394_v61 = vld [vmem:[%s10149_s0 + $0xba8] sm:$0xff] }
 0x2b8   :  { %v1367_v10 = vpop.xlane.xlu1 %1366  ;;  %v1364_v12 = vpop.xlane.xlu0 %1363 }
 0x2b9   :  { %v4547_v17 = vrot.slane %v2922_v8, %v6801_v36  ;;  %v4552_v54 = vrot.slane %v2923_v9, %v6813_v42  ;;  %v2210_v25 = vpack.c.bf16 %v1367_v10, %v1364_v12  ;;  %v1692_v9 = vsel %vm533_vm0, %v407_v59, 0.0 }
 0x2ba   :  { %v1653_v10 = vsel %vm533_vm0, %v394_v61, 0.0 }
 0x2bb   :  { %v4548_v44 = vsel %vm3178_vm2, %v4547_v17, %v4543_v24  ;;  %v2924_v26 = vunpack.c.l.b16 %v2210_v25  ;;  %v2925_v29 = vunpack.c.h.b16 %v2210_v25  ;;  %2023 = vadd.xlane.f32.xlu1 %v2022_v14  ;;  %1930 = vadd.xlane.f32.xlu0 %v1929_v16  ;;  %v439_v17 = vld [vmem:[%s10149_s0 + $0xd10] sm:$0xff] }
 0x2bc   :  { %v4553_v31 = vsel %vm3185_vm3, %v4552_v54, %v4548_v44  ;;  %v1373_v32 = vpop.xlane.xlu1 %1372  ;;  %v1370_v37 = vpop.xlane.xlu0 %1369  ;;  %v408_v54 = vld [vmem:[%s10149_s0 + $0xc18] sm:$0xff] }
 0x2bd   :  { %v4557_v35 = vrot.slane %v2924_v26, %v6824_v52  ;;  %v4562_v6 = vrot.slane %v2925_v29, %v6833_v60  ;;  %v2211_v39 = vpack.c.bf16 %v1373_v32, %v1370_v37  ;;  %v1788_v29 = vsel %vm533_vm0, %v439_v17, 0.0 }
 0x2bf   :  { %v4558_v45 = vsel %vm3192_vm4, %v4557_v35, %v4553_v31  ;;  %v2926_v46 = vunpack.c.l.b16 %v2211_v39  ;;  %v2927_v47 = vunpack.c.h.b16 %v2211_v39  ;;  %1555 = vadd.xlane.f32.xlu1 %v1554_v33  ;;  %2026 = vadd.xlane.f32.xlu0 %v2025_v34  ;;  %v1695_v31 = vsel %vm533_vm0, %v408_v54, 0.0  ;;  %v469_v34 = vld [vmem:[%s10149_s0 + $0xe00] sm:$0xff]  ;;  %v440_v35 = vld [vmem:[%s10149_s0 + $0xd18] sm:$0xff] }
 0x2c0   :  { %v4563_v49 = vsel %vm3199_vm5, %v4562_v6, %v4558_v45  ;;  %v1379_v62 = vpop.xlane.xlu1 %1378  ;;  %v1376_v50 = vpop.xlane.xlu0 %1375 }
 0x2c1   :  { %v4567_v57 = vrot.slane %v2926_v46, %v6840_v2  ;;  %v4572_v1 = vrot.slane %v2927_v47, %v6853_v13  ;;  %v2212_v58 = vpack.c.bf16 %v1379_v62, %v1376_v50  ;;  %v1878_v47 = vsel %vm533_vm0, %v469_v34, 0.0 }
 0x2c3   :  { %v4568_v11 = vsel %vm3206_vm6, %v4567_v57, %v4563_v49  ;;  %v2928_v63 = vunpack.c.l.b16 %v2212_v58  ;;  %v2929_v0 = vunpack.c.h.b16 %v2212_v58  ;;  %1651 = vadd.xlane.f32.xlu1 %v1650_v51  ;;  %1558 = vadd.xlane.f32.xlu0 %v1557_v55  ;;  %v1791_v49 = vsel %vm533_vm0, %v440_v35, 0.0  ;;  %v487_v55 = vld [vmem:[%s10149_s0 + $0xe90] sm:$0xff]  ;;  %v470_v57 = vld [vmem:[%s10149_s0 + $0xe08] sm:$0xff] }
 0x2c4   :  { %v4573_v7 = vsel %vm3213_vm7, %v4572_v1, %v4568_v11  ;;  %v1385_v15 = vpop.xlane.xlu1 %1384  ;;  %v1382_v8 = vpop.xlane.xlu0 %1381 }
 0x2c5   :  { %v4577_v12 = vrot.slane %v2928_v63, %v6859_v22  ;;  %v4582_v14 = vrot.slane %v2929_v0, %v6867_v27  ;;  %v2213_v16 = vpack.c.bf16 %v1385_v15, %v1382_v8  ;;  %v1932_v0 = vsel %vm533_vm0, %v487_v55, 0.0 }
 0x2c7   :  { %v4578_v25 = vsel %vm3220_vm8, %v4577_v12, %v4573_v7  ;;  %v2930_v18 = vunpack.c.l.b16 %v2213_v16  ;;  %v2931_v21 = vunpack.c.h.b16 %v2213_v16  ;;  %1693 = vadd.xlane.f32.xlu1 %v1692_v9  ;;  %1654 = vadd.xlane.f32.xlu0 %v1653_v10  ;;  %v1881_v7 = vsel %vm533_vm0, %v470_v57, 0.0  ;;  %v501_v10 = vld [vmem:[%s10149_s0 + $0xf00] sm:$0xff]  ;;  %v488_v12 = vld [vmem:[%s10149_s0 + $0xe98] sm:$0xff] }
 0x2c8   :  { %v4583_v24 = vsel %vm3227_vm9, %v4582_v14, %v4578_v25  ;;  %v1391_v44 = vpop.xlane.xlu1 %1390  ;;  %v1388_v26 = vpop.xlane.xlu0 %1387 }
 0x2c9   :  { %v4587_v32 = vrot.slane %v2930_v18, %v6885_v48  ;;  %v4592_v37 = vrot.slane %v2931_v21, %v6895_v56  ;;  %v2214_v33 = vpack.c.bf16 %v1391_v44, %v1388_v26  ;;  %v1974_v18 = vsel %vm533_vm0, %v501_v10, 0.0  ;;  %v519_v26 = vld [vmem:[%s10149_s0 + $0xf90] sm:$0xff] }
 0x2ca   :  { %v1935_v21 = vsel %vm533_vm0, %v488_v12, 0.0 }
 0x2cb   :  { %v4588_v6 = vsel %vm3234_vm10, %v4587_v32, %v4583_v24  ;;  %v2932_v39 = vunpack.c.l.b16 %v2214_v33  ;;  %v2933_v40 = vunpack.c.h.b16 %v2214_v33  ;;  %1789 = vadd.xlane.f32.xlu1 %v1788_v29  ;;  %1696 = vadd.xlane.f32.xlu0 %v1695_v31  ;;  %v502_v29 = vld [vmem:[%s10149_s0 + $0xf08] sm:$0xff] }
 0x2cc   :  { %v4593_v43 = vsel %vm10175_vm11, %v4592_v37, %v4588_v6  ;;  %v1397_v45 = vpop.xlane.xlu1 %1396  ;;  %v1394_v46 = vpop.xlane.xlu0 %1393  ;;  %vm10176_vm11 = vcmask 917312  }
 0x2cd   :  { %v4597_v62 = vrot.slane %v2932_v39, %v6902_v3  ;;  %v4602_v50 = vrot.slane %v2933_v40, %v6905_v4  ;;  %v2215_v51 = vpack.c.bf16 %v1397_v45, %v1394_v46  ;;  %v2028_v39 = vsel %vm533_vm0, %v519_v26, 0.0  ;;  %v345_v46 = vld [vmem:[%s10149_s0 + $0xa20] sm:$0xff] }
 0x2ce   :  { %v1977_v40 = vsel %vm533_vm0, %v502_v29, 0.0 }
 0x2cf   :  { %v4598_v1 = vsel %vm3248_vm12, %v4597_v62, %v4593_v43  ;;  %v2934_v58 = vunpack.c.l.b16 %v2215_v51  ;;  %v2935_v59 = vunpack.c.h.b16 %v2215_v51  ;;  %1879 = vadd.xlane.f32.xlu1 %v1878_v47  ;;  %1792 = vadd.xlane.f32.xlu0 %v1791_v49  ;;  %v520_v47 = vld [vmem:[%s10149_s0 + $0xf98] sm:$0xff] }
 0x2d0   :  { %v4603_v61 = vsel %vm10176_vm11, %v4602_v50, %v4598_v1  ;;  %v1403_v11 = vpop.xlane.xlu1 %1402  ;;  %v1400_v63 = vpop.xlane.xlu0 %1399  ;;  %vm10177_vm11 = vcmask 786112  }
 0x2d1   :  { %v4607_v15 = vrot.slane %v2934_v58, %v6920_v19  ;;  %v4612_v8 = vrot.slane %v2935_v59, %v6927_v28  ;;  %v2216_v9 = vpack.c.bf16 %v1403_v11, %v1400_v63  ;;  %v1506_v58 = vsel %vm533_vm0, %v345_v46, 0.0 }
 0x2d2   :  { %v2031_v59 = vsel %vm533_vm0, %v520_v47, 0.0 }
 0x2d3   :  { %v4608_v14 = vsel %vm3262_vm14, %v4607_v15, %v4603_v61  ;;  %v2936_v16 = vunpack.c.l.b16 %v2216_v9  ;;  %v2937_v17 = vunpack.c.h.b16 %v2216_v9  ;;  %1933 = vadd.xlane.f32.xlu1 %v1932_v0  ;;  %1882 = vadd.xlane.f32.xlu0 %v1881_v7  ;;  %v377_v0 = vld [vmem:[%s10149_s0 + $0xb20] sm:$0xff]  ;;  %v346_v7 = vld [vmem:[%s10149_s0 + $0xa28] sm:$0xff] }
 0x2d4   :  { %v1409_v54 = vpop.xlane.xlu1 %1408  ;;  %v1406_v25 = vpop.xlane.xlu0 %1405  ;;  %v4613_v24 = vsel %vm3269_vm15, %v4612_v8, %v4608_v14 }
 0x2d5   :  { %v2217_v44 = vpack.c.bf16 %v1409_v54, %v1406_v25  ;;  %v8634_v31 = vsel %vm5726_vm13, %v4613_v24, %v8238_v53  ;;  %v4617_v32 = vrot.slane %v2936_v16, %v6795_v30  ;;  %v4621_v37 = vrot.slane %v2937_v17, %v6804_v38  ;;  %v378_v24 = vld [vmem:[%s10149_s0 + $0xb28] sm:$0xff] }
 0x2d6   :  { %v1602_v16 = vsel %vm533_vm0, %v377_v0, 0.0  ;;  %v1509_v17 = vsel %vm533_vm0, %v346_v7, 0.0 }
 0x2d7   :  { %v2938_v33 = vunpack.c.l.b16 %v2217_v44  ;;  %v2939_v34 = vunpack.c.h.b16 %v2217_v44  ;;  %1975 = vadd.xlane.f32.xlu1 %v1974_v18  ;;  %1936 = vadd.xlane.f32.xlu0 %v1935_v21  ;;  %v4622_v49 = vsel %vm3171_vm1, %v4621_v37, %v4617_v32  ;;  %v425_v21 = vld [vmem:[%s10149_s0 + $0xca0] sm:$0xff] }
 0x2d8   :  { %v1415_v35 = vpop.xlane.xlu1 %1414  ;;  %v1412_v6 = vpop.xlane.xlu0 %1411 }
 0x2d9   :  { %v4626_v43 = vrot.slane %v2938_v33, %v6801_v36  ;;  %v4631_v45 = vrot.slane %v2939_v34, %v6813_v42  ;;  %v2218_v53 = vpack.c.bf16 %v1415_v35, %v1412_v6  ;;  %v1746_v34 = vsel %vm533_vm0, %v425_v21, 0.0 }
 0x2da   :  { %v1605_v35 = vsel %vm533_vm0, %v378_v24, 0.0 }
 0x2db   :  { %v4627_v62 = vsel %vm3178_vm2, %v4626_v43, %v4622_v49  ;;  %v2940_v50 = vunpack.c.l.b16 %v2218_v53  ;;  %v2941_v51 = vunpack.c.h.b16 %v2218_v53  ;;  %2029 = vadd.xlane.f32.xlu1 %v2028_v39  ;;  %1978 = vadd.xlane.f32.xlu0 %v1977_v40  ;;  %v457_v43 = vld [vmem:[%s10149_s0 + $0xda0] sm:$0xff] }
 0x2dc   :  { %v4632_v55 = vsel %vm3185_vm3, %v4631_v45, %v4627_v62  ;;  %v1421_v57 = vpop.xlane.xlu1 %1420  ;;  %v1418_v1 = vpop.xlane.xlu0 %1417  ;;  %v426_v45 = vld [vmem:[%s10149_s0 + $0xca8] sm:$0xff] }
 0x2dd   :  { %v4636_v61 = vrot.slane %v2940_v50, %v6824_v52  ;;  %v4641_v11 = vrot.slane %v2941_v51, %v6833_v60  ;;  %v2219_v63 = vpack.c.bf16 %v1421_v57, %v1418_v1  ;;  %v1842_v51 = vsel %vm533_vm0, %v457_v43, 0.0 }
 0x2df   :  { %v4637_v15 = vsel %vm3192_vm4, %v4636_v61, %v4632_v55  ;;  %v2942_v8 = vunpack.c.l.b16 %v2219_v63  ;;  %v2943_v9 = vunpack.c.h.b16 %v2219_v63  ;;  %1507 = vadd.xlane.f32.xlu1 %v1506_v58  ;;  %2032 = vadd.xlane.f32.xlu0 %v2031_v59  ;;  %v1749_v55 = vsel %vm533_vm0, %v426_v45, 0.0  ;;  %v471_v59 = vld [vmem:[%s10149_s0 + $0xe10] sm:$0xff]  ;;  %v458_v61 = vld [vmem:[%s10149_s0 + $0xda8] sm:$0xff] }
 0x2e0   :  { %v4642_v10 = vsel %vm3199_vm5, %v4641_v11, %v4637_v15  ;;  %v1427_v12 = vpop.xlane.xlu1 %1426  ;;  %v1424_v14 = vpop.xlane.xlu0 %1423 }
 0x2e1   :  { %v4646_v54 = vrot.slane %v2942_v8, %v6840_v2  ;;  %v4651_v25 = vrot.slane %v2943_v9, %v6853_v13  ;;  %v2220_v18 = vpack.c.bf16 %v1427_v12, %v1424_v14  ;;  %v1884_v9 = vsel %vm533_vm0, %v471_v59, 0.0 }
 0x2e3   :  { %v4647_v44 = vsel %vm3206_vm6, %v4646_v54, %v4642_v10  ;;  %v2944_v26 = vunpack.c.l.b16 %v2220_v18  ;;  %v2945_v29 = vunpack.c.h.b16 %v2220_v18  ;;  %1603 = vadd.xlane.f32.xlu1 %v1602_v16  ;;  %1510 = vadd.xlane.f32.xlu0 %v1509_v17  ;;  %v1845_v10 = vsel %vm533_vm0, %v458_v61, 0.0  ;;  %v503_v17 = vld [vmem:[%s10149_s0 + $0xf10] sm:$0xff]  ;;  %v472_v54 = vld [vmem:[%s10149_s0 + $0xe18] sm:$0xff] }
 0x2e4   :  { %v4652_v32 = vsel %vm3213_vm7, %v4651_v25, %v4647_v44  ;;  %v1433_v37 = vpop.xlane.xlu1 %1432  ;;  %v1430_v33 = vpop.xlane.xlu0 %1429 }
 0x2e5   :  { %v4656_v6 = vrot.slane %v2944_v26, %v6859_v22  ;;  %v4661_v39 = vrot.slane %v2945_v29, %v6867_v27  ;;  %v2221_v40 = vpack.c.bf16 %v1433_v37, %v1430_v33  ;;  %v1980_v29 = vsel %vm533_vm0, %v503_v17, 0.0 }
 0x2e7   :  { %v4657_v53 = vsel %vm3220_vm8, %v4656_v6, %v4652_v32  ;;  %v2946_v46 = vunpack.c.l.b16 %v2221_v40  ;;  %v2947_v47 = vunpack.c.h.b16 %v2221_v40  ;;  %1747 = vadd.xlane.f32.xlu1 %v1746_v34  ;;  %1606 = vadd.xlane.f32.xlu0 %v1605_v35  ;;  %v1887_v32 = vsel %vm533_vm0, %v472_v54, 0.0  ;;  %v363_v35 = vld [vmem:[%s10149_s0 + $0xab0] sm:$0xff]  ;;  %v504_v6 = vld [vmem:[%s10149_s0 + $0xf18] sm:$0xff] }
 0x2e8   :  { %v4662_v49 = vsel %vm3227_vm9, %v4661_v39, %v4657_v53  ;;  %v1439_v62 = vpop.xlane.xlu1 %1438  ;;  %v1436_v50 = vpop.xlane.xlu0 %1435 }
 0x2e9   :  { %v4666_v57 = vrot.slane %v2946_v46, %v6885_v48  ;;  %v4671_v1 = vrot.slane %v2947_v47, %v6895_v56  ;;  %v2222_v58 = vpack.c.bf16 %v1439_v62, %v1436_v50  ;;  %v1560_v47 = vsel %vm533_vm0, %v363_v35, 0.0  ;;  %v395_v50 = vld [vmem:[%s10149_s0 + $0xbb0] sm:$0xff] }
 0x2eb   :  { %v4667_v11 = vsel %vm3234_vm10, %v4666_v57, %v4662_v49  ;;  %v2948_v63 = vunpack.c.l.b16 %v2222_v58  ;;  %v2949_v0 = vunpack.c.h.b16 %v2222_v58  ;;  %1843 = vadd.xlane.f32.xlu1 %v1842_v51  ;;  %1750 = vadd.xlane.f32.xlu0 %v1749_v55  ;;  %v1983_v49 = vsel %vm533_vm0, %v504_v6, 0.0  ;;  %v364_v51 = vld [vmem:[%s10149_s0 + $0xab8] sm:$0xff] }
 0x2ec   :  { %v4672_v7 = vsel %vm10177_vm11, %v4671_v1, %v4667_v11  ;;  %v1445_v15 = vpop.xlane.xlu1 %1444  ;;  %v1442_v8 = vpop.xlane.xlu0 %1441  ;;  %vm10178_vm11 = vcmask 917312  }
 0x2ed   :  { %v4676_v12 = vrot.slane %v2948_v63, %v6902_v3  ;;  %v4681_v14 = vrot.slane %v2949_v0, %v6905_v4  ;;  %v2223_v16 = vpack.c.bf16 %v1445_v15, %v1442_v8  ;;  %v1656_v63 = vsel %vm533_vm0, %v395_v50, 0.0  ;;  %v409_v8 = vld [vmem:[%s10149_s0 + $0xc20] sm:$0xff] }
 0x2ee   :  { %v1563_v0 = vsel %vm533_vm0, %v364_v51, 0.0 }
 0x2ef   :  { %v4677_v25 = vsel %vm3248_vm12, %v4676_v12, %v4672_v7  ;;  %v2950_v18 = vunpack.c.l.b16 %v2223_v16  ;;  %v2951_v21 = vunpack.c.h.b16 %v2223_v16  ;;  %1885 = vadd.xlane.f32.xlu1 %v1884_v9  ;;  %1846 = vadd.xlane.f32.xlu0 %v1845_v10  ;;  %v396_v9 = vld [vmem:[%s10149_s0 + $0xbb8] sm:$0xff] }
 0x2f0   :  { %v4682_v24 = vsel %vm10178_vm11, %v4681_v14, %v4677_v25  ;;  %v1451_v44 = vpop.xlane.xlu1 %1450  ;;  %v1448_v26 = vpop.xlane.xlu0 %1447  ;;  %vm10179_vm11 = vcmask 786112  }
 0x2f1   :  { %v4686_v37 = vrot.slane %v2950_v18, %v6920_v19  ;;  %v4691_v33 = vrot.slane %v2951_v21, %v6927_v28  ;;  %v2224_v34 = vpack.c.bf16 %v1451_v44, %v1448_v26  ;;  %v1698_v18 = vsel %vm533_vm0, %v409_v8, 0.0 }
 0x2f2   :  { %v1659_v21 = vsel %vm533_vm0, %v396_v9, 0.0 }
 0x2f3   :  { %v4687_v39 = vsel %vm3262_vm14, %v4686_v37, %v4682_v24  ;;  %v2952_v40 = vunpack.c.l.b16 %v2224_v34  ;;  %v2953_v43 = vunpack.c.h.b16 %v2224_v34  ;;  %1981 = vadd.xlane.f32.xlu1 %v1980_v29  ;;  %1888 = vadd.xlane.f32.xlu0 %v1887_v32  ;;  %v441_v29 = vld [vmem:[%s10149_s0 + $0xd20] sm:$0xff]  ;;  %v410_v32 = vld [vmem:[%s10149_s0 + $0xc28] sm:$0xff] }
 0x2f4   :  { %v4692_v45 = vsel %vm3269_vm15, %v4691_v33, %v4687_v39  ;;  %v1457_v53 = vpop.xlane.xlu1 %1456  ;;  %v1454_v46 = vpop.xlane.xlu0 %1453 }
 0x2f5   :  { %v2225_v62 = vpack.c.bf16 %v1457_v53, %v1454_v46  ;;  %v8733_v55 = vsel %vm5726_vm13, %v4692_v45, %v8331_v23  ;;  %v4696_v57 = vrot.slane %v2952_v40, %v6795_v30  ;;  %v4700_v1 = vrot.slane %v2953_v43, %v6804_v38 }
 0x2f6   :  { %v1794_v40 = vsel %vm533_vm0, %v441_v29, 0.0  ;;  %v1701_v43 = vsel %vm533_vm0, %v410_v32, 0.0 }
 0x2f7   :  { %v2954_v58 = vunpack.c.l.b16 %v2225_v62  ;;  %v2955_v59 = vunpack.c.h.b16 %v2225_v62  ;;  %1561 = vadd.xlane.f32.xlu1 %v1560_v47  ;;  %1984 = vadd.xlane.f32.xlu0 %v1983_v49  ;;  %v4701_v10 = vsel %vm3171_vm1, %v4700_v1, %v4696_v57  ;;  %v489_v47 = vld [vmem:[%s10149_s0 + $0xea0] sm:$0xff]  ;;  %v442_v49 = vld [vmem:[%s10149_s0 + $0xd28] sm:$0xff] }
 0x2f8   :  { %v1463_v61 = vpop.xlane.xlu1 %1462  ;;  %v1460_v11 = vpop.xlane.xlu0 %1459 }
 0x2f9   :  { %v4705_v7 = vrot.slane %v2954_v58, %v6801_v36  ;;  %v4710_v15 = vrot.slane %v2955_v59, %v6813_v42  ;;  %v2226_v23 = vpack.c.bf16 %v1463_v61, %v1460_v11  ;;  %v1938_v59 = vsel %vm533_vm0, %v489_v47, 0.0 }
 0x2fa   :  { %v1797_v61 = vsel %vm533_vm0, %v442_v49, 0.0 }
 0x2fb   :  { %v4706_v12 = vsel %vm3178_vm2, %v4705_v7, %v4701_v10  ;;  %v2956_v14 = vunpack.c.l.b16 %v2226_v23  ;;  %v2957_v16 = vunpack.c.h.b16 %v2226_v23  ;;  %1657 = vadd.xlane.f32.xlu1 %v1656_v63  ;;  %1564 = vadd.xlane.f32.xlu0 %v1563_v0  ;;  %v521_v7 = vld [vmem:[%s10149_s0 + $0xfa0] sm:$0xff] }
 0x2fc   :  { %v4711_v17 = vsel %vm3185_vm3, %v4710_v15, %v4706_v12  ;;  %v1469_v54 = vpop.xlane.xlu1 %1468  ;;  %v1466_v25 = vpop.xlane.xlu0 %1465  ;;  %v490_v15 = vld [vmem:[%s10149_s0 + $0xea8] sm:$0xff] }
 0x2fd   :  { %v4715_v24 = vrot.slane %v2956_v14, %v6824_v52  ;;  %v4720_v44 = vrot.slane %v2957_v16, %v6833_v60  ;;  %v2227_v26 = vpack.c.bf16 %v1469_v54, %v1466_v25  ;;  %v2034_v16 = vsel %vm533_vm0, %v521_v7, 0.0 }
 0x2ff   :  { %v4716_v37 = vsel %vm3192_vm4, %v4715_v24, %v4711_v17  ;;  %v2958_v33 = vunpack.c.l.b16 %v2227_v26  ;;  %v2959_v34 = vunpack.c.h.b16 %v2227_v26  ;;  %1699 = vadd.xlane.f32.xlu1 %v1698_v18  ;;  %1660 = vadd.xlane.f32.xlu0 %v1659_v21  ;;  %v1941_v17 = vsel %vm533_vm0, %v490_v15, 0.0  ;;  %v347_v21 = vld [vmem:[%s10149_s0 + $0xa30] sm:$0xff]  ;;  %v522_v24 = vld [vmem:[%s10149_s0 + $0xfa8] sm:$0xff] }
 0x300   :  { %v4721_v35 = vsel %vm3199_vm5, %v4720_v44, %v4716_v37  ;;  %v1475_v6 = vpop.xlane.xlu1 %1474  ;;  %v1472_v39 = vpop.xlane.xlu0 %1471 }
 0x301   :  { %v4725_v45 = vrot.slane %v2958_v33, %v6840_v2  ;;  %v4730_v53 = vrot.slane %v2959_v34, %v6853_v13  ;;  %v2228_v46 = vpack.c.bf16 %v1475_v6, %v1472_v39  ;;  %v1512_v34 = vsel %vm533_vm0, %v347_v21, 0.0 }
 0x303   :  { %v4726_v62 = vsel %vm3206_vm6, %v4725_v45, %v4721_v35  ;;  %v2960_v50 = vunpack.c.l.b16 %v2228_v46  ;;  %v2961_v51 = vunpack.c.h.b16 %v2228_v46  ;;  %1795 = vadd.xlane.f32.xlu1 %v1794_v40  ;;  %1702 = vadd.xlane.f32.xlu0 %v1701_v43  ;;  %v2037_v35 = vsel %vm533_vm0, %v522_v24, 0.0  ;;  %v379_v40 = vld [vmem:[%s10149_s0 + $0xb30] sm:$0xff]  ;;  %v348_v43 = vld [vmem:[%s10149_s0 + $0xa38] sm:$0xff]  ;;  %v505_v24 = vld [vmem:[%s10149_s0 + $0xf20] sm:$0xff] }
 0x304   :  { %v4731_v57 = vsel %vm3213_vm7, %v4730_v53, %v4726_v62  ;;  %v1481_v1 = vpop.xlane.xlu1 %1480  ;;  %v1478_v58 = vpop.xlane.xlu0 %1477  ;;  %v1608_v49 = vsel %vm533_vm0, %v379_v40, 0.0  ;;  %v1515_v62 = vsel %vm533_vm0, %v348_v43, 0.0 }
 0x305   :  { %v4735_v11 = vrot.slane %v2960_v50, %v6859_v22  ;;  %v4740_v63 = vrot.slane %v2961_v51, %v6867_v27  ;;  %v2229_v0 = vpack.c.bf16 %v1481_v1, %v1478_v58  ;;  %v427_v51 = vld [vmem:[%s10149_s0 + $0xcb0] sm:$0xff] }
 0x307   :  { %v4736_v23 = vsel %vm3220_vm8, %v4735_v11, %v4731_v57  ;;  %v2962_v8 = vunpack.c.l.b16 %v2229_v0  ;;  %v2963_v9 = vunpack.c.h.b16 %v2229_v0  ;;  %1939 = vadd.xlane.f32.xlu1 %v1938_v59  ;;  %1798 = vadd.xlane.f32.xlu0 %v1797_v61  ;;  %v380_v57 = vld [vmem:[%s10149_s0 + $0xb38] sm:$0xff]  ;;  %v1752_v59 = vsel %vm533_vm0, %v427_v51, 0.0 }
 0x308   :  { %v4741_v10 = vsel %vm3227_vm9, %v4740_v63, %v4736_v23  ;;  %v1487_v12 = vpop.xlane.xlu1 %1486  ;;  %v1484_v14 = vpop.xlane.xlu0 %1483  ;;  %v1611_v61 = vsel %vm533_vm0, %v380_v57, 0.0  ;;  %v459_v63 = vld [vmem:[%s10149_s0 + $0xdb0] sm:$0xff]  ;;  %v428_v0 = vld [vmem:[%s10149_s0 + $0xcb8] sm:$0xff] }
 0x309   :  { %v4745_v54 = vrot.slane %v2962_v8, %v6885_v48  ;;  %v4750_v25 = vrot.slane %v2963_v9, %v6895_v56  ;;  %v2230_v18 = vpack.c.bf16 %v1487_v12, %v1484_v14  ;;  %v1848_v23 = vsel %vm533_vm0, %v459_v63, 0.0  ;;  %v460_v12 = vld [vmem:[%s10149_s0 + $0xdb8] sm:$0xff] }
 0x30a   :  { %v1755_v8 = vsel %vm533_vm0, %v428_v0, 0.0  ;;  %v397_v0 = vld [vmem:[%s10149_s0 + $0xbc0] sm:$0xff] }
 0x30b   :  { %v4746_v44 = vsel %vm3234_vm10, %v4745_v54, %v4741_v10  ;;  %v2964_v26 = vunpack.c.l.b16 %v2230_v18  ;;  %v2965_v29 = vunpack.c.h.b16 %v2230_v18  ;;  %2035 = vadd.xlane.f32.xlu1 %v2034_v16  ;;  %1942 = vadd.xlane.f32.xlu0 %v1941_v17  ;;  %v473_v10 = vld [vmem:[%s10149_s0 + $0xe20] sm:$0xff]  ;;  %v1851_v18 = vsel %vm533_vm0, %v460_v12, 0.0 }
 0x30c   :  { %v4751_v32 = vsel %vm10179_vm11, %v4750_v25, %v4746_v44  ;;  %v1544_v37 = vpop.xlane.xlu1 %1543  ;;  %v8798_v33 = vpop.xlane.xlu0 %1489  ;;  %vm10180_vm11 = vcmask 917312   ;;  %v1890_v25 = vsel %vm533_vm0, %v473_v10, 0.0  ;;  %v474_v44 = vld [vmem:[%s10149_s0 + $0xe28] sm:$0xff] }
 0x30d   :  { %v4755_v6 = vrot.slane %v2964_v26, %v6902_v3  ;;  %v4760_v39 = vrot.slane %v2965_v29, %v6905_v4 }
 0x30f   :  { %v4756_v45 = vsel %vm3248_vm12, %v4755_v6, %v4751_v32  ;;  %1513 = vadd.xlane.f32.xlu1 %v1512_v34  ;;  %2038 = vadd.xlane.f32.xlu0 %v2037_v35  ;;  %v1986_v6 = vsel %vm533_vm0, %v505_v24, 0.0 }
 0x310   :  { %v8812_v53 = vsel %vm10180_vm11, %v4760_v39, %v4756_v45  ;;  %v1640_v46 = vpop.xlane.xlu1 %1639  ;;  %v1547_v47 = vpop.xlane.xlu0 %1546  ;;  %v1893_v39 = vsel %vm533_vm0, %v474_v44, 0.0 }
 0x311   :  { %v2240_v50 = vpack.c.bf16 %v1547_v47, %v1544_v37  ;;  %v506_v47 = vld [vmem:[%s10149_s0 + $0xf28] sm:$0xff] }
 0x313   :  { %1609 = vadd.xlane.f32.xlu1 %v1608_v49  ;;  %1516 = vadd.xlane.f32.xlu0 %v1515_v62  ;;  %v2984_v14 = vunpack.c.l.b16 %v2240_v50  ;;  %v2985_v16 = vunpack.c.h.b16 %v2240_v50 }
 0x314   :  { %v1496_v1 = vpop.xlane.xlu1 %1495  ;;  %v1643_v58 = vpop.xlane.xlu0 %1642 }
 0x315   :  { %v2256_v11 = vpack.c.bf16 %v1643_v58, %v1640_v46  ;;  %v4854_v26 = vrot.slane %v2984_v14, %v6795_v30  ;;  %v4858_v29 = vrot.slane %v2985_v16, %v6804_v38  ;;  %v365_v46 = vld [vmem:[%s10149_s0 + $0xac0] sm:$0xff]  ;;  %v1662_v14 = vsel %vm533_vm0, %v397_v0, 0.0 }
 0x317   :  { %1753 = vadd.xlane.f32.xlu1 %v1752_v59  ;;  %1612 = vadd.xlane.f32.xlu0 %v1611_v61  ;;  %v4859_v49 = vsel %vm3171_vm1, %v4858_v29, %v4854_v26  ;;  %v3016_v62 = vunpack.c.l.b16 %v2256_v11  ;;  %v3017_v50 = vunpack.c.h.b16 %v2256_v11  ;;  %v1566_v59 = vsel %vm533_vm0, %v365_v46, 0.0  ;;  %v366_v11 = vld [vmem:[%s10149_s0 + $0xac8] sm:$0xff] }
 0x318   :  { %v1550_v7 = vpop.xlane.xlu1 %1549  ;;  %v1499_v15 = vpop.xlane.xlu0 %1498  ;;  %v1989_v61 = vsel %vm533_vm0, %v506_v47, 0.0  ;;  %v1569_v16 = vsel %vm533_vm0, %v366_v11, 0.0 }
 0x319   :  { %v8832_v9 = vpack.c.bf16 %v1499_v15, %v1496_v1  ;;  %v5016_v15 = vrot.slane %v3017_v50, %v6804_v38 }
 0x31b   :  { %1849 = vadd.xlane.f32.xlu1 %v1848_v23  ;;  %1756 = vadd.xlane.f32.xlu0 %v1755_v8 }
 0x31c   :  { %v1592_v17 = vpop.xlane.xlu1 %1591  ;;  %v1553_v54 = vpop.xlane.xlu0 %1552 }
 0x31d   :  { %v2241_v21 = vpack.c.bf16 %v1553_v54, %v1550_v7  ;;  %v5012_v7 = vrot.slane %v3016_v62, %v6795_v30 }
 0x31f   :  { %v2986_v32 = vunpack.c.l.b16 %v2241_v21  ;;  %v2987_v37 = vunpack.c.h.b16 %v2241_v21  ;;  %1891 = vadd.xlane.f32.xlu1 %v1890_v25  ;;  %1852 = vadd.xlane.f32.xlu0 %v1851_v18  ;;  %v411_v18 = vld [vmem:[%s10149_s0 + $0xc30] sm:$0xff]  ;;  %v398_v21 = vld [vmem:[%s10149_s0 + $0xbc8] sm:$0xff]  ;;  %v5017_v24 = vsel %vm3171_vm1, %v5016_v15, %v5012_v7 }
 0x320   :  { %v1646_v34 = vpop.xlane.xlu1 %1645  ;;  %v1595_v35 = vpop.xlane.xlu0 %1594 }
 0x321   :  { %v4863_v40 = vrot.slane %v2986_v32, %v6801_v36  ;;  %v4868_v43 = vrot.slane %v2987_v37, %v6813_v42  ;;  %v8854_v45 = vpack.c.bf16 %v1595_v35, %v1592_v17  ;;  %v1704_v37 = vsel %vm533_vm0, %v411_v18, 0.0 }
 0x323   :  { %v4864_v51 = vsel %vm3178_vm2, %v4863_v40, %v4859_v49  ;;  %1987 = vadd.xlane.f32.xlu1 %v1986_v6  ;;  %1894 = vadd.xlane.f32.xlu0 %v1893_v39  ;;  %v443_v6 = vld [vmem:[%s10149_s0 + $0xd30] sm:$0xff]  ;;  %v412_v39 = vld [vmem:[%s10149_s0 + $0xc38] sm:$0xff]  ;;  %v2968_v40 = vunpack.c.l.b16 %v8832_v9 }
 0x324   :  { %v8865_v57 = vsel %vm3185_vm3, %v4868_v43, %v4864_v51  ;;  %v1736_v1 = vpop.xlane.xlu1 %1735  ;;  %v1649_v58 = vpop.xlane.xlu0 %1648  ;;  %v2969_v43 = vunpack.c.h.b16 %v8832_v9  ;;  %v1800_v49 = vsel %vm533_vm0, %v443_v6, 0.0  ;;  %v1707_v62 = vsel %vm533_vm0, %v412_v39, 0.0  ;;  %v491_v51 = vld [vmem:[%s10149_s0 + $0xeb0] sm:$0xff] }
 0x325   :  { %v2257_v63 = vpack.c.bf16 %v1649_v58, %v1646_v34  ;;  %v1665_v34 = vsel %vm533_vm0, %v398_v21, 0.0  ;;  %v4775_v58 = vrot.slane %v2968_v40, %v6795_v30  ;;  %v1944_v15 = vsel %vm533_vm0, %v491_v51, 0.0 }
 0x326   :  { %v4779_v9 = vrot.slane %v2969_v43, %v6804_v38  ;;  %v349_v43 = vld [vmem:[%s10149_s0 + $0xa40] sm:$0xff] }
 0x327   :  { %v3018_v23 = vunpack.c.l.b16 %v2257_v63  ;;  %v3019_v8 = vunpack.c.h.b16 %v2257_v63  ;;  %1567 = vadd.xlane.f32.xlu1 %v1566_v59  ;;  %1990 = vadd.xlane.f32.xlu0 %v1989_v61  ;;  %v3000_v59 = vunpack.c.l.b16 %v8854_v45  ;;  %v3001_v61 = vunpack.c.h.b16 %v8854_v45  ;;  %v492_v45 = vld [vmem:[%s10149_s0 + $0xeb8] sm:$0xff] }
 0x328   :  { %v1832_v10 = vpop.xlane.xlu1 %1831  ;;  %v1739_v12 = vpop.xlane.xlu0 %1738 }
 0x329   :  { %v5021_v17 = vrot.slane %v3018_v23, %v6801_v36  ;;  %v5026_v54 = vrot.slane %v3019_v8, %v6813_v42  ;;  %v8881_v25 = vpack.c.bf16 %v1739_v12, %v1736_v1  ;;  %v444_v1 = vld [vmem:[%s10149_s0 + $0xd38] sm:$0xff] }
 0x32a   :  { %v1803_v23 = vsel %vm533_vm0, %v444_v1, 0.0 }
 0x32b   :  { %v5022_v44 = vsel %vm3178_vm2, %v5021_v17, %v5017_v24  ;;  %1663 = vadd.xlane.f32.xlu1 %v1662_v14  ;;  %1570 = vadd.xlane.f32.xlu0 %v1569_v16  ;;  %v523_v14 = vld [vmem:[%s10149_s0 + $0xfb0] sm:$0xff]  ;;  %v4780_v16 = vsel %vm3171_vm1, %v4779_v9, %v4775_v58  ;;  %v4933_v17 = vrot.slane %v3000_v59, %v6795_v30  ;;  %v1518_v9 = vsel %vm533_vm0, %v349_v43, 0.0 }
 0x32c   :  { %v8892_v26 = vsel %vm3185_vm3, %v5026_v54, %v5022_v44  ;;  %v1502_v29 = vpop.xlane.xlu1 %1501  ;;  %v1835_v32 = vpop.xlane.xlu0 %1834  ;;  %v4937_v54 = vrot.slane %v3001_v61, %v6804_v38 }
 0x32d   :  { %v8896_v35 = vpack.c.bf16 %v1835_v32, %v1832_v10 }
 0x32f   :  { %1705 = vadd.xlane.f32.xlu1 %v1704_v37  ;;  %1666 = vadd.xlane.f32.xlu0 %v1665_v34  ;;  %v2040_v37 = vsel %vm533_vm0, %v523_v14, 0.0  ;;  %v1947_v34 = vsel %vm533_vm0, %v492_v45, 0.0 }
 0x330   :  { %v1598_v46 = vpop.xlane.xlu1 %1597  ;;  %v1505_v47 = vpop.xlane.xlu0 %1504 }
 0x331   :  { %v2233_v50 = vpack.c.bf16 %v1505_v47, %v1502_v29  ;;  %v4938_v47 = vsel %vm3171_vm1, %v4937_v54, %v4933_v17  ;;  %v429_v17 = vld [vmem:[%s10149_s0 + $0xcc0] sm:$0xff]  ;;  %v382_v54 = vld [vmem:[%s10149_s0 + $0xb48] sm:$0xff] }
 0x333   :  { %v2970_v63 = vunpack.c.l.b16 %v2233_v50  ;;  %v2971_v0 = vunpack.c.h.b16 %v2233_v50  ;;  %1801 = vadd.xlane.f32.xlu1 %v1800_v49  ;;  %1708 = vadd.xlane.f32.xlu0 %v1707_v62  ;;  %v3048_v49 = vunpack.c.l.b16 %v8881_v25  ;;  %v3049_v62 = vunpack.c.h.b16 %v8881_v25  ;;  %v350_v25 = vld [vmem:[%s10149_s0 + $0xa48] sm:$0xff] }
 0x334   :  { %v1688_v11 = vpop.xlane.xlu1 %1687  ;;  %v1601_v7 = vpop.xlane.xlu0 %1600 }
 0x335   :  { %v4784_v8 = vrot.slane %v2970_v63, %v6801_v36  ;;  %v4789_v10 = vrot.slane %v2971_v0, %v6813_v42  ;;  %v2249_v12 = vpack.c.bf16 %v1601_v7, %v1598_v46  ;;  %v524_v46 = vld [vmem:[%s10149_s0 + $0xfb8] sm:$0xff]  ;;  %v381_v63 = vld [vmem:[%s10149_s0 + $0xb40] sm:$0xff]  ;;  %v5170_v0 = vrot.slane %v3048_v49, %v6795_v30 }
 0x336   :  { %v2043_v59 = vsel %vm533_vm0, %v524_v46, 0.0  ;;  %v461_v46 = vld [vmem:[%s10149_s0 + $0xdc0] sm:$0xff] }
 0x337   :  { %v4785_v18 = vsel %vm3178_vm2, %v4784_v8, %v4780_v16  ;;  %v3002_v21 = vunpack.c.l.b16 %v2249_v12  ;;  %v3003_v24 = vunpack.c.h.b16 %v2249_v12  ;;  %1945 = vadd.xlane.f32.xlu1 %v1944_v15  ;;  %1804 = vadd.xlane.f32.xlu0 %v1803_v23  ;;  %v1521_v12 = vsel %vm533_vm0, %v350_v25, 0.0 }
 0x338   :  { %v8933_v44 = vsel %vm3185_vm3, %v4789_v10, %v4785_v18  ;;  %v1742_v29 = vpop.xlane.xlu1 %1741  ;;  %v1691_v32 = vpop.xlane.xlu0 %1690  ;;  %v1614_v10 = vsel %vm533_vm0, %v381_v63, 0.0 }
 0x339   :  { %v4942_v6 = vrot.slane %v3002_v21, %v6801_v36  ;;  %v4947_v39 = vrot.slane %v3003_v24, %v6813_v42  ;;  %v8939_v40 = vpack.c.bf16 %v1691_v32, %v1688_v11  ;;  %v5174_v11 = vrot.slane %v3049_v62, %v6804_v38 }
 0x33a   :  { %v3080_v21 = vunpack.c.l.b16 %v8896_v35  ;;  %v3081_v24 = vunpack.c.h.b16 %v8896_v35  ;;  %v430_v35 = vld [vmem:[%s10149_s0 + $0xcc8] sm:$0xff] }
 0x33b   :  { %v4943_v50 = vsel %vm3178_vm2, %v4942_v6, %v4938_v47  ;;  %2041 = vadd.xlane.f32.xlu1 %v2040_v37  ;;  %1948 = vadd.xlane.f32.xlu0 %v1947_v34  ;;  %v5175_v18 = vsel %vm3171_vm1, %v5174_v11, %v5170_v0  ;;  %v1758_v6 = vsel %vm533_vm0, %v429_v17, 0.0  ;;  %v475_v0 = vld [vmem:[%s10149_s0 + $0xe30] sm:$0xff]  ;;  %v462_v11 = vld [vmem:[%s10149_s0 + $0xdc8] sm:$0xff] }
 0x33c   :  { %v8952_v51 = vsel %vm3185_vm3, %v4947_v39, %v4943_v50  ;;  %v1784_v1 = vpop.xlane.xlu1 %1783  ;;  %v1745_v58 = vpop.xlane.xlu0 %1744  ;;  %v1617_v39 = vsel %vm533_vm0, %v382_v54, 0.0  ;;  %v5328_v47 = vrot.slane %v3080_v21, %v6795_v30  ;;  %v5332_v49 = vrot.slane %v3081_v24, %v6804_v38  ;;  %v507_v17 = vld [vmem:[%s10149_s0 + $0xf30] sm:$0xff]  ;;  %v476_v54 = vld [vmem:[%s10149_s0 + $0xe38] sm:$0xff] }
 0x33d   :  { %v2273_v61 = vpack.c.bf16 %v1745_v58, %v1742_v29  ;;  %v1992_v24 = vsel %vm533_vm0, %v507_v17, 0.0 }
 0x33f   :  { %v3050_v7 = vunpack.c.l.b16 %v2273_v61  ;;  %v3051_v15 = vunpack.c.h.b16 %v2273_v61  ;;  %1519 = vadd.xlane.f32.xlu1 %v1518_v9  ;;  %2044 = vadd.xlane.f32.xlu0 %v2043_v59  ;;  %v1854_v9 = vsel %vm533_vm0, %v461_v46, 0.0  ;;  %v1761_v59 = vsel %vm533_vm0, %v430_v35, 0.0 }
 0x340   :  { %v1838_v23 = vpop.xlane.xlu1 %1837  ;;  %v1787_v8 = vpop.xlane.xlu0 %1786 }
 0x341   :  { %v5179_v14 = vrot.slane %v3050_v7, %v6801_v36  ;;  %v5184_v45 = vrot.slane %v3051_v15, %v6813_v42  ;;  %v8968_v16 = vpack.c.bf16 %v1787_v8, %v1784_v1  ;;  %v5333_v7 = vsel %vm3171_vm1, %v5332_v49, %v5328_v47 }
 0x343   :  { %v5180_v29 = vsel %vm3178_vm2, %v5179_v14, %v5175_v18  ;;  %1615 = vadd.xlane.f32.xlu1 %v1614_v10  ;;  %1522 = vadd.xlane.f32.xlu0 %v1521_v12  ;;  %v1896_v12 = vsel %vm533_vm0, %v475_v0, 0.0  ;;  %v1857_v14 = vsel %vm533_vm0, %v462_v11, 0.0 }
 0x344   :  { %v8981_v32 = vsel %vm3185_vm3, %v5184_v45, %v5180_v29  ;;  %v1928_v37 = vpop.xlane.xlu1 %1927  ;;  %v1841_v34 = vpop.xlane.xlu0 %1840  ;;  %v1899_v29 = vsel %vm533_vm0, %v476_v54, 0.0  ;;  %v400_v54 = vld [vmem:[%s10149_s0 + $0xbd8] sm:$0xff] }
 0x345   :  { %v2289_v43 = vpack.c.bf16 %v1841_v34, %v1838_v23  ;;  %v367_v34 = vld [vmem:[%s10149_s0 + $0xad0] sm:$0xff] }
 0x346   :  { %v1572_v47 = vsel %vm533_vm0, %v367_v34, 0.0 }
 0x347   :  { %v3082_v62 = vunpack.c.l.b16 %v2289_v43  ;;  %v3083_v50 = vunpack.c.h.b16 %v2289_v43  ;;  %1759 = vadd.xlane.f32.xlu1 %v1758_v6  ;;  %1618 = vadd.xlane.f32.xlu0 %v1617_v39  ;;  %v508_v6 = vld [vmem:[%s10149_s0 + $0xf38] sm:$0xff] }
 0x348   :  { %v2024_v1 = vpop.xlane.xlu1 %2023  ;;  %v1931_v58 = vpop.xlane.xlu0 %1930  ;;  %v1995_v49 = vsel %vm533_vm0, %v508_v6, 0.0 }
 0x349   :  { %v5337_v61 = vrot.slane %v3082_v62, %v6801_v36  ;;  %v5342_v63 = vrot.slane %v3083_v50, %v6813_v42  ;;  %v8997_v25 = vpack.c.bf16 %v1931_v58, %v1928_v37  ;;  %v399_v58 = vld [vmem:[%s10149_s0 + $0xbd0] sm:$0xff] }
 0x34b   :  { %v5338_v15 = vsel %vm3178_vm2, %v5337_v61, %v5333_v7  ;;  %1855 = vadd.xlane.f32.xlu1 %v1854_v9  ;;  %1762 = vadd.xlane.f32.xlu0 %v1761_v59  ;;  %v368_v9 = vld [vmem:[%s10149_s0 + $0xad8] sm:$0xff]  ;;  %v3032_v59 = vunpack.c.l.b16 %v8939_v40  ;;  %v3033_v61 = vunpack.c.h.b16 %v8939_v40 }
 0x34c   :  { %v9008_v23 = vsel %vm3185_vm3, %v5342_v63, %v5338_v15  ;;  %v1556_v8 = vpop.xlane.xlu1 %1555  ;;  %v2027_v10 = vpop.xlane.xlu0 %2026 }
 0x34d   :  { %v9012_v45 = vpack.c.bf16 %v2027_v10, %v2024_v1  ;;  %v1668_v10 = vsel %vm533_vm0, %v399_v58, 0.0 }
 0x34f   :  { %1897 = vadd.xlane.f32.xlu1 %v1896_v12  ;;  %1858 = vadd.xlane.f32.xlu0 %v1857_v14  ;;  %v1575_v12 = vsel %vm533_vm0, %v368_v9, 0.0 }
 0x350   :  { %v1652_v18 = vpop.xlane.xlu1 %1651  ;;  %v1559_v21 = vpop.xlane.xlu0 %1558 }
 0x351   :  { %v2242_v37 = vpack.c.bf16 %v1559_v21, %v1556_v8  ;;  %v5095_v21 = vrot.slane %v3033_v61, %v6804_v38 }
 0x353   :  { %v2988_v39 = vunpack.c.l.b16 %v2242_v37  ;;  %v2989_v43 = vunpack.c.h.b16 %v2242_v37  ;;  %1993 = vadd.xlane.f32.xlu1 %v1992_v24  ;;  %1900 = vadd.xlane.f32.xlu0 %v1899_v29  ;;  %v3064_v24 = vunpack.c.l.b16 %v8968_v16  ;;  %v3065_v29 = vunpack.c.h.b16 %v8968_v16 }
 0x354   :  { %v1694_v46 = vpop.xlane.xlu1 %1693  ;;  %v1655_v35 = vpop.xlane.xlu0 %1654 }
 0x355   :  { %v4873_v62 = vrot.slane %v2988_v39, %v6824_v52  ;;  %v4878_v50 = vrot.slane %v2989_v43, %v6833_v60  ;;  %v2258_v1 = vpack.c.bf16 %v1655_v35, %v1652_v18  ;;  %v5091_v18 = vrot.slane %v3032_v59, %v6795_v30 }
 0x356   :  { %v5249_v58 = vrot.slane %v3064_v24, %v6795_v30  ;;  %v5253_v9 = vrot.slane %v3065_v29, %v6804_v38 }
 0x357   :  { %v4874_v63 = vsel %vm3192_vm4, %v4873_v62, %v8865_v57  ;;  %v3020_v0 = vunpack.c.l.b16 %v2258_v1  ;;  %v3021_v11 = vunpack.c.h.b16 %v2258_v1  ;;  %1573 = vadd.xlane.f32.xlu1 %v1572_v47  ;;  %1996 = vadd.xlane.f32.xlu0 %v1995_v49  ;;  %v413_v57 = vld [vmem:[%s10149_s0 + $0xc40] sm:$0xff]  ;;  %v1671_v47 = vsel %vm533_vm0, %v400_v54, 0.0 }
 0x358   :  { %v9043_v7 = vsel %vm3199_vm5, %v4878_v50, %v4874_v63  ;;  %v1790_v15 = vpop.xlane.xlu1 %1789  ;;  %v1697_v8 = vpop.xlane.xlu0 %1696  ;;  %v1710_v35 = vsel %vm533_vm0, %v413_v57, 0.0  ;;  %v414_v50 = vld [vmem:[%s10149_s0 + $0xc48] sm:$0xff]  ;;  %v5096_v1 = vsel %vm3171_vm1, %v5095_v21, %v5091_v18  ;;  %v5254_v54 = vsel %vm3171_vm1, %v5253_v9, %v5249_v58 }
 0x359   :  { %v5031_v14 = vrot.slane %v3020_v0, %v6824_v52  ;;  %v5036_v40 = vrot.slane %v3021_v11, %v6833_v60  ;;  %v2265_v17 = vpack.c.bf16 %v1697_v8, %v1694_v46  ;;  %v446_v57 = vld [vmem:[%s10149_s0 + $0xd48] sm:$0xff]  ;;  %v3112_v18 = vunpack.c.l.b16 %v8997_v25 }
 0x35a   :  { %v3113_v21 = vunpack.c.h.b16 %v8997_v25  ;;  %v494_v25 = vld [vmem:[%s10149_s0 + $0xec8] sm:$0xff] }
 0x35b   :  { %v5032_v37 = vsel %vm3192_vm4, %v5031_v14, %v8892_v26  ;;  %v3034_v34 = vunpack.c.l.b16 %v2265_v17  ;;  %v3035_v6 = vunpack.c.h.b16 %v2265_v17  ;;  %1669 = vadd.xlane.f32.xlu1 %v1668_v10  ;;  %1576 = vadd.xlane.f32.xlu0 %v1575_v12  ;;  %v445_v26 = vld [vmem:[%s10149_s0 + $0xd40] sm:$0xff]  ;;  %v1713_v10 = vsel %vm533_vm0, %v414_v50, 0.0 }
 0x35c   :  { %v9062_v39 = vsel %vm3199_vm5, %v5036_v40, %v5032_v37  ;;  %v1880_v43 = vpop.xlane.xlu1 %1879  ;;  %v1793_v46 = vpop.xlane.xlu0 %1792  ;;  %v1806_v8 = vsel %vm533_vm0, %v445_v26, 0.0  ;;  %v493_v17 = vld [vmem:[%s10149_s0 + $0xec0] sm:$0xff]  ;;  %v1953_v58 = vsel %vm533_vm0, %v494_v25, 0.0 }
 0x35d   :  { %v5100_v49 = vrot.slane %v3034_v34, %v6801_v36  ;;  %v5105_v16 = vrot.slane %v3035_v6, %v6813_v42  ;;  %v2281_v62 = vpack.c.bf16 %v1793_v46, %v1790_v15  ;;  %v1950_v6 = vsel %vm533_vm0, %v493_v17, 0.0 }
 0x35f   :  { %v5101_v59 = vsel %vm3178_vm2, %v5100_v49, %v5096_v1  ;;  %v3066_v61 = vunpack.c.l.b16 %v2281_v62  ;;  %v3067_v63 = vunpack.c.h.b16 %v2281_v62  ;;  %1711 = vadd.xlane.f32.xlu1 %v1710_v35  ;;  %1672 = vadd.xlane.f32.xlu0 %v1671_v47  ;;  %v525_v35 = vld [vmem:[%s10149_s0 + $0xfc0] sm:$0xff]  ;;  %v5486_v47 = vrot.slane %v3112_v18, %v6795_v30 }
 0x360   :  { %v9079_v0 = vsel %vm3185_vm3, %v5105_v16, %v5101_v59  ;;  %v1934_v11 = vpop.xlane.xlu1 %1933  ;;  %v1883_v15 = vpop.xlane.xlu0 %1882  ;;  %v5490_v49 = vrot.slane %v3113_v21, %v6804_v38  ;;  %v2046_v1 = vsel %vm533_vm0, %v525_v35, 0.0 }
 0x361   :  { %v5258_v12 = vrot.slane %v3066_v61, %v6801_v36  ;;  %v5263_v14 = vrot.slane %v3067_v63, %v6813_v42  ;;  %v9085_v40 = vpack.c.bf16 %v1883_v15, %v1880_v43  ;;  %v1809_v43 = vsel %vm533_vm0, %v446_v57, 0.0  ;;  %v351_v63 = vld [vmem:[%s10149_s0 + $0xa50] sm:$0xff] }
 0x362   :  { %v5491_v15 = vsel %vm3171_vm1, %v5490_v49, %v5486_v47 }
 0x363   :  { %v5259_v24 = vsel %vm3178_vm2, %v5258_v12, %v5254_v54  ;;  %1807 = vadd.xlane.f32.xlu1 %v1806_v8  ;;  %1714 = vadd.xlane.f32.xlu0 %v1713_v10  ;;  %v3144_v8 = vunpack.c.l.b16 %v9012_v45  ;;  %v3145_v10 = vunpack.c.h.b16 %v9012_v45  ;;  %v1524_v54 = vsel %vm533_vm0, %v351_v63, 0.0  ;;  %v352_v45 = vld [vmem:[%s10149_s0 + $0xa58] sm:$0xff] }
 0x364   :  { %v9098_v29 = vsel %vm3185_vm3, %v5263_v14, %v5259_v24  ;;  %v1976_v37 = vpop.xlane.xlu1 %1975  ;;  %v1937_v34 = vpop.xlane.xlu0 %1936  ;;  %v383_v24 = vld [vmem:[%s10149_s0 + $0xb50] sm:$0xff]  ;;  %v1527_v47 = vsel %vm533_vm0, %v352_v45, 0.0 }
 0x365   :  { %v2305_v46 = vpack.c.bf16 %v1937_v34, %v1934_v11  ;;  %v526_v11 = vld [vmem:[%s10149_s0 + $0xfc8] sm:$0xff]  ;;  %v5648_v34 = vrot.slane %v3145_v10, %v6804_v38  ;;  %v1620_v25 = vsel %vm533_vm0, %v383_v24, 0.0 }
 0x366   :  { %v2049_v18 = vsel %vm533_vm0, %v526_v11, 0.0 }
 0x367   :  { %v3114_v16 = vunpack.c.l.b16 %v2305_v46  ;;  %v3115_v62 = vunpack.c.h.b16 %v2305_v46  ;;  %1951 = vadd.xlane.f32.xlu1 %v1950_v6  ;;  %1810 = vadd.xlane.f32.xlu0 %v1809_v43 }
 0x368   :  { %v2030_v26 = vpop.xlane.xlu1 %2029  ;;  %v1979_v50 = vpop.xlane.xlu0 %1978 }
 0x369   :  { %v5495_v9 = vrot.slane %v3114_v16, %v6801_v36  ;;  %v5500_v59 = vrot.slane %v3115_v62, %v6813_v42  ;;  %v9114_v61 = vpack.c.bf16 %v1979_v50, %v1976_v37  ;;  %v5644_v37 = vrot.slane %v3144_v8, %v6795_v30  ;;  %v384_v50 = vld [vmem:[%s10149_s0 + $0xb58] sm:$0xff] }
 0x36a   :  { %v1623_v10 = vsel %vm533_vm0, %v384_v50, 0.0 }
 0x36b   :  { %v5496_v12 = vsel %vm3178_vm2, %v5495_v9, %v5491_v15  ;;  %2047 = vadd.xlane.f32.xlu1 %v2046_v1  ;;  %1954 = vadd.xlane.f32.xlu0 %v1953_v58  ;;  %v5649_v1 = vsel %vm3171_vm1, %v5648_v34, %v5644_v37 }
 0x36c   :  { %v9127_v14 = vsel %vm3185_vm3, %v5500_v59, %v5496_v12  ;;  %v1508_v17 = vpop.xlane.xlu1 %1507  ;;  %v2033_v57 = vpop.xlane.xlu0 %2032 }
 0x36d   :  { %v2321_v21 = vpack.c.bf16 %v2033_v57, %v2030_v26  ;;  %v431_v26 = vld [vmem:[%s10149_s0 + $0xcd0] sm:$0xff] }
 0x36e   :  { %v1764_v8 = vsel %vm533_vm0, %v431_v26, 0.0 }
 0x36f   :  { %v3146_v6 = vunpack.c.l.b16 %v2321_v21  ;;  %v3147_v43 = vunpack.c.h.b16 %v2321_v21  ;;  %1525 = vadd.xlane.f32.xlu1 %v1524_v54  ;;  %2050 = vadd.xlane.f32.xlu0 %v2049_v18  ;;  %v463_v54 = vld [vmem:[%s10149_s0 + $0xdd0] sm:$0xff]  ;;  %v432_v18 = vld [vmem:[%s10149_s0 + $0xcd8] sm:$0xff] }
 0x370   :  { %v1604_v46 = vpop.xlane.xlu1 %1603  ;;  %v1511_v35 = vpop.xlane.xlu0 %1510 }
 0x371   :  { %v5653_v49 = vrot.slane %v3146_v6, %v6801_v36  ;;  %v5658_v16 = vrot.slane %v3147_v43, %v6813_v42  ;;  %v2234_v62 = vpack.c.bf16 %v1511_v35, %v1508_v17  ;;  %v1860_v43 = vsel %vm533_vm0, %v463_v54, 0.0 }
 0x373   :  { %v5654_v58 = vsel %vm3178_vm2, %v5653_v49, %v5649_v1  ;;  %v2972_v9 = vunpack.c.l.b16 %v2234_v62  ;;  %v2973_v59 = vunpack.c.h.b16 %v2234_v62  ;;  %1621 = vadd.xlane.f32.xlu1 %v1620_v25  ;;  %1528 = vadd.xlane.f32.xlu0 %v1527_v47  ;;  %v464_v49 = vld [vmem:[%s10149_s0 + $0xdd8] sm:$0xff] }
 0x374   :  { %v9152_v63 = vsel %vm3185_vm3, %v5658_v16, %v5654_v58  ;;  %v1748_v11 = vpop.xlane.xlu1 %1747  ;;  %v1607_v15 = vpop.xlane.xlu0 %1606 }
 0x375   :  { %v4794_v12 = vrot.slane %v2972_v9, %v6824_v52  ;;  %v4799_v17 = vrot.slane %v2973_v59, %v6833_v60  ;;  %v2250_v57 = vpack.c.bf16 %v1607_v15, %v1604_v46  ;;  %v1767_v46 = vsel %vm533_vm0, %v432_v18, 0.0 }
 0x376   :  { %v1863_v59 = vsel %vm533_vm0, %v464_v49, 0.0  ;;  %v3129_v49 = vunpack.c.h.b16 %v9114_v61 }
 0x377   :  { %v4795_v21 = vsel %vm3192_vm4, %v4794_v12, %v8933_v44  ;;  %v3004_v24 = vunpack.c.l.b16 %v2250_v57  ;;  %v3005_v45 = vunpack.c.h.b16 %v2250_v57  ;;  %1765 = vadd.xlane.f32.xlu1 %v1764_v8  ;;  %1624 = vadd.xlane.f32.xlu0 %v1623_v10  ;;  %v477_v44 = vld [vmem:[%s10149_s0 + $0xe40] sm:$0xff]  ;;  %v478_v10 = vld [vmem:[%s10149_s0 + $0xe48] sm:$0xff]  ;;  %v3096_v12 = vunpack.c.l.b16 %v9085_v40 }
 0x378   :  { %v9167_v37 = vsel %vm3199_vm5, %v4799_v17, %v4795_v21  ;;  %v1844_v34 = vpop.xlane.xlu1 %1843  ;;  %v1751_v6 = vpop.xlane.xlu0 %1750  ;;  %v1902_v9 = vsel %vm533_vm0, %v477_v44, 0.0  ;;  %v3097_v17 = vunpack.c.h.b16 %v9085_v40  ;;  %v3128_v44 = vunpack.c.l.b16 %v9114_v61 }
 0x379   :  { %v4952_v35 = vrot.slane %v3004_v24, %v6824_v52  ;;  %v4957_v25 = vrot.slane %v3005_v45, %v6833_v60  ;;  %v2274_v47 = vpack.c.bf16 %v1751_v6, %v1748_v11  ;;  %v1905_v6 = vsel %vm533_vm0, %v478_v10, 0.0 }
 0x37b   :  { %v4953_v16 = vsel %vm3192_vm4, %v4952_v35, %v8952_v51  ;;  %v3052_v62 = vunpack.c.l.b16 %v2274_v47  ;;  %v3053_v26 = vunpack.c.h.b16 %v2274_v47  ;;  %1861 = vadd.xlane.f32.xlu1 %v1860_v43  ;;  %1768 = vadd.xlane.f32.xlu0 %v1767_v46  ;;  %v509_v51 = vld [vmem:[%s10149_s0 + $0xf40] sm:$0xff]  ;;  %v510_v35 = vld [vmem:[%s10149_s0 + $0xf48] sm:$0xff]  ;;  %v5411_v47 = vrot.slane %v3097_v17, %v6804_v38 }
 0x37c   :  { %v9182_v50 = vsel %vm3199_vm5, %v4957_v25, %v4953_v16  ;;  %v1886_v1 = vpop.xlane.xlu1 %1885  ;;  %v1847_v58 = vpop.xlane.xlu0 %1846  ;;  %v5407_v25 = vrot.slane %v3096_v12, %v6795_v30  ;;  %v5565_v12 = vrot.slane %v3128_v44, %v6795_v30  ;;  %v5569_v17 = vrot.slane %v3129_v49, %v6804_v38 }
 0x37d   :  { %v5189_v11 = vrot.slane %v3052_v62, %v6824_v52  ;;  %v5194_v15 = vrot.slane %v3053_v26, %v6833_v60  ;;  %v2290_v8 = vpack.c.bf16 %v1847_v58, %v1844_v34  ;;  %v1998_v34 = vsel %vm533_vm0, %v509_v51, 0.0  ;;  %v370_v51 = vld [vmem:[%s10149_s0 + $0xae8] sm:$0xff] }
 0x37e   :  { %v5412_v10 = vsel %vm3171_vm1, %v5411_v47, %v5407_v25 }
 0x37f   :  { %v5190_v57 = vsel %vm3192_vm4, %v5189_v11, %v8981_v32  ;;  %v3084_v54 = vunpack.c.l.b16 %v2290_v8  ;;  %v3085_v18 = vunpack.c.h.b16 %v2290_v8  ;;  %1903 = vadd.xlane.f32.xlu1 %v1902_v9  ;;  %1864 = vadd.xlane.f32.xlu0 %v1863_v59  ;;  %v369_v32 = vld [vmem:[%s10149_s0 + $0xae0] sm:$0xff]  ;;  %v2001_v11 = vsel %vm533_vm0, %v510_v35, 0.0 }
 0x380   :  { %v9199_v21 = vsel %vm3199_vm5, %v5194_v15, %v5190_v57  ;;  %v1982_v24 = vpop.xlane.xlu1 %1981  ;;  %v1889_v45 = vpop.xlane.xlu0 %1888  ;;  %v1578_v59 = vsel %vm533_vm0, %v369_v32, 0.0  ;;  %v402_v32 = vld [vmem:[%s10149_s0 + $0xbe8] sm:$0xff]  ;;  %v5570_v35 = vsel %vm3171_vm1, %v5569_v17, %v5565_v12  ;;  %vm10181_vm1 = vcmask 786112  }
 0x381   :  { %v5347_v43 = vrot.slane %v3084_v54, %v6824_v52  ;;  %v5352_v40 = vrot.slane %v3085_v18, %v6833_v60  ;;  %v2297_v46 = vpack.c.bf16 %v1889_v45, %v1886_v1 }
 0x383   :  { %v5348_v16 = vsel %vm3192_vm4, %v5347_v43, %v9008_v23  ;;  %v3098_v62 = vunpack.c.l.b16 %v2297_v46  ;;  %v3099_v26 = vunpack.c.h.b16 %v2297_v46  ;;  %1999 = vadd.xlane.f32.xlu1 %v1998_v34  ;;  %1906 = vadd.xlane.f32.xlu0 %v1905_v6  ;;  %v401_v23 = vld [vmem:[%s10149_s0 + $0xbe0] sm:$0xff]  ;;  %v1581_v43 = vsel %vm533_vm0, %v370_v51, 0.0  ;;  %v415_v46 = vld [vmem:[%s10149_s0 + $0xc50] sm:$0xff] }
 0x384   :  { %v9218_v1 = vsel %vm3199_vm5, %v5352_v40, %v5348_v16  ;;  %v1562_v58 = vpop.xlane.xlu1 %1561  ;;  %v1985_v9 = vpop.xlane.xlu0 %1984  ;;  %v1674_v6 = vsel %vm533_vm0, %v401_v23, 0.0  ;;  %v1716_v16 = vsel %vm533_vm0, %v415_v46, 0.0 }
 0x385   :  { %v5416_v15 = vrot.slane %v3098_v62, %v6801_v36  ;;  %v5421_v61 = vrot.slane %v3099_v26, %v6813_v42  ;;  %v2313_v8 = vpack.c.bf16 %v1985_v9, %v1982_v24  ;;  %v1677_v62 = vsel %vm533_vm0, %v402_v32, 0.0 }
 0x387   :  { %v5417_v57 = vsel %vm3178_vm2, %v5416_v15, %v5412_v10  ;;  %v3130_v54 = vunpack.c.l.b16 %v2313_v8  ;;  %v3131_v18 = vunpack.c.h.b16 %v2313_v8  ;;  %1579 = vadd.xlane.f32.xlu1 %v1578_v59  ;;  %2002 = vadd.xlane.f32.xlu0 %v2001_v11  ;;  %v447_v59 = vld [vmem:[%s10149_s0 + $0xd50] sm:$0xff]  ;;  %v416_v11 = vld [vmem:[%s10149_s0 + $0xc58] sm:$0xff] }
 0x388   :  { %v9235_v24 = vsel %vm3185_vm3, %v5421_v61, %v5417_v57  ;;  %v1658_v45 = vpop.xlane.xlu1 %1657  ;;  %v1565_v34 = vpop.xlane.xlu0 %1564  ;;  %v1812_v12 = vsel %vm533_vm0, %v447_v59, 0.0  ;;  %v1719_v17 = vsel %vm533_vm0, %v416_v11, 0.0 }
 0x389   :  { %v5574_v40 = vrot.slane %v3130_v54, %v6801_v36  ;;  %v5579_v30 = vrot.slane %v3131_v18, %v6813_v42  ;;  %v2243_v38 = vpack.c.bf16 %v1565_v34, %v1562_v58 }
 0x38b   :  { %v5575_v25 = vsel %vm3178_vm2, %v5574_v40, %v5570_v35  ;;  %v2990_v47 = vunpack.c.l.b16 %v2243_v38  ;;  %v2991_v44 = vunpack.c.h.b16 %v2243_v38  ;;  %1675 = vadd.xlane.f32.xlu1 %v1674_v6  ;;  %1582 = vadd.xlane.f32.xlu0 %v1581_v43  ;;  %vm10182_vm2 = vmmov %vm10181_vm1 }
 0x38c   :  { %v9250_v36 = vsel %vm3185_vm3, %v5579_v30, %v5575_v25  ;;  %v1700_v42 = vpop.xlane.xlu1 %1699  ;;  %v1661_v49 = vpop.xlane.xlu0 %1660 }
 0x38d   :  { %v4883_v26 = vrot.slane %v2990_v47, %v6840_v2  ;;  %v4888_v58 = vrot.slane %v2991_v44, %v6853_v13  ;;  %v2259_v9 = vpack.c.bf16 %v1661_v49, %v1658_v45  ;;  %v448_v45 = vld [vmem:[%s10149_s0 + $0xd58] sm:$0xff] }
 0x38e   :  { %v1815_v32 = vsel %vm533_vm0, %v448_v45, 0.0  ;;  %v496_v44 = vld [vmem:[%s10149_s0 + $0xed8] sm:$0xff] }
 0x38f   :  { %v4884_v15 = vsel %vm3206_vm6, %v4883_v26, %v9043_v7  ;;  %v3022_v61 = vunpack.c.l.b16 %v2259_v9  ;;  %v3023_v8 = vunpack.c.h.b16 %v2259_v9  ;;  %1717 = vadd.xlane.f32.xlu1 %v1716_v16  ;;  %1678 = vadd.xlane.f32.xlu0 %v1677_v62  ;;  %v495_v7 = vld [vmem:[%s10149_s0 + $0xed0] sm:$0xff]  ;;  %v1959_v59 = vsel %vm533_vm0, %v496_v44, 0.0 }
 0x390   :  { %v9265_v23 = vsel %vm3213_vm7, %v4888_v58, %v4884_v15  ;;  %v1796_v51 = vpop.xlane.xlu1 %1795  ;;  %v1703_v10 = vpop.xlane.xlu0 %1702  ;;  %v1956_v46 = vsel %vm533_vm0, %v495_v7, 0.0 }
 0x391   :  { %v5041_v57 = vrot.slane %v3022_v61, %v6840_v2  ;;  %v5046_v54 = vrot.slane %v3023_v8, %v6853_v13  ;;  %v2266_v18 = vpack.c.bf16 %v1703_v10, %v1700_v42  ;;  %v528_v8 = vld [vmem:[%s10149_s0 + $0xfd8] sm:$0xff] }
 0x392   :  { %v2055_v7 = vsel %vm533_vm0, %v528_v8, 0.0 }
 0x393   :  { %v5042_v34 = vsel %vm3206_vm6, %v5041_v57, %v9062_v39  ;;  %v3036_v6 = vunpack.c.l.b16 %v2266_v18  ;;  %v3037_v43 = vunpack.c.h.b16 %v2266_v18  ;;  %1813 = vadd.xlane.f32.xlu1 %v1812_v12  ;;  %1720 = vadd.xlane.f32.xlu0 %v1719_v17  ;;  %v527_v39 = vld [vmem:[%s10149_s0 + $0xfd0] sm:$0xff] }
 0x394   :  { %v9280_v40 = vsel %vm3213_vm7, %v5046_v54, %v5042_v34  ;;  %v1940_v30 = vpop.xlane.xlu1 %1939  ;;  %v1799_v38 = vpop.xlane.xlu0 %1798  ;;  %v2052_v9 = vsel %vm533_vm0, %v527_v39, 0.0 }
 0x395   :  { %v5110_v35 = vrot.slane %v3036_v6, %v6824_v52  ;;  %v5115_v25 = vrot.slane %v3037_v43, %v6833_v60  ;;  %v2282_v47 = vpack.c.bf16 %v1799_v38, %v1796_v51  ;;  %v353_v43 = vld [vmem:[%s10149_s0 + $0xa60] sm:$0xff] }
 0x396   :  { %v1530_v39 = vsel %vm533_vm0, %v353_v43, 0.0 }
 0x397   :  { %v5111_v42 = vsel %vm3192_vm4, %v5110_v35, %v9079_v0  ;;  %v3068_v49 = vunpack.c.l.b16 %v2282_v47  ;;  %v3069_v16 = vunpack.c.h.b16 %v2282_v47  ;;  %1957 = vadd.xlane.f32.xlu1 %v1956_v46  ;;  %1816 = vadd.xlane.f32.xlu0 %v1815_v32  ;;  %v340_v0 = vld [vmem:[%s10149_s0 + $0x9f8] sm:$0xff] }
 0x398   :  { %v9295_v62 = vsel %vm3199_vm5, %v5115_v25, %v5111_v42  ;;  %v2036_v26 = vpop.xlane.xlu1 %2035  ;;  %v1943_v58 = vpop.xlane.xlu0 %1942  ;;  %v1491_v18 = vsel %vm533_vm0, %v340_v0, 0.0 }
 0x399   :  { %v5268_v11 = vrot.slane %v3068_v49, %v6824_v52  ;;  %v5273_v15 = vrot.slane %v3069_v16, %v6833_v60  ;;  %v2306_v61 = vpack.c.bf16 %v1943_v58, %v1940_v30  ;;  %v385_v16 = vld [vmem:[%s10149_s0 + $0xb60] sm:$0xff] }
 0x39a   :  { %v1626_v0 = vsel %vm533_vm0, %v385_v16, 0.0 }
 0x39b   :  { %v5269_v51 = vsel %vm3192_vm4, %v5268_v11, %v9098_v29  ;;  %v3116_v10 = vunpack.c.l.b16 %v2306_v61  ;;  %v3117_v12 = vunpack.c.h.b16 %v2306_v61  ;;  %2053 = vadd.xlane.f32.xlu1 %v2052_v9  ;;  %1960 = vadd.xlane.f32.xlu0 %v1959_v59  ;;  %v354_v29 = vld [vmem:[%s10149_s0 + $0xa68] sm:$0xff] }
 0x39c   :  { %v9310_v17 = vsel %vm3199_vm5, %v5273_v15, %v5269_v51  ;;  %v1514_v57 = vpop.xlane.xlu1 %1513  ;;  %v2039_v54 = vpop.xlane.xlu0 %2038  ;;  %v1533_v47 = vsel %vm533_vm0, %v354_v29, 0.0 }
 0x39d   :  { %v5505_v45 = vrot.slane %v3116_v10, %v6824_v52  ;;  %v5510_v34 = vrot.slane %v3117_v12, %v6833_v60  ;;  %v2322_v6 = vpack.c.bf16 %v2039_v54, %v2036_v26  ;;  %v433_v12 = vld [vmem:[%s10149_s0 + $0xce0] sm:$0xff] }
 0x39e   :  { %v1770_v29 = vsel %vm533_vm0, %v433_v12, 0.0 }
 0x39f   :  { %v5506_v30 = vsel %vm3192_vm4, %v5505_v45, %v9127_v14  ;;  %v3148_v38 = vunpack.c.l.b16 %v2322_v6  ;;  %v3149_v46 = vunpack.c.h.b16 %v2322_v6  ;;  %1492 = vadd.xlane.f32.xlu1 %v1491_v18  ;;  %2056 = vadd.xlane.f32.xlu0 %v2055_v7  ;;  %v386_v14 = vld [vmem:[%s10149_s0 + $0xb68] sm:$0xff] }
 0x3a0   :  { %v9325_v32 = vsel %vm3199_vm5, %v5510_v34, %v5506_v30  ;;  %v1610_v35 = vpop.xlane.xlu1 %1609  ;;  %v1517_v25 = vpop.xlane.xlu0 %1516  ;;  %v1629_v61 = vsel %vm533_vm0, %v386_v14, 0.0 }
 0x3a1   :  { %v5663_v44 = vrot.slane %v3148_v38, %v6824_v52  ;;  %v5668_v42 = vrot.slane %v3149_v46, %v6833_v60  ;;  %v2235_v49 = vpack.c.bf16 %v1517_v25, %v1514_v57  ;;  %v465_v46 = vld [vmem:[%s10149_s0 + $0xde0] sm:$0xff] }
 0x3a2   :  { %v1866_v14 = vsel %vm533_vm0, %v465_v46, 0.0 }
 0x3a3   :  { %v5664_v26 = vsel %vm3192_vm4, %v5663_v44, %v9152_v63  ;;  %v2974_v58 = vunpack.c.l.b16 %v2235_v49  ;;  %v2975_v9 = vunpack.c.h.b16 %v2235_v49  ;;  %1534 = vadd.xlane.f32.xlu1 %v1533_v47  ;;  %1531 = vadd.xlane.f32.xlu0 %v1530_v39  ;;  %v434_v63 = vld [vmem:[%s10149_s0 + $0xce8] sm:$0xff] }
 0x3a4   :  { %v9340_v59 = vsel %vm3199_vm5, %v5668_v42, %v5664_v26  ;;  %v1754_v11 = vpop.xlane.xlu1 %1753  ;;  %v1613_v15 = vpop.xlane.xlu0 %1612  ;;  %v1773_v6 = vsel %vm533_vm0, %v434_v63, 0.0 }
 0x3a5   :  { %v4804_v8 = vrot.slane %v2974_v58, %v6840_v2  ;;  %v4809_v51 = vrot.slane %v2975_v9, %v6853_v13  ;;  %v2251_v10 = vpack.c.bf16 %v1613_v15, %v1610_v35  ;;  %v479_v9 = vld [vmem:[%s10149_s0 + $0xe50] sm:$0xff] }
 0x3a6   :  { %v1908_v63 = vsel %vm533_vm0, %v479_v9, 0.0 }
 0x3a7   :  { %v4805_v57 = vsel %vm3206_vm6, %v4804_v8, %v9167_v37  ;;  %v3006_v54 = vunpack.c.l.b16 %v2251_v10  ;;  %v3007_v18 = vunpack.c.h.b16 %v2251_v10  ;;  %1630 = vadd.xlane.f32.xlu1 %v1629_v61  ;;  %1627 = vadd.xlane.f32.xlu0 %v1626_v0  ;;  %v466_v37 = vld [vmem:[%s10149_s0 + $0xde8] sm:$0xff] }
 0x3a8   :  { %v9355_v7 = vsel %vm3213_vm7, %v4809_v51, %v4805_v57  ;;  %v1850_v45 = vpop.xlane.xlu1 %1849  ;;  %v1757_v34 = vpop.xlane.xlu0 %1756  ;;  %v1869_v49 = vsel %vm533_vm0, %v466_v37, 0.0 }
 0x3a9   :  { %v4962_v43 = vrot.slane %v3006_v54, %v6840_v2  ;;  %v4967_v30 = vrot.slane %v3007_v18, %v6853_v13  ;;  %v2275_v38 = vpack.c.bf16 %v1757_v34, %v1754_v11  ;;  %v511_v18 = vld [vmem:[%s10149_s0 + $0xf50] sm:$0xff] }
 0x3aa   :  { %v2004_v37 = vsel %vm533_vm0, %v511_v18, 0.0 }
 0x3ab   :  { %v4963_v35 = vsel %vm3206_vm6, %v4962_v43, %v9182_v50  ;;  %v3054_v25 = vunpack.c.l.b16 %v2275_v38  ;;  %v3055_v47 = vunpack.c.h.b16 %v2275_v38  ;;  %1774 = vadd.xlane.f32.xlu1 %v1773_v6  ;;  %1771 = vadd.xlane.f32.xlu0 %v1770_v29  ;;  %v480_v50 = vld [vmem:[%s10149_s0 + $0xe58] sm:$0xff] }
 0x3ac   :  { %v9370_v39 = vsel %vm3213_vm7, %v4967_v30, %v4963_v35  ;;  %v1892_v44 = vpop.xlane.xlu1 %1891  ;;  %v1853_v42 = vpop.xlane.xlu0 %1852  ;;  %v1911_v10 = vsel %vm533_vm0, %v480_v50, 0.0 }
 0x3ad   :  { %v5199_v16 = vrot.slane %v3054_v25, %v6840_v2  ;;  %v5204_v26 = vrot.slane %v3055_v47, %v6853_v13  ;;  %v2291_v58 = vpack.c.bf16 %v1853_v42, %v1850_v45  ;;  %v371_v47 = vld [vmem:[%s10149_s0 + $0xaf0] sm:$0xff] }
 0x3ae   :  { %v1584_v50 = vsel %vm533_vm0, %v371_v47, 0.0 }
 0x3af   :  { %v5200_v11 = vsel %vm3206_vm6, %v5199_v16, %v9199_v21  ;;  %v3086_v15 = vunpack.c.l.b16 %v2291_v58  ;;  %v3087_v61 = vunpack.c.h.b16 %v2291_v58  ;;  %1870 = vadd.xlane.f32.xlu1 %v1869_v49  ;;  %1867 = vadd.xlane.f32.xlu0 %v1866_v14  ;;  %v512_v21 = vld [vmem:[%s10149_s0 + $0xf58] sm:$0xff] }
 0x3b0   :  { %v9385_v0 = vsel %vm3213_vm7, %v5204_v26, %v5200_v11  ;;  %v1988_v8 = vpop.xlane.xlu1 %1987  ;;  %v1895_v51 = vpop.xlane.xlu0 %1894  ;;  %v2007_v38 = vsel %vm533_vm0, %v512_v21, 0.0 }
 0x3b1   :  { %v5357_v12 = vrot.slane %v3086_v15, %v6840_v2  ;;  %v5362_v57 = vrot.slane %v3087_v61, %v6853_v13  ;;  %v2298_v54 = vpack.c.bf16 %v1895_v51, %v1892_v44  ;;  %v403_v61 = vld [vmem:[%s10149_s0 + $0xbf0] sm:$0xff] }
 0x3b3   :  { %v5358_v45 = vsel %vm3206_vm6, %v5357_v12, %v9218_v1  ;;  %v3100_v34 = vunpack.c.l.b16 %v2298_v54  ;;  %v3101_v6 = vunpack.c.h.b16 %v2298_v54  ;;  %1912 = vadd.xlane.f32.xlu1 %v1911_v10  ;;  %1909 = vadd.xlane.f32.xlu0 %v1908_v63  ;;  %v372_v1 = vld [vmem:[%s10149_s0 + $0xaf8] sm:$0xff] }
 0x3b4   :  { %v9400_v29 = vsel %vm3213_vm7, %v5362_v57, %v5358_v45  ;;  %v1568_v43 = vpop.xlane.xlu1 %1567  ;;  %v1991_v30 = vpop.xlane.xlu0 %1990  ;;  %v1587_v58 = vsel %vm533_vm0, %v372_v1, 0.0  ;;  %v1680_v57 = vsel %vm533_vm0, %v403_v61, 0.0  ;;  %v417_v45 = vld [vmem:[%s10149_s0 + $0xc60] sm:$0xff] }
 0x3b5   :  { %v5426_v46 = vrot.slane %v3100_v34, %v6824_v52  ;;  %v5431_v35 = vrot.slane %v3101_v6, %v6833_v60  ;;  %v2314_v25 = vpack.c.bf16 %v1991_v30, %v1988_v8 }
 0x3b7   :  { %v5427_v44 = vsel %vm3192_vm4, %v5426_v46, %v9235_v24  ;;  %v3132_v42 = vunpack.c.l.b16 %v2314_v25  ;;  %v3133_v49 = vunpack.c.h.b16 %v2314_v25  ;;  %2008 = vadd.xlane.f32.xlu1 %v2007_v38  ;;  %2005 = vadd.xlane.f32.xlu0 %v2004_v37  ;;  %v404_v24 = vld [vmem:[%s10149_s0 + $0xbf8] sm:$0xff] }
 0x3b8   :  { %v9415_v14 = vsel %vm3199_vm5, %v5431_v35, %v5427_v44  ;;  %v1664_v16 = vpop.xlane.xlu1 %1663  ;;  %v1571_v26 = vpop.xlane.xlu0 %1570  ;;  %v1683_v12 = vsel %vm533_vm0, %v404_v24, 0.0  ;;  %v1722_v35 = vsel %vm533_vm0, %v417_v45, 0.0  ;;  %v449_v44 = vld [vmem:[%s10149_s0 + $0xd60] sm:$0xff] }
 0x3b9   :  { %v5584_v9 = vrot.slane %v3132_v42, %v6824_v52  ;;  %v5589_v11 = vrot.slane %v3133_v49, %v6833_v60  ;;  %v2244_v15 = vpack.c.bf16 %v1571_v26, %v1568_v43 }
 0x3bb   :  { %v5585_v8 = vsel %vm3192_vm4, %v5584_v9, %v9250_v36  ;;  %v2992_v51 = vunpack.c.l.b16 %v2244_v15  ;;  %v2993_v10 = vunpack.c.h.b16 %v2244_v15  ;;  %1588 = vadd.xlane.f32.xlu1 %v1587_v58  ;;  %1585 = vadd.xlane.f32.xlu0 %v1584_v50  ;;  %v418_v36 = vld [vmem:[%s10149_s0 + $0xc68] sm:$0xff] }
 0x3bc   :  { %v9430_v52 = vsel %vm3199_vm5, %v5589_v11, %v5585_v8  ;;  %v1706_v60 = vpop.xlane.xlu1 %1705  ;;  %v1667_v63 = vpop.xlane.xlu0 %1666  ;;  %v1725_v46 = vsel %vm533_vm0, %v418_v36, 0.0  ;;  %v1818_v11 = vsel %vm533_vm0, %v449_v44, 0.0  ;;  %v497_v8 = vld [vmem:[%s10149_s0 + $0xee0] sm:$0xff] }
 0x3bd   :  { %v4893_v54 = vrot.slane %v2992_v51, %v6859_v22  ;;  %v4898_v21 = vrot.slane %v2993_v10, %v6867_v27  ;;  %v2260_v18 = vpack.c.bf16 %v1667_v63, %v1664_v16 }
 0x3bf   :  { %v4894_v34 = vsel %vm3220_vm8, %v4893_v54, %v9265_v23  ;;  %v3024_v6 = vunpack.c.l.b16 %v2260_v18  ;;  %v3025_v43 = vunpack.c.h.b16 %v2260_v18  ;;  %1684 = vadd.xlane.f32.xlu1 %v1683_v12  ;;  %1681 = vadd.xlane.f32.xlu0 %v1680_v57  ;;  %v450_v23 = vld [vmem:[%s10149_s0 + $0xd68] sm:$0xff] }
 0x3c0   :  { %v9445_v30 = vsel %vm3227_vm9, %v4898_v21, %v4894_v34  ;;  %v1802_v38 = vpop.xlane.xlu1 %1801  ;;  %v1709_v37 = vpop.xlane.xlu0 %1708  ;;  %v1821_v9 = vsel %vm533_vm0, %v450_v23, 0.0  ;;  %v1962_v21 = vsel %vm533_vm0, %v497_v8, 0.0  ;;  %v529_v34 = vld [vmem:[%s10149_s0 + $0xfe0] sm:$0xff] }
 0x3c1   :  { %v5051_v25 = vrot.slane %v3024_v6, %v6859_v22  ;;  %v5056_v1 = vrot.slane %v3025_v43, %v6867_v27  ;;  %v2267_v47 = vpack.c.bf16 %v1709_v37, %v1706_v60 }
 0x3c3   :  { %v5052_v42 = vsel %vm3220_vm8, %v5051_v25, %v9280_v40  ;;  %v3038_v49 = vunpack.c.l.b16 %v2267_v47  ;;  %v3039_v16 = vunpack.c.h.b16 %v2267_v47  ;;  %1726 = vadd.xlane.f32.xlu1 %v1725_v46  ;;  %1723 = vadd.xlane.f32.xlu0 %v1722_v35  ;;  %v498_v40 = vld [vmem:[%s10149_s0 + $0xee8] sm:$0xff] }
 0x3c4   :  { %v9460_v26 = vsel %vm3227_vm9, %v5056_v1, %v5052_v42  ;;  %v1946_v58 = vpop.xlane.xlu1 %1945  ;;  %v1805_v50 = vpop.xlane.xlu0 %1804  ;;  %v1965_v54 = vsel %vm533_vm0, %v498_v40, 0.0  ;;  %v2058_v1 = vsel %vm533_vm0, %v529_v34, 0.0  ;;  %v355_v42 = vld [vmem:[%s10149_s0 + $0xa70] sm:$0xff] }
 0x3c5   :  { %v5120_v15 = vrot.slane %v3038_v49, %v6840_v2  ;;  %v5125_v24 = vrot.slane %v3039_v16, %v6853_v13  ;;  %v2283_v61 = vpack.c.bf16 %v1805_v50, %v1802_v38 }
 0x3c7   :  { %v5121_v51 = vsel %vm3206_vm6, %v5120_v15, %v9295_v62  ;;  %v3070_v10 = vunpack.c.l.b16 %v2283_v61  ;;  %v3071_v60 = vunpack.c.h.b16 %v2283_v61  ;;  %1822 = vadd.xlane.f32.xlu1 %v1821_v9  ;;  %1819 = vadd.xlane.f32.xlu0 %v1818_v11  ;;  %v530_v62 = vld [vmem:[%s10149_s0 + $0xfe8] sm:$0xff] }
 0x3c8   :  { %v9475_v63 = vsel %vm3213_vm7, %v5125_v24, %v5121_v51  ;;  %v2042_v12 = vpop.xlane.xlu1 %2041  ;;  %v1949_v57 = vpop.xlane.xlu0 %1948  ;;  %v2061_v25 = vsel %vm533_vm0, %v530_v62, 0.0  ;;  %v1536_v24 = vsel %vm533_vm0, %v355_v42, 0.0  ;;  %v387_v51 = vld [vmem:[%s10149_s0 + $0xb70] sm:$0xff] }
 0x3c9   :  { %v5278_v18 = vrot.slane %v3070_v10, %v6840_v2  ;;  %v5283_v36 = vrot.slane %v3071_v60, %v6853_v13  ;;  %v2307_v45 = vpack.c.bf16 %v1949_v57, %v1946_v58  ;;  %v6339_v57 = vld [vmem:[%s10150_s1 + $0x4] ss:$8 sps:$4 sm:$0xff]  }
 0x3ca   :  { %6083 = vmatprep.subr.bf16.mxu0 %v6339_v57 }
 0x3cb   :  { %v5279_v6 = vsel %vm3206_vm6, %v5278_v18, %v9310_v17  ;;  %v3118_v43 = vunpack.c.l.b16 %v2307_v45  ;;  %v3119_v38 = vunpack.c.h.b16 %v2307_v45  ;;  %1966 = vadd.xlane.f32.xlu1 %v1965_v54  ;;  %1963 = vadd.xlane.f32.xlu0 %v1962_v21  ;;  %v356_v17 = vld [vmem:[%s10149_s0 + $0xa78] sm:$0xff]  ;;  %v1632_v45 = vsel %vm533_vm0, %v387_v51, 0.0 }
 0x3cc   :  { %v9490_v37 = vsel %vm3213_vm7, %v5283_v36, %v5279_v6  ;;  %v1520_v46 = vpop.xlane.xlu1 %1519  ;;  %v2045_v35 = vpop.xlane.xlu0 %2044  ;;  %v1539_v15 = vsel %vm533_vm0, %v356_v17, 0.0  ;;  %v6350_v51 = vld [vmem:[%s10150_s1 + $0x114] ss:$8 sps:$4 sm:$0xff]  }
 0x3cd   :  { %v5515_v47 = vrot.slane %v3118_v43, %v6840_v2  ;;  %v5520_v23 = vrot.slane %v3119_v38, %v6853_v13  ;;  %v2323_v44 = vpack.c.bf16 %v2045_v35, %v2042_v12  ;;  %v436_v43 = vld [vmem:[%s10149_s0 + $0xcf8] sm:$0xff]  ;;  %v435_v38 = vld [vmem:[%s10149_s0 + $0xcf0] sm:$0xff] }
 0x3ce   :  { %v1779_v42 = vsel %vm533_vm0, %v436_v43, 0.0 }
 0x3cf   :  { %v5516_v49 = vsel %vm3206_vm6, %v5515_v47, %v9325_v32  ;;  %v3150_v16 = vunpack.c.l.b16 %v2323_v44  ;;  %v3151_v58 = vunpack.c.h.b16 %v2323_v44  ;;  %2062 = vadd.xlane.f32.xlu1 %v2061_v25  ;;  %2059 = vadd.xlane.f32.xlu0 %v2058_v1  ;;  %v388_v32 = vld [vmem:[%s10149_s0 + $0xb78] sm:$0xff]  ;;  %v6344_v47 = vld [vmem:[%s10150_s1 + $0x104] ss:$8 sps:$4 sm:$0xff]  }
 0x3d0   :  { %v9505_v50 = vsel %vm3213_vm7, %v5520_v23, %v5516_v49  ;;  %v1616_v9 = vpop.xlane.xlu1 %1615  ;;  %v1523_v11 = vpop.xlane.xlu0 %1522  ;;  %v1635_v36 = vsel %vm533_vm0, %v388_v32, 0.0  ;;  %v6342_v1 = vld [vmem:[%s10150_s1 + $0x14] ss:$8 sps:$4 sm:$0xff]   ;;  %v6346_v49 = vld [vmem:[%s10150_s1 + $0x10] ss:$8 sps:$4 sm:$0xff]   ;;  %6124 = vmatprep.subr.bf16.mxu1 %v6344_v47 }
 0x3d1   :  { %v5673_v61 = vrot.slane %v3150_v16, %v6840_v2  ;;  %v5678_v40 = vrot.slane %v3151_v58, %v6853_v13  ;;  %v2236_v8 = vpack.c.bf16 %v1523_v11, %v1520_v46  ;;  %v6347_v16 = vld [vmem:[%s10150_s1 + $0x100] ss:$8 sps:$4 sm:$0xff]   ;;  %v6348_v32 = vld [vmem:[%s10150_s1 + $0x24] ss:$8 sps:$4 sm:$0xff]  }
 0x3d2   :  { %6125 = vmatpush1.bf16.msra.mxu1 %v6347_v16 }
 0x3d3   :  { %v5674_v10 = vsel %vm3206_vm6, %v5673_v61, %v9340_v59  ;;  %v2976_v60 = vunpack.c.l.b16 %v2236_v8  ;;  %v2977_v12 = vunpack.c.h.b16 %v2236_v8  ;;  %1540 = vadd.xlane.f32.xlu1 %v1539_v15  ;;  %1537 = vadd.xlane.f32.xlu0 %v1536_v24  ;;  %v6341_v59 = vld [vmem:[%s10150_s1] ss:$8 sps:$4 sm:$0xff]   ;;  %v468_v15 = vld [vmem:[%s10149_s0 + $0xdf8] sm:$0xff]  ;;  %v467_v24 = vld [vmem:[%s10149_s0 + $0xdf0] sm:$0xff] }
 0x3d4   :  { %v9523_v54 = vsel %vm3213_vm7, %v5678_v40, %v5674_v10  ;;  %v1760_v21 = vpop.xlane.xlu1 %1759  ;;  %v1619_v18 = vpop.xlane.xlu0 %1618  ;;  %6084 = vmatpush1.bf16.msra.mxu0 %v6341_v59  ;;  %v1875_v57 = vsel %vm533_vm0, %v468_v15, 0.0  ;;  %6126 = vmatprep.subr.bf16.mxu1 %v6350_v51 }
 0x3d5   :  { %v4814_v62 = vrot.slane %v2976_v60, %v6859_v22  ;;  %v4819_v34 = vrot.slane %v2977_v12, %v6867_v27  ;;  %v2252_v6 = vpack.c.bf16 %v1619_v18, %v1616_v9  ;;  %6085 = vmatprep.subr.bf16.mxu0 %v6342_v1  ;;  %v6353_v18 = vld [vmem:[%s10150_s1 + $0x110] ss:$8 sps:$4 sm:$0xff]  }
 0x3d6   :  { %6127 = vmatpush1.bf16.msra.mxu1 %v6353_v18 }
 0x3d7   :  { %v4815_v46 = vsel %vm3220_vm8, %v4814_v62, %v9355_v7  ;;  %v3008_v35 = vunpack.c.l.b16 %v2252_v6  ;;  %v3009_v25 = vunpack.c.h.b16 %v2252_v6  ;;  %1636 = vadd.xlane.f32.xlu1 %v1635_v36  ;;  %1633 = vadd.xlane.f32.xlu0 %v1632_v45  ;;  %v1776_v7 = vsel %vm533_vm0, %v435_v38, 0.0  ;;  %v482_v62 = vld [vmem:[%s10149_s0 + $0xe68] sm:$0xff] }
 0x3d8   :  { %v9547_v23 = vsel %vm3227_vm9, %v4819_v34, %v4815_v46  ;;  %v1856_v44 = vpop.xlane.xlu1 %1855  ;;  %v1763_v17 = vpop.xlane.xlu0 %1762  ;;  %6086 = vmatpush1.bf16.msra.mxu0 %v6346_v49  ;;  %v481_v34 = vld [vmem:[%s10149_s0 + $0xe60] sm:$0xff]  ;;  %v6354_v46 = vld [vmem:[%s10150_s1 + $0x34] ss:$8 sps:$4 sm:$0xff]  }
 0x3d9   :  { %v4972_v58 = vrot.slane %v3008_v35, %v6859_v22  ;;  %v4977_v9 = vrot.slane %v3009_v25, %v6867_v27  ;;  %v2276_v11 = vpack.c.bf16 %v1763_v17, %v1760_v21  ;;  %v6352_v21 = vld [vmem:[%s10150_s1 + $0x20] ss:$8 sps:$4 sm:$0xff]   ;;  %6087 = vmatprep.subr.bf16.mxu0 %v6348_v32  ;;  %v6356_v35 = vld [vmem:[%s10150_s1 + $0x124] ss:$8 sps:$4 sm:$0xff]   ;;  %v6358_v17 = vld [vmem:[%s10150_s1 + $0x30] ss:$8 sps:$4 sm:$0xff]  }
 0x3da   :  { %6128 = vmatprep.subr.bf16.mxu1 %v6356_v35 }
 0x3db   :  { %v4973_v61 = vsel %vm3220_vm8, %v4972_v58, %v9370_v39  ;;  %v3056_v40 = vunpack.c.l.b16 %v2276_v11  ;;  %v3057_v8 = vunpack.c.h.b16 %v2276_v11  ;;  %1780 = vadd.xlane.f32.xlu1 %v1779_v42  ;;  %1777 = vadd.xlane.f32.xlu0 %v1776_v7  ;;  %v1872_v39 = vsel %vm533_vm0, %v467_v24, 0.0  ;;  %v6359_v42 = vld [vmem:[%s10150_s1 + $0x120] ss:$8 sps:$4 sm:$0xff]  }
 0x3dc   :  { %v9574_v10 = vsel %vm3227_vm9, %v4977_v9, %v4973_v61  ;;  %v1898_v60 = vpop.xlane.xlu1 %1897  ;;  %v1859_v12 = vpop.xlane.xlu0 %1858  ;;  %6088 = vmatpush1.bf16.msra.mxu0 %v6352_v21  ;;  %v514_v58 = vld [vmem:[%s10149_s0 + $0xf68] sm:$0xff]  ;;  %v513_v9 = vld [vmem:[%s10149_s0 + $0xf60] sm:$0xff]  ;;  %6129 = vmatpush1.bf16.msra.mxu1 %v6359_v42 }
 0x3dd   :  { %v5209_v36 = vrot.slane %v3056_v40, %v6859_v22  ;;  %v5214_v45 = vrot.slane %v3057_v8, %v6867_v27  ;;  %v2292_v59 = vpack.c.bf16 %v1859_v12, %v1856_v44  ;;  %v1917_v44 = vsel %vm533_vm0, %v482_v62, 0.0  ;;  %6089 = vmatprep.subr.bf16.mxu0 %v6354_v46  ;;  %v6360_v61 = vld [vmem:[%s10150_s1 + $0x44] ss:$8 sps:$4 sm:$0xff]   ;;  %v6362_v40 = vld [vmem:[%s10150_s1 + $0x134] ss:$8 sps:$4 sm:$0xff]  }
 0x3de   :  { %v6364_v12 = vld [vmem:[%s10150_s1 + $0x40] ss:$8 sps:$4 sm:$0xff]   ;;  %6130 = vmatprep.subr.bf16.mxu1 %v6362_v40 }
 0x3df   :  { %v5210_v6 = vsel %vm3220_vm8, %v5209_v36, %v9385_v0  ;;  %v3088_v43 = vunpack.c.l.b16 %v2292_v59  ;;  %v3089_v38 = vunpack.c.h.b16 %v2292_v59  ;;  %1876 = vadd.xlane.f32.xlu1 %v1875_v57  ;;  %1873 = vadd.xlane.f32.xlu0 %v1872_v39  ;;  %v1914_v0 = vsel %vm533_vm0, %v481_v34, 0.0  ;;  %v6365_v57 = vld [vmem:[%s10150_s1 + $0x130] ss:$8 sps:$4 sm:$0xff]   ;;  %v6376_v40 = vld [vmem:[%s10150_s1 + $0x60] ss:$8 sps:$4 sm:$0xff]  }
 0x3e0   :  { %v9601_v25 = vsel %vm3227_vm9, %v5214_v45, %v5210_v6  ;;  %v1994_v1 = vpop.xlane.xlu1 %1993  ;;  %v1901_v47 = vpop.xlane.xlu0 %1900  ;;  %6090 = vmatpush1.bf16.msra.mxu0 %v6358_v17  ;;  %v420_v36 = vld [vmem:[%s10149_s0 + $0xc78] sm:$0xff]  ;;  %v419_v45 = vld [vmem:[%s10149_s0 + $0xc70] sm:$0xff]  ;;  %6131 = vmatpush1.bf16.msra.mxu1 %v6365_v57 }
 0x3e1   :  { %v5367_v7 = vrot.slane %v3088_v43, %v6859_v22  ;;  %v5372_v49 = vrot.slane %v3089_v38, %v6867_v27  ;;  %v2299_v16 = vpack.c.bf16 %v1901_v47, %v1898_v60  ;;  %v2013_v60 = vsel %vm533_vm0, %v514_v58, 0.0  ;;  %6091 = vmatprep.subr.bf16.mxu0 %v6360_v61  ;;  %v6366_v6 = vld [vmem:[%s10150_s1 + $0x54] ss:$8 sps:$4 sm:$0xff]   ;;  %v6368_v43 = vld [vmem:[%s10150_s1 + $0x144] ss:$8 sps:$4 sm:$0xff]  }
 0x3e2   :  { %v6370_v47 = vld [vmem:[%s10150_s1 + $0x50] ss:$8 sps:$4 sm:$0xff]   ;;  %6132 = vmatprep.subr.bf16.mxu1 %v6368_v43 }
 0x3e3   :  { %v5368_v11 = vsel %vm3220_vm8, %v5367_v7, %v9400_v29  ;;  %v3102_v15 = vunpack.c.l.b16 %v2299_v16  ;;  %v3103_v24 = vunpack.c.h.b16 %v2299_v16  ;;  %1918 = vadd.xlane.f32.xlu1 %v1917_v44  ;;  %1915 = vadd.xlane.f32.xlu0 %v1914_v0  ;;  %v2010_v29 = vsel %vm533_vm0, %v513_v9, 0.0  ;;  %v6371_v44 = vld [vmem:[%s10150_s1 + $0x140] ss:$8 sps:$4 sm:$0xff]   ;;  %v452_v7 = vld [vmem:[%s10149_s0 + $0xd78] sm:$0xff]  ;;  %v499_v57 = vld [vmem:[%s10149_s0 + $0xef0] sm:$0xff] }
 0x3e4   :  { %v9628_v8 = vsel %vm3227_vm9, %v5372_v49, %v5368_v11  ;;  %v1574_v32 = vpop.xlane.xlu1 %1573  ;;  %v1997_v51 = vpop.xlane.xlu0 %1996  ;;  %6092 = vmatpush1.bf16.msra.mxu0 %v6364_v12  ;;  %v451_v49 = vld [vmem:[%s10149_s0 + $0xd70] sm:$0xff]  ;;  %6133 = vmatpush1.bf16.msra.mxu1 %v6371_v44  ;;  %v1827_v61 = vsel %vm533_vm0, %v452_v7, 0.0  ;;  %v500_v12 = vld [vmem:[%s10149_s0 + $0xef8] sm:$0xff]  ;;  %v6384_v7 = vld [vmem:[%s10150_s1 + $0x84] ss:$8 sps:$4 sm:$0xff]  }
 0x3e5   :  { %v5436_v39 = vrot.slane %v3102_v15, %v6840_v2  ;;  %v5441_v21 = vrot.slane %v3103_v24, %v6853_v13  ;;  %v2315_v18 = vpack.c.bf16 %v1997_v51, %v1994_v1  ;;  %v1731_v1 = vsel %vm533_vm0, %v420_v36, 0.0  ;;  %6093 = vmatprep.subr.bf16.mxu0 %v6366_v6  ;;  %v6374_v9 = vld [vmem:[%s10150_s1 + $0x154] ss:$8 sps:$4 sm:$0xff]   ;;  %v6382_v43 = vld [vmem:[%s10150_s1 + $0x70] ss:$8 sps:$4 sm:$0xff]  }
 0x3e6   :  { %6134 = vmatprep.subr.bf16.mxu1 %v6374_v9  ;;  %v6378_v36 = vld [vmem:[%s10150_s1 + $0x74] ss:$8 sps:$4 sm:$0xff]   ;;  %v1971_v6 = vsel %vm533_vm0, %v500_v12, 0.0  ;;  %v6388_v9 = vld [vmem:[%s10150_s1 + $0x80] ss:$8 sps:$4 sm:$0xff]  }
 0x3e7   :  { %v5437_v59 = vsel %vm3206_vm6, %v5436_v39, %v9415_v14  ;;  %v3134_v62 = vunpack.c.l.b16 %v2315_v18  ;;  %v3135_v34 = vunpack.c.h.b16 %v2315_v18  ;;  %2014 = vadd.xlane.f32.xlu1 %v2013_v60  ;;  %2011 = vadd.xlane.f32.xlu0 %v2010_v29  ;;  %v1728_v14 = vsel %vm533_vm0, %v419_v45, 0.0  ;;  %v6380_v45 = vld [vmem:[%s10150_s1 + $0x164] ss:$8 sps:$4 sm:$0xff]   ;;  %v531_v44 = vld [vmem:[%s10149_s0 + $0xff0] sm:$0xff] }
 0x3e8   :  { %v9655_v38 = vsel %vm3213_vm7, %v5441_v21, %v5437_v59  ;;  %v1670_v46 = vpop.xlane.xlu1 %1669  ;;  %v1577_v35 = vpop.xlane.xlu0 %1576  ;;  %6094 = vmatpush1.bf16.msra.mxu0 %v6370_v47  ;;  %v532_v47 = vld [vmem:[%s10149_s0 + $0xff8] sm:$0xff] }
 0x3e9   :  { %v5594_v0 = vrot.slane %v3134_v62, %v6840_v2  ;;  %v5599_v17 = vrot.slane %v3135_v34, %v6853_v13  ;;  %v2245_v42 = vpack.c.bf16 %v1577_v35, %v1574_v32  ;;  %v6372_v13 = vld [vmem:[%s10150_s1 + $0x64] ss:$8 sps:$4 sm:$0xff]   ;;  %v6377_v32 = vld [vmem:[%s10150_s1 + $0x150] ss:$8 sps:$4 sm:$0xff]   ;;  %v6390_v12 = vld [vmem:[%s10150_s1 + $0x94] ss:$8 sps:$4 sm:$0xff]  }
 0x3ea   :  { %6095 = vmatprep.subr.bf16.mxu0 %v6372_v13  ;;  %6135 = vmatpush1.bf16.msra.mxu1 %v6377_v32  ;;  %v2067_v13 = vsel %vm533_vm0, %v532_v47, 0.0  ;;  %v483_v32 = vld [vmem:[%s10149_s0 + $0xe70] sm:$0xff]  ;;  %v6396_v47 = vld [vmem:[%s10150_s1 + $0xa4] ss:$8 sps:$4 sm:$0xff]  }
 0x3eb   :  { %v5595_v16 = vsel %vm3206_vm6, %v5594_v0, %v9430_v52  ;;  %v2994_v58 = vunpack.c.l.b16 %v2245_v42  ;;  %v2995_v2 = vunpack.c.h.b16 %v2245_v42  ;;  %1732 = vadd.xlane.f32.xlu1 %v1731_v1  ;;  %1729 = vadd.xlane.f32.xlu0 %v1728_v14  ;;  %v1824_v52 = vsel %vm533_vm0, %v451_v49, 0.0  ;;  %v6386_v49 = vld [vmem:[%s10150_s1 + $0x174] ss:$8 sps:$4 sm:$0xff]   ;;  %vm10187_vm6 = vmmov %vm10180_vm11 }
 0x3ec   :  { %v9682_v11 = vsel %vm3213_vm7, %v5599_v17, %v5595_v16  ;;  %v1712_v15 = vpop.xlane.xlu1 %1711  ;;  %v1673_v24 = vpop.xlane.xlu0 %1672  ;;  %6096 = vmatpush1.bf16.msra.mxu0 %v6376_v40  ;;  %6136 = vmatprep.subr.bf16.mxu1 %v6380_v45  ;;  %v484_v40 = vld [vmem:[%s10149_s0 + $0xe78] sm:$0xff]  ;;  %vm10188_vm7 = vmmov %vm10187_vm6 }
 0x3ed   :  { %v4903_v51 = vrot.slane %v2994_v58, %v6885_v48  ;;  %v4908_v60 = vrot.slane %v2995_v2, %v6895_v56  ;;  %v2261_v29 = vpack.c.bf16 %v1673_v24, %v1670_v46  ;;  %v6383_v46 = vld [vmem:[%s10150_s1 + $0x160] ss:$8 sps:$4 sm:$0xff]   ;;  %6097 = vmatprep.subr.bf16.mxu0 %v6378_v36  ;;  %v1923_v36 = vsel %vm533_vm0, %v484_v40, 0.0  ;;  %v6394_v45 = vld [vmem:[%s10150_s1 + $0x90] ss:$8 sps:$4 sm:$0xff]  }
 0x3ee   :  { %6137 = vmatpush1.bf16.msra.mxu1 %v6383_v46  ;;  %v515_v46 = vld [vmem:[%s10149_s0 + $0xf70] sm:$0xff] }
 0x3ef   :  { %v4904_v39 = vsel %vm3234_vm10, %v4903_v51, %v9445_v30  ;;  %v3026_v21 = vunpack.c.l.b16 %v2261_v29  ;;  %v3027_v18 = vunpack.c.h.b16 %v2261_v29  ;;  %1828 = vadd.xlane.f32.xlu1 %v1827_v61  ;;  %1825 = vadd.xlane.f32.xlu0 %v1824_v52  ;;  %v1968_v30 = vsel %vm533_vm0, %v499_v57, 0.0  ;;  %v6392_v57 = vld [vmem:[%s10150_s1 + $0x184] ss:$8 sps:$4 sm:$0xff]  }
 0x3f0   :  { %v9709_v59 = vsel %vm10181_vm1, %v4908_v60, %v4904_v39  ;;  %v1808_v62 = vpop.xlane.xlu1 %1807  ;;  %v1715_v34 = vpop.xlane.xlu0 %1714  ;;  %6098 = vmatpush1.bf16.msra.mxu0 %v6382_v43  ;;  %6138 = vmatprep.subr.bf16.mxu1 %v6386_v49  ;;  %v516_v43 = vld [vmem:[%s10149_s0 + $0xf78] sm:$0xff]  ;;  %v6400_v49 = vld [vmem:[%s10150_s1 + $0xa0] ss:$8 sps:$4 sm:$0xff]  }
 0x3f1   :  { %v5061_v35 = vrot.slane %v3026_v21, %v6885_v48  ;;  %v5066_v1 = vrot.slane %v3027_v18, %v6895_v56  ;;  %v2268_v14 = vpack.c.bf16 %v1715_v34, %v1712_v15  ;;  %v6389_v15 = vld [vmem:[%s10150_s1 + $0x170] ss:$8 sps:$4 sm:$0xff]   ;;  %6099 = vmatprep.subr.bf16.mxu0 %v6384_v7  ;;  %v2019_v7 = vsel %vm533_vm0, %v516_v43, 0.0 }
 0x3f2   :  { %6139 = vmatpush1.bf16.msra.mxu1 %v6389_v15 }
 0x3f3   :  { %v5062_v0 = vsel %vm3234_vm10, %v5061_v35, %v9460_v26  ;;  %v3040_v17 = vunpack.c.l.b16 %v2268_v14  ;;  %v3041_v42 = vunpack.c.h.b16 %v2268_v14  ;;  %1972 = vadd.xlane.f32.xlu1 %v1971_v6  ;;  %1969 = vadd.xlane.f32.xlu0 %v1968_v30  ;;  %v2064_v26 = vsel %vm533_vm0, %v531_v44, 0.0  ;;  %v6398_v44 = vld [vmem:[%s10150_s1 + $0x194] ss:$8 sps:$4 sm:$0xff]  }
 0x3f4   :  { %v9736_v16 = vsel %vm10182_vm2, %v5066_v1, %v5062_v0  ;;  %v1952_v58 = vpop.xlane.xlu1 %1951  ;;  %v1811_v2 = vpop.xlane.xlu0 %1810  ;;  %6100 = vmatpush1.bf16.msra.mxu0 %v6388_v9  ;;  %6140 = vmatprep.subr.bf16.mxu1 %v6392_v57  ;;  %vm10193_vm2 = vmmov %vm10187_vm6 }
 0x3f5   :  { %v5130_v24 = vrot.slane %v3040_v17, %v6859_v22  ;;  %v5135_v61 = vrot.slane %v3041_v42, %v6867_v27  ;;  %v2284_v52 = vpack.c.bf16 %v1811_v2, %v1808_v62  ;;  %v6395_v62 = vld [vmem:[%s10150_s1 + $0x180] ss:$8 sps:$4 sm:$0xff]   ;;  %6101 = vmatprep.subr.bf16.mxu0 %v6390_v12 }
 0x3f6   :  { %6141 = vmatpush1.bf16.msra.mxu1 %v6395_v62 }
 0x3f7   :  { %v5131_v51 = vsel %vm3220_vm8, %v5130_v24, %v9475_v63  ;;  %v3072_v60 = vunpack.c.l.b16 %v2284_v52  ;;  %v3073_v29 = vunpack.c.h.b16 %v2284_v52  ;;  %2068 = vadd.xlane.f32.xlu1 %v2067_v13  ;;  %2065 = vadd.xlane.f32.xlu0 %v2064_v26  ;;  %v1920_v63 = vsel %vm533_vm0, %v483_v32, 0.0  ;;  %v6404_v52 = vld [vmem:[%s10150_s1 + $0x1a4] ss:$8 sps:$4 sm:$0xff]  }
 0x3f8   :  { %v9763_v39 = vsel %vm3227_vm9, %v5135_v61, %v5131_v51  ;;  %v2048_v21 = vpop.xlane.xlu1 %2047  ;;  %v1955_v18 = vpop.xlane.xlu0 %1954  ;;  %6102 = vmatpush1.bf16.msra.mxu0 %v6394_v45  ;;  %6142 = vmatprep.subr.bf16.mxu1 %v6398_v44  ;;  %v6402_v61 = vld [vmem:[%s10150_s1 + $0xb4] ss:$8 sps:$4 sm:$0xff]  }
 0x3f9   :  { %v5288_v34 = vrot.slane %v3072_v60, %v6859_v22  ;;  %v5293_v6 = vrot.slane %v3073_v29, %v6867_v27  ;;  %v2308_v30 = vpack.c.bf16 %v1955_v18, %v1952_v58  ;;  %v6401_v58 = vld [vmem:[%s10150_s1 + $0x190] ss:$8 sps:$4 sm:$0xff]   ;;  %6103 = vmatprep.subr.bf16.mxu0 %v6396_v47  ;;  %v6407_v60 = vld [vmem:[%s10150_s1 + $0x1a0] ss:$8 sps:$4 sm:$0xff]   ;;  %v6410_v45 = vld [vmem:[%s10150_s1 + $0x1b4] ss:$8 sps:$4 sm:$0xff]  }
 0x3fa   :  { %6143 = vmatpush1.bf16.msra.mxu1 %v6401_v58  ;;  %v6414_v44 = vld [vmem:[%s10150_s1 + $0xd4] ss:$8 sps:$4 sm:$0xff]  }
 0x3fb   :  { %v5289_v35 = vsel %vm3220_vm8, %v5288_v34, %v9490_v37  ;;  %v3120_v1 = vunpack.c.l.b16 %v2308_v30  ;;  %v3121_v14 = vunpack.c.h.b16 %v2308_v30  ;;  %1924 = vadd.xlane.f32.xlu1 %v1923_v36  ;;  %1921 = vadd.xlane.f32.xlu0 %v1920_v63  ;;  %v2016_v37 = vsel %vm533_vm0, %v515_v46, 0.0  ;;  %v6408_v63 = vld [vmem:[%s10150_s1 + $0xc4] ss:$8 sps:$4 sm:$0xff]   ;;  %v6412_v30 = vld [vmem:[%s10150_s1 + $0xc0] ss:$8 sps:$4 sm:$0xff]   ;;  %vm10183_vm0 = vmmov %vm10181_vm1 }
 0x3fc   :  { %v9790_v0 = vsel %vm3227_vm9, %v5293_v6, %v5289_v35  ;;  %v1526_v17 = vpop.xlane.xlu1 %1525  ;;  %v2051_v42 = vpop.xlane.xlu0 %2050  ;;  %6104 = vmatpush1.bf16.msra.mxu0 %v6400_v49  ;;  %6144 = vmatprep.subr.bf16.mxu1 %v6404_v52  ;;  %v6418_v49 = vld [vmem:[%s10150_s1 + $0xd0] ss:$8 sps:$4 sm:$0xff]   ;;  %vm10184_vm3 = vmmov %vm10183_vm0 }
 0x3fd   :  { %v5525_v2 = vrot.slane %v3120_v1, %v6859_v22  ;;  %v5530_v13 = vrot.slane %v3121_v14, %v6867_v27  ;;  %v2324_v26 = vpack.c.bf16 %v2051_v42, %v2048_v21  ;;  %6105 = vmatprep.subr.bf16.mxu0 %v6402_v61  ;;  %v6422_v61 = vld [vmem:[%s10150_s1 + $0x1d4] ss:$8 sps:$4 sm:$0xff]   ;;  %vm10185_vm4 = vmmov %vm10183_vm0 }
 0x3fe   :  { %6145 = vmatpush1.bf16.msra.mxu1 %v6407_v60  ;;  %vm10186_vm5 = vmmov %vm10183_vm0 }
 0x3ff   :  { %v5526_v9 = vsel %vm3220_vm8, %v5525_v2, %v9505_v50  ;;  %v3152_v15 = vunpack.c.l.b16 %v2324_v26  ;;  %v3153_v24 = vunpack.c.h.b16 %v2324_v26  ;;  %2020 = vadd.xlane.f32.xlu1 %v2019_v7  ;;  %2017 = vadd.xlane.f32.xlu0 %v2016_v37  ;;  %v6406_v50 = vld [vmem:[%s10150_s1 + $0xb0] ss:$8 sps:$4 sm:$0xff]   ;;  %vm10191_vm11 = vmmov %vm10183_vm0 }
 0x400   :  { %v9811_v40 = vsel %vm3227_vm9, %v5530_v13, %v5526_v9  ;;  %v1622_v32 = vpop.xlane.xlu1 %1621  ;;  %v1529_v51 = vpop.xlane.xlu0 %1528  ;;  %6106 = vmatpush1.bf16.msra.mxu0 %v6406_v50  ;;  %6146 = vmatprep.subr.bf16.mxu1 %v6410_v45  ;;  %v6424_v50 = vld [vmem:[%s10150_s1 + $0xe0] ss:$8 sps:$4 sm:$0xff]   ;;  %vm10192_vm1 = vmmov %vm10183_vm0 }
 0x401   :  { %v5683_v29 = vrot.slane %v3152_v15, %v6859_v22  ;;  %v5688_v12 = vrot.slane %v3153_v24, %v6867_v27  ;;  %v2237_v57 = vpack.c.bf16 %v1529_v51, %v1526_v17  ;;  %6107 = vmatprep.subr.bf16.mxu0 %v6408_v63  ;;  %v6416_v17 = vld [vmem:[%s10150_s1 + $0x1c4] ss:$8 sps:$4 sm:$0xff]  }
 0x402   :  { %v6420_v24 = vld [vmem:[%s10150_s1 + $0xe4] ss:$8 sps:$4 sm:$0xff]  }
 0x403   :  { %v5684_v21 = vsel %vm3220_vm8, %v5683_v29, %v9523_v54  ;;  %v2978_v18 = vunpack.c.l.b16 %v2237_v57  ;;  %v2979_v36 = vunpack.c.h.b16 %v2237_v57  ;;  %v6413_v54 = vld [vmem:[%s10150_s1 + $0x1b0] ss:$8 sps:$4 sm:$0xff]   ;;  %v6428_v63 = vld [vmem:[%s10150_s1 + $0x1e4] ss:$8 sps:$4 sm:$0xff]  }
 0x404   :  { %v9830_v62 = vsel %vm3227_vm9, %v5688_v12, %v5684_v21  ;;  %v1766_v34 = vpop.xlane.xlu1 %1765  ;;  %v1625_v6 = vpop.xlane.xlu0 %1624  ;;  %6108 = vmatpush1.bf16.msra.mxu0 %v6412_v30  ;;  %6147 = vmatpush1.bf16.msra.mxu1 %v6413_v54  ;;  %v6430_v30 = vld [vmem:[%s10150_s1 + $0xf0] ss:$8 sps:$4 sm:$0xff]  }
 0x405   :  { %v4824_v43 = vrot.slane %v2978_v18, %v6885_v48  ;;  %v4829_v46 = vrot.slane %v2979_v36, %v6895_v56  ;;  %v2253_v35 = vpack.c.bf16 %v1625_v6, %v1622_v32  ;;  %6109 = vmatprep.subr.bf16.mxu0 %v6414_v44  ;;  %6148 = vmatprep.subr.bf16.mxu1 %v6416_v17  ;;  %v6426_v36 = vld [vmem:[%s10150_s1 + $0xf4] ss:$8 sps:$4 sm:$0xff]  }
 0x407   :  { %v4825_v1 = vsel %vm3234_vm10, %v4824_v43, %v9547_v23  ;;  %v3010_v14 = vunpack.c.l.b16 %v2253_v35  ;;  %v3011_v47 = vunpack.c.h.b16 %v2253_v35  ;;  %v6419_v23 = vld [vmem:[%s10150_s1 + $0x1c0] ss:$8 sps:$4 sm:$0xff]  }
 0x408   :  { %v9849_v42 = vsel %vm10183_vm0, %v4829_v46, %v4825_v1  ;;  %v1862_v7 = vpop.xlane.xlu1 %1861  ;;  %v1769_v37 = vpop.xlane.xlu0 %1768  ;;  %6110 = vmatpush1.bf16.msra.mxu0 %v6418_v49  ;;  %6149 = vmatpush1.bf16.msra.mxu1 %v6419_v23 }
 0x409   :  { %v4982_v58 = vrot.slane %v3010_v14, %v6885_v48  ;;  %v4987_v2 = vrot.slane %v3011_v47, %v6895_v56  ;;  %v2277_v13 = vpack.c.bf16 %v1769_v37, %v1766_v34  ;;  %6111 = vmatprep.subr.bf16.mxu0 %v6420_v24  ;;  %6150 = vmatprep.subr.bf16.mxu1 %v6422_v61  ;;  %v6432_v47 = vld [vmem:[%s10150_s1 + $0x1f4] ss:$8 sps:$4 sm:$0xff]   ;;  %v6434_v37 = vld [vmem:[%s10150_s1 + $0x1f0] ss:$8 sps:$4 sm:$0xff]  }
 0x40b   :  { %v4983_v26 = vsel %vm3234_vm10, %v4982_v58, %v9574_v10  ;;  %v3058_v9 = vunpack.c.l.b16 %v2277_v13  ;;  %v3059_v15 = vunpack.c.h.b16 %v2277_v13  ;;  %v6425_v10 = vld [vmem:[%s10150_s1 + $0x1d0] ss:$8 sps:$4 sm:$0xff]  }
 0x40c   :  { %v9868_v52 = vsel %vm10184_vm3, %v4987_v2, %v4983_v26  ;;  %v1904_v32 = vpop.xlane.xlu1 %1903  ;;  %v1865_v51 = vpop.xlane.xlu0 %1864  ;;  %6112 = vmatpush1.bf16.msra.mxu0 %v6424_v50  ;;  %6151 = vmatpush1.bf16.msra.mxu1 %v6425_v10 }
 0x40d   :  { %v5219_v60 = vrot.slane %v3058_v9, %v6885_v48  ;;  %v5224_v29 = vrot.slane %v3059_v15, %v6895_v56  ;;  %v2293_v12 = vpack.c.bf16 %v1865_v51, %v1862_v7  ;;  %6113 = vmatprep.subr.bf16.mxu0 %v6426_v36  ;;  %6152 = vmatprep.subr.bf16.mxu1 %v6428_v63 }
 0x40f   :  { %v5220_v57 = vsel %vm3234_vm10, %v5219_v60, %v9601_v25  ;;  %v3090_v21 = vunpack.c.l.b16 %v2293_v12  ;;  %v3091_v18 = vunpack.c.h.b16 %v2293_v12  ;;  %v6431_v25 = vld [vmem:[%s10150_s1 + $0x1e0] ss:$8 sps:$4 sm:$0xff]  }
 0x410   :  { %v9887_v45 = vsel %vm10185_vm4, %v5224_v29, %v5220_v57  ;;  %v2000_v34 = vpop.xlane.xlu1 %1999  ;;  %v1907_v6 = vpop.xlane.xlu0 %1906  ;;  %6114 = vmatpush1.bf16.msra.mxu0 %v6430_v30  ;;  %6153 = vmatpush1.bf16.msra.mxu1 %v6431_v25  ;;  %vm10197_vm4 = vmmov %vm10192_vm1 }
 0x411   :  { %v5377_v54 = vrot.slane %v3090_v21, %v6885_v48  ;;  %v5382_v43 = vrot.slane %v3091_v18, %v6895_v56  ;;  %v2300_v46 = vpack.c.bf16 %v1907_v6, %v1904_v32  ;;  %6154 = vmatprep.subr.bf16.mxu1 %v6432_v47 }
 0x413   :  { %v5378_v35 = vsel %vm3234_vm10, %v5377_v54, %v9628_v8  ;;  %v3104_v1 = vunpack.c.l.b16 %v2300_v46  ;;  %v3105_v14 = vunpack.c.h.b16 %v2300_v46 }
 0x414   :  { %v9903_v44 = vsel %vm10186_vm5, %v5382_v43, %v5378_v35  ;;  %v1580_v17 = vpop.xlane.xlu1 %1579  ;;  %v2003_v7 = vpop.xlane.xlu0 %2002  ;;  %6155 = vmatpush1.bf16.msra.mxu1 %v6434_v37  ;;  %vm10198_vm5 = vmmov %vm10192_vm1 }
 0x415   :  { %v5446_v49 = vrot.slane %v3104_v1, %v6859_v22  ;;  %v5451_v23 = vrot.slane %v3105_v14, %v6867_v27  ;;  %v2316_v8 = vpack.c.bf16 %v2003_v7, %v2000_v34 }
 0x417   :  { %v5447_v58 = vsel %vm3220_vm8, %v5446_v49, %v9655_v38  ;;  %v3136_v2 = vunpack.c.l.b16 %v2316_v8  ;;  %v3137_v13 = vunpack.c.h.b16 %v2316_v8 }
 0x418   :  { %v9913_v26 = vsel %vm3227_vm9, %v5451_v23, %v5447_v58  ;;  %v1676_v9 = vpop.xlane.xlu1 %1675  ;;  %v1583_v15 = vpop.xlane.xlu0 %1582 }
 0x419   :  { %v5604_v24 = vrot.slane %v3136_v2, %v6859_v22  ;;  %v5609_v61 = vrot.slane %v3137_v13, %v6867_v27  ;;  %v2246_v32 = vpack.c.bf16 %v1583_v15, %v1580_v17 }
 0x41b   :  { %v5605_v51 = vsel %vm3220_vm8, %v5604_v24, %v9682_v11  ;;  %v2996_v50 = vunpack.c.l.b16 %v2246_v32  ;;  %v2997_v10 = vunpack.c.h.b16 %v2246_v32  ;;  %vm10189_vm8 = vmmov %vm10183_vm0 }
 0x41c   :  { %v9920_v60 = vsel %vm3227_vm9, %v5609_v61, %v5605_v51  ;;  %v1718_v38 = vpop.xlane.xlu1 %1717  ;;  %v1679_v29 = vpop.xlane.xlu0 %1678  ;;  %vm10190_vm9 = vmmov %vm10183_vm0 }
 0x41d   :  { %v4913_v12 = vrot.slane %v2996_v50, %v6902_v3  ;;  %v4918_v57 = vrot.slane %v2997_v10, %v6905_v4  ;;  %v2262_v21 = vpack.c.bf16 %v1679_v29, %v1676_v9  ;;  %vm10195_vm0 = vmmov %vm10193_vm2 }
 0x41e   :  { %vm10196_vm3 = vmmov %vm10195_vm0 }
 0x41f   :  { %v4914_v22 = vsel %vm3248_vm12, %v4913_v12, %v9709_v59  ;;  %v3028_v27 = vunpack.c.l.b16 %v2262_v21  ;;  %v3029_v18 = vunpack.c.h.b16 %v2262_v21 }
 0x420   :  { %v9927_v36 = vsel %vm10187_vm6, %v4918_v57, %v4914_v22  ;;  %v1814_v11 = vpop.xlane.xlu1 %1813  ;;  %v1721_v63 = vpop.xlane.xlu0 %1720  ;;  %vm5728_vm6 = vcmask 1045509  }
 0x421   :  { %v5071_v34 = vrot.slane %v3028_v27, %v6902_v3  ;;  %v5076_v6 = vrot.slane %v3029_v18, %v6905_v4  ;;  %v2269_v30 = vpack.c.bf16 %v1721_v63, %v1718_v38 }
 0x423   :  { %v5072_v25 = vsel %vm3248_vm12, %v5071_v34, %v9736_v16  ;;  %v3042_v54 = vunpack.c.l.b16 %v2269_v30  ;;  %v3043_v43 = vunpack.c.h.b16 %v2269_v30 }
 0x424   :  { %v9934_v46 = vsel %vm10188_vm7, %v5076_v6, %v5072_v25  ;;  %v1958_v59 = vpop.xlane.xlu1 %1957  ;;  %v1817_v35 = vpop.xlane.xlu0 %1816  ;;  %vm10199_vm7 = vmmov %vm10195_vm0 }
 0x425   :  { %v5140_v1 = vrot.slane %v3042_v54, %v6885_v48  ;;  %v5145_v14 = vrot.slane %v3043_v43, %v6895_v56  ;;  %v2285_v47 = vpack.c.bf16 %v1817_v35, %v1814_v11 }
 0x427   :  { %v5141_v17 = vsel %vm3234_vm10, %v5140_v1, %v9763_v39  ;;  %v3074_v7 = vunpack.c.l.b16 %v2285_v47  ;;  %v3075_v37 = vunpack.c.h.b16 %v2285_v47 }
 0x428   :  { %v9941_v49 = vsel %vm10189_vm8, %v5145_v14, %v5141_v17  ;;  %v2054_v16 = vpop.xlane.xlu1 %2053  ;;  %v1961_v23 = vpop.xlane.xlu0 %1960  ;;  %vm10200_vm8 = vmmov %vm10195_vm0 }
 0x429   :  { %v5298_v8 = vrot.slane %v3074_v7, %v6885_v48  ;;  %v5303_v58 = vrot.slane %v3075_v37, %v6895_v56  ;;  %v2309_v2 = vpack.c.bf16 %v1961_v23, %v1958_v59 }
 0x42b   :  { %v5299_v13 = vsel %vm3234_vm10, %v5298_v8, %v9790_v0  ;;  %v3122_v9 = vunpack.c.l.b16 %v2309_v2  ;;  %v3123_v15 = vunpack.c.h.b16 %v2309_v2 }
 0x42c   :  { %v9948_v24 = vsel %vm10190_vm9, %v5303_v58, %v5299_v13  ;;  %v1493_v39 = vpop.xlane.xlu1 %1492  ;;  %v2057_v61 = vpop.xlane.xlu0 %2056  ;;  %vm10201_vm9 = vmmov %vm10195_vm0 }
 0x42d   :  { %v5535_v32 = vrot.slane %v3122_v9, %v6885_v48  ;;  %v5540_v51 = vrot.slane %v3123_v15, %v6895_v56  ;;  %v2231_v50 = vpack.c.bf16 %v1493_v39, %v8798_v33  ;;  %v2325_v10 = vpack.c.bf16 %v2057_v61, %v2054_v16 }
 0x42f   :  { %v5536_v38 = vsel %vm3234_vm10, %v5535_v32, %v9811_v40  ;;  %v2966_v29 = vunpack.c.l.b16 %v2231_v50  ;;  %v2967_v12 = vunpack.c.h.b16 %v2231_v50  ;;  %v3154_v0 = vunpack.c.l.b16 %v2325_v10 }
 0x430   :  { %v9956_v57 = vsel %vm10191_vm11, %v5540_v51, %v5536_v38  ;;  %v3155_v21 = vunpack.c.h.b16 %v2325_v10  ;;  %v1535_v22 = vpop.xlane.xlu1 %1534  ;;  %v1532_v27 = vpop.xlane.xlu0 %1531  ;;  %vm5732_vm11 = vcmask 1047559  }
 0x431   :  { %v4765_v18 = vrot.slane %v2966_v29, %v6920_v19  ;;  %v4770_v11 = vrot.slane %v2967_v12, %v6927_v28  ;;  %v5693_v63 = vrot.slane %v3154_v0, %v6885_v48  ;;  %v2238_v33 = vpack.c.bf16 %v1535_v22, %v1532_v27 }
 0x432   :  { %v5698_v34 = vrot.slane %v3155_v21, %v6895_v56 }
 0x433   :  { %v4766_v40 = vsel %vm3262_vm14, %v4765_v18, %v8812_v53  ;;  %v5694_v6 = vsel %vm3234_vm10, %v5693_v63, %v9830_v62  ;;  %v2980_v30 = vunpack.c.l.b16 %v2238_v33  ;;  %v2981_v25 = vunpack.c.h.b16 %v2238_v33 }
 0x434   :  { %v4771_v54 = vsel %vm3269_vm15, %v4770_v11, %v4766_v40  ;;  %v9968_v43 = vsel %vm10192_vm1, %v5698_v34, %v5694_v6  ;;  %v1631_v59 = vpop.xlane.xlu1 %1630  ;;  %v1628_v35 = vpop.xlane.xlu0 %1627  ;;  %vm10202_vm1 = vmmov %vm10195_vm0 }
 0x435   :  { %v4834_v1 = vrot.slane %v2980_v30, %v6902_v3  ;;  %v4839_v14 = vrot.slane %v2981_v25, %v6905_v4  ;;  %v2254_v47 = vpack.c.bf16 %v1631_v59, %v1628_v35  ;;  %v9974_v53 = vsel %vm5726_vm13, %v4771_v54, %v8436_v41  ;;  %vm10194_vm13 = vmmov %vm10193_vm2 }
 0x437   :  { %v4835_v62 = vsel %vm3248_vm12, %v4834_v1, %v9849_v42  ;;  %v3012_v17 = vunpack.c.l.b16 %v2254_v47  ;;  %v3013_v7 = vunpack.c.h.b16 %v2254_v47 }
 0x438   :  { %v9979_v37 = vsel %vm10193_vm2, %v4839_v14, %v4835_v62  ;;  %v1775_v16 = vpop.xlane.xlu1 %1774  ;;  %v1772_v23 = vpop.xlane.xlu0 %1771  ;;  %vm10203_vm2 = vmmov %vm10195_vm0 }
 0x439   :  { %v4992_v8 = vrot.slane %v3012_v17, %v6902_v3  ;;  %v4997_v58 = vrot.slane %v3013_v7, %v6905_v4  ;;  %v2278_v2 = vpack.c.bf16 %v1775_v16, %v1772_v23 }
 0x43b   :  { %v4993_v13 = vsel %vm3248_vm12, %v4992_v8, %v9868_v52  ;;  %v3060_v41 = vunpack.c.l.b16 %v2278_v2  ;;  %v3061_v9 = vunpack.c.h.b16 %v2278_v2 }
 0x43c   :  { %v9986_v15 = vsel %vm10194_vm13, %v4997_v58, %v4993_v13  ;;  %v1871_v42 = vpop.xlane.xlu1 %1870  ;;  %v1868_v39 = vpop.xlane.xlu0 %1867  ;;  %vm10204_vm13 = vmmov %vm10195_vm0 }
 0x43d   :  { %v5229_v61 = vrot.slane %v3060_v41, %v6902_v3  ;;  %v5234_v32 = vrot.slane %v3061_v9, %v6905_v4  ;;  %v2294_v51 = vpack.c.bf16 %v1871_v42, %v1868_v39 }
 0x43f   :  { %v5230_v50 = vsel %vm3248_vm12, %v5229_v61, %v9887_v45  ;;  %v3092_v10 = vunpack.c.l.b16 %v2294_v51  ;;  %v3093_v38 = vunpack.c.h.b16 %v2294_v51 }
 0x440   :  { %v9993_v29 = vsel %vm10195_vm0, %v5234_v32, %v5230_v50  ;;  %v1913_v52 = vpop.xlane.xlu1 %1912  ;;  %v1910_v12 = vpop.xlane.xlu0 %1909 }
 0x441   :  { %v5387_v0 = vrot.slane %v3092_v10, %v6902_v3  ;;  %v5392_v21 = vrot.slane %v3093_v38, %v6905_v4  ;;  %v2301_v22 = vpack.c.bf16 %v1913_v52, %v1910_v12 }
 0x443   :  { %v5388_v27 = vsel %vm3248_vm12, %v5387_v0, %v9903_v44  ;;  %v3106_v18 = vunpack.c.l.b16 %v2301_v22  ;;  %v3107_v11 = vunpack.c.h.b16 %v2301_v22 }
 0x444   :  { %v10000_v63 = vsel %vm10196_vm3, %v5392_v21, %v5388_v27  ;;  %v2009_v45 = vpop.xlane.xlu1 %2008  ;;  %v2006_v33 = vpop.xlane.xlu0 %2005 }
 0x445   :  { %v5456_v34 = vrot.slane %v3106_v18, %v6885_v48  ;;  %v5461_v40 = vrot.slane %v3107_v11, %v6895_v56  ;;  %v2317_v6 = vpack.c.bf16 %v2009_v45, %v2006_v33 }
 0x447   :  { %v5457_v30 = vsel %vm3234_vm10, %v5456_v34, %v9913_v26  ;;  %v3138_v25 = vunpack.c.l.b16 %v2317_v6  ;;  %v3139_v54 = vunpack.c.h.b16 %v2317_v6 }
 0x448   :  { %v10007_v59 = vsel %vm10197_vm4, %v5461_v40, %v5457_v30  ;;  %v1589_v44 = vpop.xlane.xlu1 %1588  ;;  %v1586_v35 = vpop.xlane.xlu0 %1585 }
 0x449   :  { %v5614_v1 = vrot.slane %v3138_v25, %v6885_v48  ;;  %v5619_v14 = vrot.slane %v3139_v54, %v6895_v56  ;;  %v2247_v47 = vpack.c.bf16 %v1589_v44, %v1586_v35 }
 0x44b   :  { %v5615_v62 = vsel %vm3234_vm10, %v5614_v1, %v9920_v60  ;;  %v2998_v17 = vunpack.c.l.b16 %v2247_v47  ;;  %v2999_v7 = vunpack.c.h.b16 %v2247_v47  ;;  %vm5730_vm10 = vcmask 1046534  }
 0x44c   :  { %v10014_v16 = vsel %vm10198_vm5, %v5619_v14, %v5615_v62  ;;  %v1685_v26 = vpop.xlane.xlu1 %1684  ;;  %v1682_v23 = vpop.xlane.xlu0 %1681 }
 0x44d   :  { %v4923_v8 = vrot.slane %v2998_v17, %v6920_v19  ;;  %v4928_v58 = vrot.slane %v2999_v7, %v6927_v28  ;;  %v2263_v2 = vpack.c.bf16 %v1685_v26, %v1682_v23 }
 0x44f   :  { %v4924_v48 = vsel %vm3262_vm14, %v4923_v8, %v9927_v36  ;;  %v3030_v56 = vunpack.c.l.b16 %v2263_v2  ;;  %v3031_v13 = vunpack.c.h.b16 %v2263_v2 }
 0x450   :  { %v1727_v41 = vpop.xlane.xlu1 %1726  ;;  %v1724_v60 = vpop.xlane.xlu0 %1723  ;;  %v4929_v9 = vsel %vm3269_vm15, %v4928_v58, %v4924_v48 }
 0x451   :  { %v5081_v42 = vrot.slane %v3030_v56, %v6920_v19  ;;  %v5086_v39 = vrot.slane %v3031_v13, %v6927_v28  ;;  %v5738_v61 = vsel %vm5728_vm6, %v4929_v9, %v8634_v31 }
 0x453   :  { %v5082_v32 = vsel %vm3262_vm14, %v5081_v42, %v9934_v46 }
 0x454   :  { %v1823_v51 = vpop.xlane.xlu1 %1822  ;;  %v1820_v50 = vpop.xlane.xlu0 %1819  ;;  %v5087_v36 = vsel %vm3269_vm15, %v5086_v39, %v5082_v32 }
 0x455   :  { %v5752_v10 = vsel %vm5728_vm6, %v5087_v36, %v9974_v53 }
 0x458   :  { %v1967_v38 = vpop.xlane.xlu1 %1966  ;;  %v1964_v52 = vpop.xlane.xlu0 %1963 }
 0x45c   :  { %v2063_v12 = vpop.xlane.xlu1 %2062  ;;  %v2060_v0 = vpop.xlane.xlu0 %2059 }
 0x460   :  { %v1541_v21 = vpop.xlane.xlu1 %1540  ;;  %v1538_v22 = vpop.xlane.xlu0 %1537 }
 0x461   :  { %v2239_v27 = vpack.c.bf16 %v1541_v21, %v1538_v22  ;;  %v2286_v21 = vpack.c.bf16 %v1823_v51, %v1820_v50 }
 0x463   :  { %v2982_v18 = vunpack.c.l.b16 %v2239_v27  ;;  %v2983_v11 = vunpack.c.h.b16 %v2239_v27 }
 0x464   :  { %v1637_v31 = vpop.xlane.xlu1 %1636  ;;  %v1634_v45 = vpop.xlane.xlu0 %1633 }
 0x465   :  { %v4844_v46 = vrot.slane %v2982_v18, %v6920_v19  ;;  %v4849_v33 = vrot.slane %v2983_v11, %v6927_v28  ;;  %v2255_v34 = vpack.c.bf16 %v1637_v31, %v1634_v45  ;;  %v2310_v31 = vpack.c.bf16 %v1967_v38, %v1964_v52 }
 0x466   :  { %v3076_v45 = vunpack.c.l.b16 %v2286_v21 }
 0x467   :  { %v4845_v40 = vsel %vm3262_vm14, %v4844_v46, %v9979_v37  ;;  %v3014_v53 = vunpack.c.l.b16 %v2255_v34  ;;  %v3015_v6 = vunpack.c.h.b16 %v2255_v34  ;;  %v2326_v46 = vpack.c.bf16 %v2063_v12, %v2060_v0 }
 0x468   :  { %v4850_v30 = vsel %vm3269_vm15, %v4849_v33, %v4845_v40  ;;  %v1781_v25 = vpop.xlane.xlu1 %1780  ;;  %v1778_v54 = vpop.xlane.xlu0 %1777  ;;  %v3077_v34 = vunpack.c.h.b16 %v2286_v21  ;;  %v3124_v40 = vunpack.c.l.b16 %v2310_v31 }
 0x469   :  { %v5002_v44 = vrot.slane %v3014_v53, %v6920_v19  ;;  %v5007_v35 = vrot.slane %v3015_v6, %v6927_v28  ;;  %v2279_v1 = vpack.c.bf16 %v1781_v25, %v1778_v54  ;;  %v10039_v14 = vsel %vm5728_vm6, %v4850_v30, %v8535_v5 }
 0x46a   :  { %v2270_v5 = vpack.c.bf16 %v1727_v41, %v1724_v60  ;;  %v5308_v53 = vrot.slane %v3076_v45, %v6902_v3  ;;  %v3156_v30 = vunpack.c.l.b16 %v2326_v46 }
 0x46b   :  { %v5003_v47 = vsel %vm3262_vm14, %v5002_v44, %v9986_v15  ;;  %v3062_v62 = vunpack.c.l.b16 %v2279_v1  ;;  %v3063_v37 = vunpack.c.h.b16 %v2279_v1  ;;  %v5313_v44 = vrot.slane %v3077_v34, %v6905_v4 }
 0x46c   :  { %v5008_v17 = vsel %vm3269_vm15, %v5007_v35, %v5003_v47  ;;  %v1877_v7 = vpop.xlane.xlu1 %1876  ;;  %v1874_v26 = vpop.xlane.xlu0 %1873  ;;  %v3045_v27 = vunpack.c.h.b16 %v2270_v5  ;;  %v3125_v35 = vunpack.c.h.b16 %v2310_v31  ;;  %v5309_v47 = vsel %vm3248_vm12, %v5308_v53, %v9948_v24 }
 0x46d   :  { %v5239_v23 = vrot.slane %v3062_v62, %v6920_v19  ;;  %v5244_v8 = vrot.slane %v3063_v37, %v6927_v28  ;;  %v2295_v58 = vpack.c.bf16 %v1877_v7, %v1874_v26  ;;  %v10048_v2 = vsel %vm5728_vm6, %v5008_v17, %v8733_v55 }
 0x46e   :  { %v3044_v55 = vunpack.c.l.b16 %v2270_v5  ;;  %v5155_v51 = vrot.slane %v3045_v27, %v6905_v4  ;;  %v3157_v7 = vunpack.c.h.b16 %v2326_v46  ;;  %v5703_v26 = vrot.slane %v3156_v30, %v6902_v3 }
 0x46f   :  { %v3094_v48 = vunpack.c.l.b16 %v2295_v58  ;;  %v3095_v56 = vunpack.c.h.b16 %v2295_v58  ;;  %v5240_v15 = vsel %vm3262_vm14, %v5239_v23, %v9993_v29  ;;  %v5314_v24 = vsel %vm10200_vm8, %v5313_v44, %v5309_v47 }
 0x470   :  { %v1919_v13 = vpop.xlane.xlu1 %1918  ;;  %v1916_v9 = vpop.xlane.xlu0 %1915  ;;  %v5245_v42 = vsel %vm3269_vm15, %v5244_v8, %v5240_v15  ;;  %v5150_v11 = vrot.slane %v3044_v55, %v6902_v3 }
 0x471   :  { %v5397_v39 = vrot.slane %v3094_v48, %v6920_v19  ;;  %v5402_v32 = vrot.slane %v3095_v56, %v6927_v28  ;;  %v10056_v36 = vsel %vm5730_vm10, %v5245_v42, %v5738_v61  ;;  %v2302_v1 = vpack.c.bf16 %v1919_v13, %v1916_v9 }
 0x472   :  { %v5550_v9 = vrot.slane %v3125_v35, %v6905_v4 }
 0x473   :  { %v5398_v41 = vsel %vm3262_vm14, %v5397_v39, %v10000_v63  ;;  %v5151_v63 = vsel %vm3248_vm12, %v5150_v11, %v9941_v49  ;;  %v5545_v49 = vrot.slane %v3124_v40, %v6902_v3  ;;  %v3108_v42 = vunpack.c.l.b16 %v2302_v1 }
 0x474   :  { %v2015_v60 = vpop.xlane.xlu1 %2014  ;;  %v2012_v22 = vpop.xlane.xlu0 %2011  ;;  %v5403_v29 = vsel %vm3269_vm15, %v5402_v32, %v5398_v41  ;;  %v5156_v38 = vsel %vm10199_vm7, %v5155_v51, %v5151_v63  ;;  %v5704_v41 = vsel %vm3248_vm12, %v5703_v26, %v9968_v43 }
 0x475   :  { %v10062_v18 = vsel %vm5730_vm10, %v5403_v29, %v5752_v10  ;;  %v5546_v13 = vsel %vm3248_vm12, %v5545_v49, %v9956_v57  ;;  %v2318_v39 = vpack.c.bf16 %v2015_v60, %v2012_v22  ;;  %v5708_v29 = vrot.slane %v3157_v7, %v6905_v4 }
 0x476   :  { %v3109_v22 = vunpack.c.h.b16 %v2302_v1  ;;  %v5466_v46 = vrot.slane %v3108_v42, %v6902_v3 }
 0x477   :  { %v3140_v43 = vunpack.c.l.b16 %v2318_v39  ;;  %v5709_v53 = vsel %vm10202_vm1, %v5708_v29, %v5704_v41 }
 0x478   :  { %v1733_v61 = vpop.xlane.xlu1 %1732  ;;  %v1730_v33 = vpop.xlane.xlu0 %1729 }
 0x479   :  { %v2271_v50 = vpack.c.bf16 %v1733_v61, %v1730_v33  ;;  %v5551_v61 = vsel %vm10201_vm9, %v5550_v9, %v5546_v13 }
 0x47b   :  { %v3046_v6 = vunpack.c.l.b16 %v2271_v50  ;;  %v3047_v10 = vunpack.c.h.b16 %v2271_v50 }
 0x47c   :  { %v1829_v25 = vpop.xlane.xlu1 %1828  ;;  %v1826_v54 = vpop.xlane.xlu0 %1825 }
 0x47d   :  { %v5160_v52 = vrot.slane %v3046_v6, %v6920_v19  ;;  %v5165_v12 = vrot.slane %v3047_v10, %v6927_v28  ;;  %v2287_v0 = vpack.c.bf16 %v1829_v25, %v1826_v54  ;;  %v5467_v25 = vsel %vm3248_vm12, %v5466_v46, %v10007_v59 }
 0x47e   :  { %v5471_v54 = vrot.slane %v3109_v22, %v6905_v4 }
 0x47f   :  { %v5161_v62 = vsel %vm3262_vm14, %v5160_v52, %v5156_v38  ;;  %v3078_v37 = vunpack.c.l.b16 %v2287_v0  ;;  %v3079_v17 = vunpack.c.h.b16 %v2287_v0  ;;  %v3141_v38 = vunpack.c.h.b16 %v2318_v39 }
 0x480   :  { %v1973_v23 = vpop.xlane.xlu1 %1972  ;;  %v1970_v8 = vpop.xlane.xlu0 %1969  ;;  %v5166_v58 = vsel %vm3269_vm15, %v5165_v12, %v5161_v62  ;;  %v5624_v12 = vrot.slane %v3140_v43, %v6902_v3 }
 0x481   :  { %v5318_v5 = vrot.slane %v3078_v37, %v6920_v19  ;;  %v5323_v48 = vrot.slane %v3079_v17, %v6927_v28  ;;  %v2311_v56 = vpack.c.bf16 %v1973_v23, %v1970_v8  ;;  %v5731_v15 = vsel %vm5730_vm10, %v5166_v58, %v10039_v14 }
 0x482   :  { %v5472_v17 = vsel %vm10203_vm2, %v5471_v54, %v5467_v25  ;;  %v5629_v3 = vrot.slane %v3141_v38, %v6905_v4  ;;  %v5625_v26 = vsel %vm3248_vm12, %v5624_v12, %v10014_v16 }
 0x483   :  { %v5319_v32 = vsel %vm3262_vm14, %v5318_v5, %v5314_v24  ;;  %v3126_v55 = vunpack.c.l.b16 %v2311_v56  ;;  %v3127_v21 = vunpack.c.h.b16 %v2311_v56 }
 0x484   :  { %v2069_v27 = vpop.xlane.xlu1 %2068  ;;  %v2066_v14 = vpop.xlane.xlu0 %2065  ;;  %v5324_v11 = vsel %vm3269_vm15, %v5323_v48, %v5319_v32  ;;  %v5630_v24 = vsel %vm10204_vm13, %v5629_v3, %v5625_v26 }
 0x485   :  { %v5555_v31 = vrot.slane %v3126_v55, %v6920_v19  ;;  %v5560_v57 = vrot.slane %v3127_v21, %v6927_v28  ;;  %v2327_v45 = vpack.c.bf16 %v2069_v27, %v2066_v14  ;;  %v5746_v60 = vsel %vm5730_vm10, %v5324_v11, %v10048_v2  ;;  %v6173_v27 = vld [vmem:[%s10151_s2 + $0x8] sm:$0xff] }
 0x487   :  { %v3158_v33 = vunpack.c.l.b16 %v2327_v45  ;;  %v3159_v51 = vunpack.c.h.b16 %v2327_v45  ;;  %v5556_v50 = vsel %vm3262_vm14, %v5555_v31, %v5551_v61 }
 0x488   :  { %v1925_v63 = vpop.xlane.xlu1 %1924  ;;  %v1922_v34 = vpop.xlane.xlu0 %1921  ;;  %v5561_v40 = vsel %vm3269_vm15, %v5560_v57, %v5556_v50 }
 0x489   :  { %v5713_v6 = vrot.slane %v3158_v33, %v6920_v19  ;;  %v5718_v2 = vrot.slane %v3159_v51, %v6927_v28  ;;  %v2303_v10 = vpack.c.bf16 %v1925_v63, %v1922_v34  ;;  %v5740_v30 = vsel %vm5732_vm11, %v5561_v40, %v10056_v36 }
 0x48a   :  { %v5756_v52 = vpack.c.b16 %v5740_v30, %v5740_v30 }
 0x48b   :  { %v3110_v0 = vunpack.c.l.b16 %v2303_v10  ;;  %v3111_v44 = vunpack.c.h.b16 %v2303_v10  ;;  %v5714_v35 = vsel %vm3262_vm14, %v5713_v6, %v5709_v53 }
 0x48c   :  { %v2021_v49 = vpop.xlane.xlu1 %2020  ;;  %6115 = vmatprep.mubr.bf16.mxu0 %v5756_v52  ;;  %v2018_v1 = vpop.xlane.xlu0 %2017  ;;  %v5719_v47 = vsel %vm3269_vm15, %v5718_v2, %v5714_v35 }
 0x48d   :  { %v5476_v36 = vrot.slane %v3110_v0, %v6920_v19  ;;  %v5481_v62 = vrot.slane %v3111_v44, %v6927_v28  ;;  %v2319_v59 = vpack.c.bf16 %v2021_v49, %v2018_v1  ;;  %v5754_v37 = vsel %vm5732_vm11, %v5719_v47, %v10062_v18 }
 0x48e   :  { %v5758_v7 = vpack.c.b16 %v5754_v37, %v5754_v37 }
 0x48f   :  { %v3142_v23 = vunpack.c.l.b16 %v2319_v59  ;;  %v3143_v8 = vunpack.c.h.b16 %v2319_v59  ;;  %v5477_v58 = vsel %vm3262_vm14, %v5476_v36, %v5472_v17 }
 0x490   :  { %6156 = vmatprep.mubr.bf16.mxu1 %v5758_v7  ;;  %v5482_v5 = vsel %vm3269_vm15, %v5481_v62, %v5477_v58 }
 0x491   :  { %v5634_v48 = vrot.slane %v3142_v23, %v6920_v19  ;;  %v5639_v56 = vrot.slane %v3143_v8, %v6927_v28  ;;  %v5733_v18 = vsel %vm5732_vm11, %v5482_v5, %v5731_v15  ;;  %v6180_v28 = vsub.s32 0, %v6780_v20  ;;  %v6172_v15 = vld [vmem:[%s10151_s2] sm:$0xff]  ;;  %s6463_s2 = smov [#allocation2]  }
 0x492   :  { %v5755_v4 = vpack.c.b16 %v5733_v18, %v5733_v18  ;;  %v6239_v18 = vsub.s32 1, %v6780_v20  ;;  %s6265_s4 = sshll.u32 %s6463_s2, 4  ;;  %s6266_s4 = int_to_ptr.vmem [resolvable:$true] %s6265_s4 }
 0x493   :  { %v5635_v13 = vsel %vm3262_vm14, %v5634_v48, %v5630_v24  ;;  %v6181_v57 = vrot.slane %v6172_v15, %v6180_v28  ;;  %v6185_v45 = vrot.slane %v6173_v27, %v6180_v28  ;;  %s6439_s5 = scalar_lea.vmem %s6266_s4, 256  ;;  %p6444_p1 = scmp.lt.s32.totalorder %s6266_s4, %s6266_s4 }
 0x494   :  { %6116 = vmatmul.mubr.bf16.vlgmr.msra.gmra.mrb[0].mxu0 %v5755_v4  ;;  %v5640_v16 = vsel %vm3269_vm15, %v5639_v56, %v5635_v13  ;;  %p6440_p0 = scmp.ne.s32.totalorder %s6266_s4, %s6439_s5  ;;  %p6445_p2 = scmp.lt.s32.totalorder %s6439_s5, %s6439_s5 }
 0x495   :  { %v5747_v9 = vsel %vm5732_vm11, %v5640_v16, %v5746_v60 }
 0x496   :  { %v5757_v42 = vpack.c.b16 %v5747_v9, %v5747_v9  ;;  %p6446_p3 = por %p6445_p2, %p6444_p1 }
 0x498   :  { %6157 = vmatmul.mubr.bf16.vlgmr.msra.gmra.mrb[0].mxu1 %v5757_v42  ;;  %v6249_v42 = vsub.s32 2, %v6780_v20  ;;  %p6447_p4 = pnand %p6446_p3, %p6440_p0 }
 0x567   :  { %v6117_v39 = vpop.f32.mrb[0].mxu0 }
 0x568   :  { %v6119_v32 = vpop.f32.mrb[1].mxu0 }
 0x569   :  { %v6121_v55 = vpop.f32.mrb[2].mxu0 }
 0x56a   :  { %v6122_v19 = vpop.f32.mrb[3].mxu0 }
 0x56b   :  { %v6158_v21 = vpop.f32.mrb[0].mxu1 }
 0x56c   :  { %v6159_v41 = vadd.f32 %v6158_v21, %v6117_v39  ;;  %v6160_v29 = vpop.f32.mrb[1].mxu1 }
 0x56d   :  { %v6161_v14 = vadd.f32 %v6160_v29, %v6119_v32  ;;  %v6162_v11 = vpop.f32.mrb[2].mxu1 }
 0x56e   :  { %v6163_v31 = vpop.f32.mrb[3].mxu1  ;;  %v6176_v60 = vmul.f32 0.0625, %v6159_v41 }
 0x56f   :  { %v6177_v22 = vmul.f32 0.0625, %v6161_v14 }
 0x570   :  { %v6186_v46 = vadd.f32 %v6181_v57, %v6176_v60 }
 0x571   :  { %v6187_v61 = vadd.f32 %v6185_v45, %v6177_v22 }
 0x572   :  { %v6188_v43 = vrot.slane %v6186_v46, 4 }
 0x573   :  { %v6194_v33 = vrot.slane %v6187_v61, 4 }
 0x574   :  { %v6189_v51 = vadd.f32 %v6188_v43, %v6186_v46 }
 0x575   :  { %v6195_v50 = vadd.f32 %v6194_v33, %v6187_v61 }
 0x576   :  { %v6190_v63 = vrot.slane %v6189_v51, 2 }
 0x577   :  { %v6196_v34 = vrot.slane %v6195_v50, 2 }
 0x578   :  { %v6191_v40 = vadd.f32 %v6190_v63, %v6189_v51 }
 0x579   :  { %v6197_v53 = vadd.f32 %v6196_v34, %v6195_v50 }
 0x57a   :  { %v6192_v6 = vrot.slane %v6191_v40, 1 }
 0x57b   :  { %v6198_v2 = vrot.slane %v6197_v53, 1 }
 0x57c   :  { %v6193_v10 = vadd.f32 %v6192_v6, %v6191_v40 }
 0x57d   :  { %v6199_v30 = vadd.f32 %v6198_v2, %v6197_v53 }
 0x57e   :  { %v6201_v25 = vmul.f32 0.125, %v6193_v10 }
 0x57f   :  { %v6202_v54 = vmul.f32 0.125, %v6199_v30 }
 0x580   :  { %v6203_v38 = vsub.f32 %v6186_v46, %v6201_v25 }
 0x581   :  { %v6204_v52 = vsub.f32 %v6187_v61, %v6202_v54 }
 0x582   :  { %v6205_v12 = vmul.f32 %v6203_v38, %v6203_v38 }
 0x583   :  { %v6206_v0 = vmul.f32 %v6204_v52, %v6204_v52 }
 0x584   :  { %v6207_v44 = vrot.slane %v6205_v12, 4 }
 0x585   :  { %v6213_v35 = vrot.slane %v6206_v0, 4 }
 0x586   :  { %v6208_v49 = vadd.f32 %v6207_v44, %v6205_v12 }
 0x587   :  { %v6214_v1 = vadd.f32 %v6213_v35, %v6206_v0 }
 0x588   :  { %v6209_v47 = vrot.slane %v6208_v49, 2 }
 0x589   :  { %v6215_v36 = vrot.slane %v6214_v1, 2 }
 0x58a   :  { %v6210_v62 = vadd.f32 %v6209_v47, %v6208_v49 }
 0x58b   :  { %v6216_v59 = vadd.f32 %v6215_v36, %v6214_v1 }
 0x58c   :  { %v6211_v37 = vrot.slane %v6210_v62, 1 }
 0x58d   :  { %v6217_v17 = vrot.slane %v6216_v59, 1 }
 0x58e   :  { %v6212_v3 = vadd.f32 %v6211_v37, %v6210_v62 }
 0x58f   :  { %v6218_v7 = vadd.f32 %v6217_v17, %v6216_v59 }
 0x590   :  { %v6219_v26 = vmul.f32 0.125, %v6212_v3 }
 0x591   :  { %v6220_v23 = vmul.f32 0.125, %v6218_v7 }
 0x592   :  { %v6221_v8 = vadd.f32 1e-05, %v6219_v26 }
 0x593   :  { %v6222_v58 = vadd.f32 1e-05, %v6220_v23 }
 0x594   :  { %6435 = vrsqrt.f32 %v6221_v8 }
 0x595   :  { %6437 = vrsqrt.f32 %v6222_v58 }
 0x59e   :  { %v6436_v5 = vpop.eup %6435 }
 0x59f   :  { %v6438_v48 = vpop.eup %6437  ;;  %v6225_v56 = vmul.f32 %v6436_v5, %v6172_v15 }
 0x5a0   :  { %v6226_v24 = vmul.f32 %v6438_v48, %v6173_v27 }
 0x5a1   :  { %v6227_v4 = vmul.f32 %v6225_v56, %v6201_v25  ;;  %v6240_v9 = vrot.slane %v6225_v56, %v6239_v18 }
 0x5a2   :  { %v6228_v13 = vmul.f32 %v6226_v24, %v6202_v54  ;;  %v6244_v32 = vrot.slane %v6226_v24, %v6239_v18 }
 0x5a3   :  { %v6231_v16 = vrot.slane %v6227_v4, 7  ;;  %v6245_v28 = vmul.f32 %v6240_v9, %v6186_v46 }
 0x5a4   :  { %v6232_v39 = vrot.slane %v6228_v13, 7  ;;  %v6246_v41 = vmul.f32 %v6244_v32, %v6187_v61 }
 0x5a5   :  { %v6235_v55 = vsub.f32 %v6172_v15, %v6231_v16 }
 0x5a6   :  { %v6236_v19 = vsub.f32 %v6173_v27, %v6232_v39 }
 0x5a7   :  { %v6250_v21 = vrot.slane %v6235_v55, %v6249_v42 }
 0x5a8   :  { %v6254_v29 = vrot.slane %v6236_v19, %v6249_v42 }
 0x5a9   :  { %v6255_v14 = vadd.f32 %v6250_v21, %v6245_v28 }
 0x5aa   :  { %v6256_v11 = vadd.f32 %v6254_v29, %v6246_v41 }
 0x5ab   :  { %6257 = vst [vmem:[#allocation2] sm:$0xff] %v6255_v14 }
 0x5ac   :  { %6258 = vst [vmem:[#allocation2 + $0x8] sm:$0xff] %v6256_v11 }
 0x5ad   :  { %6450 = shalt.err (!%p6447_p4)
}
 0x5ae   :  { %s6451_s8 = scalar_lea.hbm %s10152_s3, 256 }
 0x5af   :  { %p6452_p5 = scmp.ne.s32.totalorder %s10152_s3, %s6451_s8  ;;  %p6455_p6 = scmp.lt.u32.totalorder %s6451_s8, %s10152_s3 }
 0x5b1   :  { %p6457_p7 = pnand %p6455_p6, %p6452_p5 }
 0x5b3   :  { %6460 = shalt.err (!%p6457_p7)
}
 0x5b4   :  { %6268 = dma.vmem_to_hbm [thread:$0]  %s6266_s4, 256, %s10152_s3, [#allocation3]  }
 0x5b5   :  { %6461 = dma.done.wait [#allocation3], 256  }
 0x5b6   :  { %6462 = vsyncadd [#allocation3], 4294967040 }
 0x5b7   :  { %6272 = vsyncpa [#allocation3], 1 }

</bundles_post_ra>
